<compile_context>
chip_gen: v6e
topology: v6e:2x2x1
jax: 0.10.0
libtpu: 0.0.40
codegen_flags: <defaults>
</compile_context>

<pallas_src>
import jax
import jax.numpy as jnp
from jax import lax
from jax.experimental import pallas as pl
from jax.experimental.pallas import tpu as pltpu


def linear_kernel(x_ref, w_ref, b_ref, o_ref):
    # x_ref: (M, K) full rows
    # w_ref: (tn, K) row tile of the PyTorch-layout weight (Cout, Cin)
    # b_ref: (1, tn) bias tile
    # o_ref: (M, tn) output tile
    acc = lax.dot_general(
        x_ref[...], w_ref[...],
        dimension_numbers=(((1,), (1,)), ((), ())),  # contract K with K (no transpose)
        preferred_element_type=jnp.float32,
    )
    o_ref[...] = (acc + b_ref[...].astype(jnp.float32)).astype(o_ref.dtype)


def pallas_linear(x2d, weight, bias, *, tn=384):
    """x2d: (M, K) f32, weight: (N, K) f32 (PyTorch layout), bias: (N,) -> (M, N)."""
    M, K = x2d.shape
    N, K2 = weight.shape
    assert K == K2 and N % tn == 0
    b2 = bias.reshape(1, N)

    cost = pl.CostEstimate(
        flops=2 * M * K * N,
        bytes_accessed=4 * (M * K + K * N + M * N + N),
        transcendentals=0,
    )

    return pl.pallas_call(
        linear_kernel,
        out_shape=jax.ShapeDtypeStruct((M, N), x2d.dtype),
        grid_spec=pltpu.PrefetchScalarGridSpec(
            num_scalar_prefetch=0,
            grid=(N // tn,),
            in_specs=[
                pl.BlockSpec((M, K), lambda j: (0, 0)),    # all rows, full K
                pl.BlockSpec((tn, K), lambda j: (j, 0)),   # weight row tile (Cout slice)
                pl.BlockSpec((1, tn), lambda j: (0, j)),   # bias tile
            ],
            out_specs=pl.BlockSpec((M, tn), lambda j: (0, j)),
        ),
        compiler_params=pltpu.CompilerParams(
            dimension_semantics=("parallel",)),
        cost_estimate=cost,
    )(x2d, weight, b2)


@jax.jit
def forward(x, weight, bias):
    """x: (B, H, W, Cin); weight: (Cout, Cin) (PyTorch convention); bias: (Cout,)."""
    B, H, W, Cin = x.shape
    Cout = weight.shape[0]
    x2d = x.reshape(B * H * W, Cin)
    y2d = pallas_linear(x2d, weight, bias)
    return y2d.reshape(B, H, W, Cout)


if __name__ == "__main__":
    key = jax.random.PRNGKey(0)
    kx, kw, kb = jax.random.split(key, 3)

    B, H, W = 1, 7, 7
    Cin, Cout = 3072, 768

    # Deterministic synthetic parameters (shapes from Linear(3072, 768)).
    x = jax.random.normal(kx, (B, H, W, Cin), dtype=jnp.float32)
    weight = jax.random.normal(kw, (Cout, Cin), dtype=jnp.float32) * 0.02
    bias = jax.random.normal(kb, (Cout,), dtype=jnp.float32) * 0.02

    y = forward(x, weight, bias)
    y = jax.block_until_ready(y)

    # Reference check against plain JAX.
    y_ref = jnp.einsum("bhwc,oc->bhwo", x, weight) + bias
    assert y.shape == (B, H, W, Cout)
    assert jnp.allclose(y, y_ref, atol=1e-3, rtol=1e-3)

    print("KERNEL_OK")
</pallas_src>

<mosaic_0001>
module attributes {stable_mosaic.version = 11 : i64} {
  func.func @linear_kernel(%arg0: i32, %arg1: memref<49x3072xf32, #tpu.memory_space<vmem>>, %arg2: memref<384x3072xf32, #tpu.memory_space<vmem>>, %arg3: memref<1x384xf32, #tpu.memory_space<vmem>>, %arg4: memref<49x384xf32, #tpu.memory_space<vmem>>) attributes {dimension_semantics = [#tpu.dimension_semantics<parallel>], iteration_bounds = array<i64: 2>, scalar_prefetch = 0 : i64, scratch_operands = 0 : i64, tpu.core_type = #tpu.core_type<tc>, window_params = [{pipeline_mode = #tpu.pipeline_mode<synchronous>, transform_indices = @transform_0, window_bounds = array<i64: 49, 3072>}, {transform_indices = @transform_1, window_bounds = array<i64: 384, 3072>}, {transform_indices = @transform_2, window_bounds = array<i64: 1, 384>}, {transform_indices = @transform_3, window_bounds = array<i64: 49, 384>}]} {
    %c0 = arith.constant 0 : index
    %c0_0 = arith.constant 0 : index
    %0 = vector.load %arg1[%c0, %c0_0] : memref<49x3072xf32, #tpu.memory_space<vmem>>, vector<49x3072xf32>
    %c0_1 = arith.constant 0 : index
    %c0_2 = arith.constant 0 : index
    %1 = vector.load %arg2[%c0_1, %c0_2] : memref<384x3072xf32, #tpu.memory_space<vmem>>, vector<384x3072xf32>
    %cst = arith.constant dense<0.000000e+00> : vector<49x384xf32>
    %2 = tpu.matmul %0, %1, %cst {dimension_numbers = #tpu.dot_dimension_numbers<[1], [1], [0], [0], [0, 0, 1, 0], [], []>} : vector<49x3072xf32>, vector<384x3072xf32>, vector<49x384xf32> -> vector<49x384xf32>
    %c0_3 = arith.constant 0 : index
    %c0_4 = arith.constant 0 : index
    %3 = vector.load %arg3[%c0_3, %c0_4] : memref<1x384xf32, #tpu.memory_space<vmem>>, vector<1x384xf32>
    %4 = vector.broadcast %3 : vector<1x384xf32> to vector<49x384xf32>
    %5 = arith.addf %2, %4 : vector<49x384xf32>
    %c0_5 = arith.constant 0 : index
    %c0_6 = arith.constant 0 : index
    %6 = vector.load %arg4[%c0_5, %c0_6] : memref<49x384xf32, #tpu.memory_space<vmem>>, vector<49x384xf32>
    tpu.vector_store %arg4[%c0_5, %c0_6], %5 {strides = array<i32>} : memref<49x384xf32, #tpu.memory_space<vmem>>, vector<49x384xf32>,
    return
  }
  func.func @transform_0(%arg0: i32) -> (i32, i32) {
    %c0_i32 = arith.constant 0 : i32
    %c0_i32_0 = arith.constant 0 : i32
    %c0_i32_1 = arith.constant 0 : i32
    return %c0_i32, %c0_i32_0 : i32, i32
  }
  func.func @transform_1(%arg0: i32) -> (i32, i32) {
    %c0_i32 = arith.constant 0 : i32
    %c0_i32_0 = arith.constant 0 : i32
    return %arg0, %c0_i32 : i32, i32
  }
  func.func @transform_2(%arg0: i32) -> (i32, i32) {
    %c0_i32 = arith.constant 0 : i32
    %c0_i32_0 = arith.constant 0 : i32
    return %c0_i32, %arg0 : i32, i32
  }
  func.func @transform_3(%arg0: i32) -> (i32, i32) {
    %c0_i32 = arith.constant 0 : i32
    %c0_i32_0 = arith.constant 0 : i32
    return %c0_i32, %arg0 : i32, i32
  }
}

</mosaic_0001>

<bundles_post_ra>
// kernel: forward.1
= control target key start
LH: loop header
LB: loop body
LE: loop exit
PB: predicated region body
PF: predicated region fallthrough
CT: control target
= control target key end

     0   :  { %8 = vsyncpa [#allocation3], 0  ;;  %s7303_s0 = inlined_call_operand.vmem [shape: f32[49,3072], index: 0, kind: input, shape index: {}]   ;;  %s7304_s1 = inlined_call_operand.hbm [shape: f32[768,3072], index: 1, kind: input, shape index: {}]   ;;  %s7305_s2 = inlined_call_operand.vmem [shape: f32[1,768], index: 2, kind: input, shape index: {}]   ;;  %s7306_s3 = inlined_call_operand.vmem [shape: f32[49,768], index: 3, kind: output, shape index: {}]  }
   0x1   :  { %10 = vsyncpa [#allocation3 + $0x1], 0  ;;  %s4498_s12 = smov 0   ;;  %s4500_s13 = smov 0  }
   0x2   :  { %s4502_s14 = smov 0   ;;  %s4504_s15 = smov 0  }
   0x3 LB: > { %s4517_s16 = sadd.s32 4294967295, %s4473_s15   ;;  %s4520_s17 = sadd.s32 1, %s4473_s15   ;;  %s4473_s15 = sphi %s4504_s15, %s7408_s15   ;;  %s4469_s14 = sphi %s4502_s14, %s7407_s14   ;;  %s4465_s13 = sphi %s4500_s13, %s7406_s13   ;;  %s4461_s12 = sphi %s4498_s12, %s7405_s12  }
   0x4   : > { %s41_s18 = ssub.s32 %s4473_s15, %s4520_s17  ;;  %s44_s19 = sadd.s32 1, %s4469_s14 }
   0x5   : > { %p42_p0 = scmp.eq.s32.totalorder %s41_s18, 0  ;;  %p51_p1 = scmp.ne.s32.totalorder %s4469_s14, %s4465_s13 }
   0x6   : > { %p52_p2 = scmp.eq.s32.totalorder %s4473_s15, 0  ;;  %p57_p3 = scmp.ne.s32.totalorder %s4465_s13, %s4461_s12 }
   0x7   : > { %s4530_s20 = scalar_select %p42_p0, %s4469_s14, %s44_s19  }
   0x8   : > { %p53_p4 = por %p52_p2, %p51_p1  ;;  %p58_p5 = scmp.eq.s32.totalorder %s4517_s16, 0 }
   0x9   : > { %p107_p6 = scmp.eq.s32.totalorder %s4517_s16, 1  ;;  %p4206_p8 = scmp.lt.s32.totalorder %s4473_s15, 2 }
   0xa   : > { %p4534_p7 = por %p58_p5, %p57_p3  ;;  %s136_s23 = sand.u32 1, %s4469_s14  }
   0xb   : > { %p4539_p9 = por %p107_p6, %p51_p1  ;;  %s4196_s24 = smul.u32 9216, %s136_s23 }
   0xc   : > { %s7310_s21 = scalar_select %p4534_p7, 1, 0 }
   0xd   : > { %s7311_s22 = scalar_select %p4539_p9, 1, 0 }
   0xe   : > { %p4544_p10 = pnand %p4206_p8, %p53_p4  ;;  %s4207_s26 = smul.u32 147456, %s4473_s15 }
   0xf   : > { %s140_s27 = scalar_lea.vmem [#allocation2], %s4196_s24  ;;  %s4556_s5 = scalar_lea.sflag [#allocation3], %s136_s23 }
  0x10   : > { %s148_s28 = sshll.u32 %s140_s27, 4  ;;  %s4552_s4 = scalar_lea.hbm %s7304_s1, %s4207_s26  ;;  %s4554_s28 = int_to_ptr.vmem [resolvable:$true] %s148_s28 }
  0x11   : > { %s4411_s6 = scalar_lea.hbm %s4552_s4, 147456  ;;  %p4413_p12 = pneg %p4544_p10 }
  0x12   : > { %p4412_p11 = scmp.ne.s32.totalorder %s4552_s4, %s4411_s6  ;;  %s4416_s9 = scalar_lea.hbm %s7304_s1, 294912 }
  0x13   : > { %p4417_p1 = scmp.lt.s32.totalorder %s4552_s4, %s7304_s1  ;;  %p4418_p2 = scmp.lt.s32.totalorder %s4416_s9, %s4411_s6 }
  0x14   : > { %p4414_p13 = pnand %p4413_p12, %p4412_p11 }
  0x15   : > { %p4419_p3 = por %p4418_p2, %p4417_p1 }
  0x16   : > { %p4415_p0 = pneg %p4414_p13 }
  0x18   : > { %p4420_p4 = pnand %p4419_p3, %p4415_p0 }
  0x1a   : > { %4423 = shalt.err (!%p4420_p4)
}
  0x1b   : > { %s4424_s12 = scalar_lea.vmem %s4554_s28, 147456  ;;  %s4475_s18 = smov [#allocation2]  }
  0x1c   : > { %p4425_p5 = scmp.ne.s32.totalorder %s4554_s28, %s4424_s12  ;;  %s4429_s19 = sshll.u32 %s4475_s18, 4  ;;  %s4430_s19 = int_to_ptr.vmem [resolvable:$false] %s4429_s19 }
  0x1d   : > { %s4431_s23 = scalar_lea.vmem %s4430_s19, 294912  ;;  %p4432_p11 = scmp.lt.s32.totalorder %s4554_s28, %s4430_s19 }
  0x1e   : > { %p4427_p6 = pnand %p4425_p5, %p4413_p12  ;;  %p4433_p13 = scmp.lt.s32.totalorder %s4431_s23, %s4424_s12 }
  0x20   : > { %p4428_p8 = pneg %p4427_p6  ;;  %p4434_p9 = por %p4433_p13, %p4432_p11 }
  0x22   : > { %p4435_p7 = pnand %p4434_p9, %p4428_p8 }
  0x24   : > { %4438 = shalt.err (!%p4435_p7)
}
  0x25   : > { %s4476_s24 = smov 3072   ;;  %s4477_s26 = smov 192  }
  0x26   : > { %4205 = dma.hbm_to_vmem [thread:$0]  (!%p4544_p10), %s4552_s4, 147456, %s4554_s28, %s4556_s5, %s4476_s24, %s4476_s24, %s4477_s26  }
  0x27   : > { %p4191_p12 = scmp.ge.s32.totalorder %s4473_s15, 1  ;;  %p164_p0 = scmp.lt.s32.totalorder %s4473_s15, 3 }
  0x29   : > { %p165_p1 = pnand %p4191_p12, %p164_p0 }
  0x2b   : > { %168 = sbr.rel (%p165_p1) target bundleno = 1436 (0x59c), region = 32 }
  0x30   : > { %s4580_s27 = sand.u32 1, %s4465_s13   ;;  %p7313_p7 = scmp.ne.s32.totalorder %s7310_s21, 0 }
  0x31   : > { %s4198_s29 = smul.u32 9216, %s4580_s27  ;;  %s171_s30 = scalar_lea.sflag [#allocation3], %s4580_s27 }
  0x33   : > { %s4584_s6 = scalar_lea.vmem [#allocation2], %s4198_s29 }
  0x34   : > { %4456 = dma.done.wait (%p7313_p7), %s171_s30, 147456  }
  0x35   : > { %4458 = vsyncadd (%p7313_p7), %s171_s30, 4294819840  ;;  %v736_v0 = vld [vmem:[%s4584_s6 + $0xb48] sm:$0xff]  ;;  %v738_v1 = vld [vmem:[%s4584_s6 + $0xb58] sm:$0xff]  ;;  %s201_s25 = smul.u32 3, %s4517_s16  ;;  %p7404_p10 = scmp.ne.s32.totalorder %s7311_s22, 0 }
  0x36   : > { %v735_v2 = vld [vmem:[%s4584_s6 + $0xb40] sm:$0xff]  ;;  %1544 = vmatprep.subr.mxu0 %v736_v0  ;;  %1651 = vmatprep.subr.mxu1 %v738_v1  ;;  %v737_v3 = vld [vmem:[%s4584_s6 + $0xb50] sm:$0xff]  ;;  %v712_v4 = vld [vmem:[%s4584_s6 + $0xa88] sm:$0xff]  ;;  %s4195_s9 = smul.u32 (%p7404_p10), 24, %s4517_s16 }
  0x37   : > { %v714_v5 = vld [vmem:[%s4584_s6 + $0xa98] sm:$0xff]  ;;  %1545 = vmatpush1.xpose.msra.mxu0 %v735_v2  ;;  %1652 = vmatpush1.xpose.msra.mxu1 %v737_v3  ;;  %v711_v6 = vld [vmem:[%s4584_s6 + $0xa80] sm:$0xff]  ;;  %v713_v7 = vld [vmem:[%s4584_s6 + $0xa90] sm:$0xff]  ;;  %p202_p9 = scmp.lt.s32.totalorder %s201_s25, 5 }
  0x38   : > { %1546 = vmatprep.subr.mxu0 %v712_v4  ;;  %1653 = vmatprep.subr.mxu1 %v714_v5  ;;  %v688_v8 = vld [vmem:[%s4584_s6 + $0x9c8] sm:$0xff]  ;;  %v690_v9 = vld [vmem:[%s4584_s6 + $0x9d8] sm:$0xff]  ;;  %v687_v10 = vld [vmem:[%s4584_s6 + $0x9c0] sm:$0xff]  ;;  %s7252_s11 = scalar_lea.vmem (%p7404_p10), %s7306_s3, %s4195_s9 }
  0x39   : > { %v689_v11 = vld [vmem:[%s4584_s6 + $0x9d0] sm:$0xff]  ;;  %v664_v12 = vld [vmem:[%s4584_s6 + $0x908] sm:$0xff]  ;;  %v666_v13 = vld [vmem:[%s4584_s6 + $0x918] sm:$0xff]  ;;  %s7410_s25 = smov (!%p202_p9, %s201_s25), 5 }
  0x3a   : > { %v663_v14 = vld [vmem:[%s4584_s6 + $0x900] sm:$0xff]  ;;  %v665_v15 = vld [vmem:[%s4584_s6 + $0x910] sm:$0xff]  ;;  %v640_v16 = vld [vmem:[%s4584_s6 + $0x848] sm:$0xff]  ;;  %s5088_s5 = scalar_lea.vmem %s7305_s2, %s7410_s25 }
  0x3b   : > { %1547 = vmatpush1.xpose.msra.mxu0 %v711_v6  ;;  %1654 = vmatpush1.xpose.msra.mxu1 %v713_v7  ;;  %v642_v17 = vld [vmem:[%s4584_s6 + $0x858] sm:$0xff]  ;;  %v639_v18 = vld [vmem:[%s4584_s6 + $0x840] sm:$0xff]  ;;  %v641_v19 = vld [vmem:[%s4584_s6 + $0x850] sm:$0xff] }
  0x3c   : > { %1548 = vmatprep.subr.mxu0 %v688_v8  ;;  %1655 = vmatprep.subr.mxu1 %v690_v9  ;;  %v616_v20 = vld [vmem:[%s4584_s6 + $0x788] sm:$0xff]  ;;  %v618_v21 = vld [vmem:[%s4584_s6 + $0x798] sm:$0xff]  ;;  %v615_v22 = vld [vmem:[%s4584_s6 + $0x780] sm:$0xff] }
  0x3d   : > { %v617_v23 = vld [vmem:[%s4584_s6 + $0x790] sm:$0xff]  ;;  %v592_v24 = vld [vmem:[%s4584_s6 + $0x6c8] sm:$0xff]  ;;  %v594_v25 = vld [vmem:[%s4584_s6 + $0x6d8] sm:$0xff] }
  0x3e   : > { %v591_v26 = vld [vmem:[%s4584_s6 + $0x6c0] sm:$0xff]  ;;  %v593_v27 = vld [vmem:[%s4584_s6 + $0x6d0] sm:$0xff]  ;;  %v568_v28 = vld [vmem:[%s4584_s6 + $0x608] sm:$0xff] }
  0x3f   : > { %1549 = vmatpush1.xpose.msra.mxu0 %v687_v10  ;;  %1656 = vmatpush1.xpose.msra.mxu1 %v689_v11  ;;  %v570_v29 = vld [vmem:[%s4584_s6 + $0x618] sm:$0xff]  ;;  %v567_v30 = vld [vmem:[%s4584_s6 + $0x600] sm:$0xff]  ;;  %v569_v31 = vld [vmem:[%s4584_s6 + $0x610] sm:$0xff] }
  0x40   : > { %1550 = vmatprep.subr.mxu0 %v664_v12  ;;  %1657 = vmatprep.subr.mxu1 %v666_v13  ;;  %v544_v32 = vld [vmem:[%s4584_s6 + $0x548] sm:$0xff]  ;;  %v546_v33 = vld [vmem:[%s4584_s6 + $0x558] sm:$0xff]  ;;  %v543_v34 = vld [vmem:[%s4584_s6 + $0x540] sm:$0xff] }
  0x41   : > { %v545_v35 = vld [vmem:[%s4584_s6 + $0x550] sm:$0xff]  ;;  %v520_v36 = vld [vmem:[%s4584_s6 + $0x488] sm:$0xff]  ;;  %v522_v37 = vld [vmem:[%s4584_s6 + $0x498] sm:$0xff] }
  0x42   : > { %v519_v38 = vld [vmem:[%s4584_s6 + $0x480] sm:$0xff]  ;;  %v521_v39 = vld [vmem:[%s4584_s6 + $0x490] sm:$0xff]  ;;  %v496_v40 = vld [vmem:[%s4584_s6 + $0x3c8] sm:$0xff] }
  0x43   : > { %1551 = vmatpush1.xpose.msra.mxu0 %v663_v14  ;;  %1658 = vmatpush1.xpose.msra.mxu1 %v665_v15  ;;  %v498_v41 = vld [vmem:[%s4584_s6 + $0x3d8] sm:$0xff]  ;;  %v495_v42 = vld [vmem:[%s4584_s6 + $0x3c0] sm:$0xff]  ;;  %v497_v43 = vld [vmem:[%s4584_s6 + $0x3d0] sm:$0xff] }
  0x44   : > { %1552 = vmatprep.subr.mxu0 %v640_v16  ;;  %1659 = vmatprep.subr.mxu1 %v642_v17  ;;  %v472_v44 = vld [vmem:[%s4584_s6 + $0x308] sm:$0xff]  ;;  %v474_v45 = vld [vmem:[%s4584_s6 + $0x318] sm:$0xff]  ;;  %v471_v47 = vld [vmem:[%s4584_s6 + $0x300] sm:$0xff] }
  0x45   : > { %v208_v46 = vld [vmem:[%s7303_s0 + $0x8] sm:$0xff]  ;;  %v473_v48 = vld [vmem:[%s4584_s6 + $0x310] sm:$0xff]  ;;  %v210_v49 = vld [vmem:[%s7303_s0 + $0x18] sm:$0xff] }
  0x46   : > { %v448_v50 = vld [vmem:[%s4584_s6 + $0x248] sm:$0xff]  ;;  %v450_v51 = vld [vmem:[%s4584_s6 + $0x258] sm:$0xff]  ;;  %1608 = vmatprep.mubr.f32.mxu0 %v208_v46  ;;  %1715 = vmatprep.mubr.f32.mxu1 %v210_v49  ;;  %v447_v52 = vld [vmem:[%s4584_s6 + $0x240] sm:$0xff] }
  0x47   : > { %1553 = vmatpush1.xpose.msra.mxu0 %v639_v18  ;;  %1660 = vmatpush1.xpose.msra.mxu1 %v641_v19  ;;  %v449_v53 = vld [vmem:[%s4584_s6 + $0x250] sm:$0xff]  ;;  %v424_v54 = vld [vmem:[%s4584_s6 + $0x188] sm:$0xff]  ;;  %v426_v55 = vld [vmem:[%s4584_s6 + $0x198] sm:$0xff] }
  0x48   : > { %1554 = vmatprep.subr.mxu0 %v616_v20  ;;  %1661 = vmatprep.subr.mxu1 %v618_v21  ;;  %v423_v56 = vld [vmem:[%s4584_s6 + $0x180] sm:$0xff]  ;;  %v425_v57 = vld [vmem:[%s4584_s6 + $0x190] sm:$0xff]  ;;  %v400_v58 = vld [vmem:[%s4584_s6 + $0xc8] sm:$0xff] }
  0x49   : > { %v402_v59 = vld [vmem:[%s4584_s6 + $0xd8] sm:$0xff]  ;;  %v399_v60 = vld [vmem:[%s4584_s6 + $0xc0] sm:$0xff]  ;;  %v401_v61 = vld [vmem:[%s4584_s6 + $0xd0] sm:$0xff] }
  0x4a   : > { %v376_v62 = vld [vmem:[%s4584_s6 + $0x8] sm:$0xff]  ;;  %v378_v63 = vld [vmem:[%s4584_s6 + $0x18] sm:$0xff]  ;;  %v375_v0 = vld [vmem:[%s4584_s6] sm:$0xff] }
  0x4b   : > { %1555 = vmatpush1.xpose.msra.mxu0 %v615_v22  ;;  %1662 = vmatpush1.xpose.msra.mxu1 %v617_v23  ;;  %v377_v1 = vld [vmem:[%s4584_s6 + $0x10] sm:$0xff]  ;;  %v1120_v2 = vld [vmem:[%s4584_s6 + $0x1748] sm:$0xff]  ;;  %v1122_v3 = vld [vmem:[%s4584_s6 + $0x1758] sm:$0xff] }
  0x4c   : > { %1556 = vmatprep.subr.mxu0 %v592_v24  ;;  %1663 = vmatprep.subr.mxu1 %v594_v25  ;;  %v1119_v4 = vld [vmem:[%s4584_s6 + $0x1740] sm:$0xff]  ;;  %v1121_v5 = vld [vmem:[%s4584_s6 + $0x1750] sm:$0xff]  ;;  %v1096_v6 = vld [vmem:[%s4584_s6 + $0x1688] sm:$0xff] }
  0x4d   : > { %v1098_v7 = vld [vmem:[%s4584_s6 + $0x1698] sm:$0xff]  ;;  %v1095_v8 = vld [vmem:[%s4584_s6 + $0x1680] sm:$0xff]  ;;  %v1097_v9 = vld [vmem:[%s4584_s6 + $0x1690] sm:$0xff] }
  0x4e   : > { %v1072_v10 = vld [vmem:[%s4584_s6 + $0x15c8] sm:$0xff]  ;;  %v1074_v11 = vld [vmem:[%s4584_s6 + $0x15d8] sm:$0xff]  ;;  %v1071_v12 = vld [vmem:[%s4584_s6 + $0x15c0] sm:$0xff] }
  0x4f   : > { %1557 = vmatpush1.xpose.msra.mxu0 %v591_v26  ;;  %1664 = vmatpush1.xpose.msra.mxu1 %v593_v27  ;;  %v1073_v13 = vld [vmem:[%s4584_s6 + $0x15d0] sm:$0xff]  ;;  %v1048_v14 = vld [vmem:[%s4584_s6 + $0x1508] sm:$0xff]  ;;  %v1050_v15 = vld [vmem:[%s4584_s6 + $0x1518] sm:$0xff] }
  0x50   : > { %1558 = vmatprep.subr.mxu0 %v568_v28  ;;  %1665 = vmatprep.subr.mxu1 %v570_v29  ;;  %v1047_v16 = vld [vmem:[%s4584_s6 + $0x1500] sm:$0xff]  ;;  %v1049_v17 = vld [vmem:[%s4584_s6 + $0x1510] sm:$0xff]  ;;  %v1024_v18 = vld [vmem:[%s4584_s6 + $0x1448] sm:$0xff] }
  0x51   : > { %v1026_v19 = vld [vmem:[%s4584_s6 + $0x1458] sm:$0xff]  ;;  %v1023_v20 = vld [vmem:[%s4584_s6 + $0x1440] sm:$0xff]  ;;  %v1025_v21 = vld [vmem:[%s4584_s6 + $0x1450] sm:$0xff] }
  0x52   : > { %v1000_v22 = vld [vmem:[%s4584_s6 + $0x1388] sm:$0xff]  ;;  %v1002_v23 = vld [vmem:[%s4584_s6 + $0x1398] sm:$0xff]  ;;  %v999_v24 = vld [vmem:[%s4584_s6 + $0x1380] sm:$0xff] }
  0x53   : > { %1559 = vmatpush1.xpose.msra.mxu0 %v567_v30  ;;  %1666 = vmatpush1.xpose.msra.mxu1 %v569_v31  ;;  %v1001_v25 = vld [vmem:[%s4584_s6 + $0x1390] sm:$0xff]  ;;  %v976_v26 = vld [vmem:[%s4584_s6 + $0x12c8] sm:$0xff]  ;;  %v978_v27 = vld [vmem:[%s4584_s6 + $0x12d8] sm:$0xff] }
  0x54   : > { %1560 = vmatprep.subr.mxu0 %v544_v32  ;;  %1667 = vmatprep.subr.mxu1 %v546_v33  ;;  %v975_v28 = vld [vmem:[%s4584_s6 + $0x12c0] sm:$0xff]  ;;  %v977_v29 = vld [vmem:[%s4584_s6 + $0x12d0] sm:$0xff]  ;;  %v952_v30 = vld [vmem:[%s4584_s6 + $0x1208] sm:$0xff] }
  0x55   : > { %v954_v31 = vld [vmem:[%s4584_s6 + $0x1218] sm:$0xff]  ;;  %v951_v32 = vld [vmem:[%s4584_s6 + $0x1200] sm:$0xff]  ;;  %v953_v33 = vld [vmem:[%s4584_s6 + $0x1210] sm:$0xff] }
  0x56   : > { %v856_v46 = vld [vmem:[%s4584_s6 + $0xf08] sm:$0xff]  ;;  %v857_v49 = vld [vmem:[%s4584_s6 + $0xf10] sm:$0xff] }
  0x57   : > { %1561 = vmatpush1.xpose.msra.mxu0 %v543_v34  ;;  %1668 = vmatpush1.xpose.msra.mxu1 %v545_v35  ;;  %v928_v34 = vld [vmem:[%s4584_s6 + $0x1148] sm:$0xff]  ;;  %v930_v35 = vld [vmem:[%s4584_s6 + $0x1158] sm:$0xff] }
  0x58   : > { %1562 = vmatprep.subr.mxu0 %v520_v36  ;;  %1669 = vmatprep.subr.mxu1 %v522_v37  ;;  %v927_v36 = vld [vmem:[%s4584_s6 + $0x1140] sm:$0xff]  ;;  %v929_v37 = vld [vmem:[%s4584_s6 + $0x1150] sm:$0xff] }
  0x5b   : > { %1563 = vmatpush1.xpose.msra.mxu0 %v519_v38  ;;  %1670 = vmatpush1.xpose.msra.mxu1 %v521_v39  ;;  %v904_v38 = vld [vmem:[%s4584_s6 + $0x1088] sm:$0xff]  ;;  %v906_v39 = vld [vmem:[%s4584_s6 + $0x1098] sm:$0xff] }
  0x5c   : > { %1564 = vmatprep.subr.mxu0 %v496_v40  ;;  %1671 = vmatprep.subr.mxu1 %v498_v41  ;;  %v903_v40 = vld [vmem:[%s4584_s6 + $0x1080] sm:$0xff]  ;;  %v905_v41 = vld [vmem:[%s4584_s6 + $0x1090] sm:$0xff] }
  0x5f   : > { %1565 = vmatpush1.xpose.msra.mxu0 %v495_v42  ;;  %1672 = vmatpush1.xpose.msra.mxu1 %v497_v43  ;;  %v880_v42 = vld [vmem:[%s4584_s6 + $0xfc8] sm:$0xff]  ;;  %v882_v43 = vld [vmem:[%s4584_s6 + $0xfd8] sm:$0xff] }
  0x60   : > { %1566 = vmatprep.subr.mxu0 %v472_v44  ;;  %1673 = vmatprep.subr.mxu1 %v474_v45  ;;  %v879_v44 = vld [vmem:[%s4584_s6 + $0xfc0] sm:$0xff]  ;;  %v881_v45 = vld [vmem:[%s4584_s6 + $0xfd0] sm:$0xff] }
  0x63   : > { %1567 = vmatpush1.xpose.msra.mxu0 %v471_v47  ;;  %1674 = vmatpush1.xpose.msra.mxu1 %v473_v48  ;;  %v858_v47 = vld [vmem:[%s4584_s6 + $0xf18] sm:$0xff]  ;;  %v855_v48 = vld [vmem:[%s4584_s6 + $0xf00] sm:$0xff] }
  0x64   : > { %1568 = vmatprep.subr.mxu0 %v448_v50  ;;  %1675 = vmatprep.subr.mxu1 %v450_v51  ;;  %v832_v50 = vld [vmem:[%s4584_s6 + $0xe48] sm:$0xff]  ;;  %v834_v51 = vld [vmem:[%s4584_s6 + $0xe58] sm:$0xff] }
  0x67   : > { %1569 = vmatpush1.xpose.msra.mxu0 %v447_v52  ;;  %1676 = vmatpush1.xpose.msra.mxu1 %v449_v53  ;;  %v831_v52 = vld [vmem:[%s4584_s6 + $0xe40] sm:$0xff]  ;;  %v833_v53 = vld [vmem:[%s4584_s6 + $0xe50] sm:$0xff] }
  0x68   : > { %1570 = vmatprep.subr.mxu0 %v424_v54  ;;  %1677 = vmatprep.subr.mxu1 %v426_v55  ;;  %v808_v54 = vld [vmem:[%s4584_s6 + $0xd88] sm:$0xff]  ;;  %v810_v55 = vld [vmem:[%s4584_s6 + $0xd98] sm:$0xff] }
  0x6b   : > { %1571 = vmatpush1.xpose.msra.mxu0 %v423_v56  ;;  %1678 = vmatpush1.xpose.msra.mxu1 %v425_v57  ;;  %v807_v56 = vld [vmem:[%s4584_s6 + $0xd80] sm:$0xff]  ;;  %v809_v57 = vld [vmem:[%s4584_s6 + $0xd90] sm:$0xff] }
  0x6c   : > { %1572 = vmatprep.subr.mxu0 %v400_v58  ;;  %1679 = vmatprep.subr.mxu1 %v402_v59  ;;  %v784_v58 = vld [vmem:[%s4584_s6 + $0xcc8] sm:$0xff]  ;;  %v786_v59 = vld [vmem:[%s4584_s6 + $0xcd8] sm:$0xff] }
  0x6f   : > { %1573 = vmatpush1.xpose.msra.mxu0 %v399_v60  ;;  %1680 = vmatpush1.xpose.msra.mxu1 %v401_v61  ;;  %v783_v60 = vld [vmem:[%s4584_s6 + $0xcc0] sm:$0xff]  ;;  %v785_v61 = vld [vmem:[%s4584_s6 + $0xcd0] sm:$0xff] }
  0x70   : > { %1574 = vmatprep.subr.mxu0 %v376_v62  ;;  %1681 = vmatprep.subr.mxu1 %v378_v63  ;;  %v760_v62 = vld [vmem:[%s4584_s6 + $0xc08] sm:$0xff]  ;;  %v762_v63 = vld [vmem:[%s4584_s6 + $0xc18] sm:$0xff] }
  0x73   : > { %1575 = vmatpush1.xpose.msra.mxu0 %v375_v0  ;;  %1682 = vmatpush1.xpose.msra.mxu1 %v377_v1  ;;  %v759_v0 = vld [vmem:[%s4584_s6 + $0xc00] sm:$0xff]  ;;  %v761_v1 = vld [vmem:[%s4584_s6 + $0xc10] sm:$0xff] }
  0x74   : > { %1576 = vmatprep.subr.mxu0 %v1120_v2  ;;  %1683 = vmatprep.subr.mxu1 %v1122_v3  ;;  %v740_v2 = vld [vmem:[%s4584_s6 + $0xb68] sm:$0xff]  ;;  %v742_v3 = vld [vmem:[%s4584_s6 + $0xb78] sm:$0xff] }
  0x77   : > { %1577 = vmatpush2.xpose.msra.mxu0 %v1119_v4  ;;  %1684 = vmatpush2.xpose.msra.mxu1 %v1121_v5  ;;  %v207_v4 = vld [vmem:[%s7303_s0] sm:$0xff]  ;;  %v209_v5 = vld [vmem:[%s7303_s0 + $0x10] sm:$0xff] }
  0x78   : > { %1578 = vmatprep.subr.mxu0 %v1096_v6  ;;  %1685 = vmatprep.subr.mxu1 %v1098_v7  ;;  %v739_v6 = vld [vmem:[%s4584_s6 + $0xb60] sm:$0xff]  ;;  %v741_v7 = vld [vmem:[%s4584_s6 + $0xb70] sm:$0xff] }
  0x7b   : > { %1579 = vmatpush2.xpose.msra.mxu0 %v1095_v8  ;;  %1686 = vmatpush2.xpose.msra.mxu1 %v1097_v9  ;;  %v716_v8 = vld [vmem:[%s4584_s6 + $0xaa8] sm:$0xff]  ;;  %v718_v9 = vld [vmem:[%s4584_s6 + $0xab8] sm:$0xff] }
  0x7c   : > { %1580 = vmatprep.subr.mxu0 %v1072_v10  ;;  %1687 = vmatprep.subr.mxu1 %v1074_v11  ;;  %v232_v10 = vld [vmem:[%s7303_s0 + $0xc8] sm:$0xff]  ;;  %v234_v11 = vld [vmem:[%s7303_s0 + $0xd8] sm:$0xff] }
  0x7f   : > { %1581 = vmatpush2.xpose.msra.mxu0 %v1071_v12  ;;  %1688 = vmatpush2.xpose.msra.mxu1 %v1073_v13  ;;  %v231_v12 = vld [vmem:[%s7303_s0 + $0xc0] sm:$0xff]  ;;  %v233_v13 = vld [vmem:[%s7303_s0 + $0xd0] sm:$0xff] }
  0x80   : > { %1582 = vmatprep.subr.mxu0 %v1048_v14  ;;  %1689 = vmatprep.subr.mxu1 %v1050_v15  ;;  %v715_v14 = vld [vmem:[%s4584_s6 + $0xaa0] sm:$0xff]  ;;  %v717_v15 = vld [vmem:[%s4584_s6 + $0xab0] sm:$0xff] }
  0x83   : > { %1583 = vmatpush2.xpose.msra.mxu0 %v1047_v16  ;;  %1690 = vmatpush2.xpose.msra.mxu1 %v1049_v17  ;;  %v692_v16 = vld [vmem:[%s4584_s6 + $0x9e8] sm:$0xff]  ;;  %v694_v17 = vld [vmem:[%s4584_s6 + $0x9f8] sm:$0xff] }
  0x84   : > { %1584 = vmatprep.subr.mxu0 %v1024_v18  ;;  %1691 = vmatprep.subr.mxu1 %v1026_v19  ;;  %v256_v18 = vld [vmem:[%s7303_s0 + $0x188] sm:$0xff]  ;;  %v258_v19 = vld [vmem:[%s7303_s0 + $0x198] sm:$0xff] }
  0x87   : > { %1585 = vmatpush2.xpose.msra.mxu0 %v1023_v20  ;;  %1692 = vmatpush2.xpose.msra.mxu1 %v1025_v21  ;;  %v255_v20 = vld [vmem:[%s7303_s0 + $0x180] sm:$0xff]  ;;  %v257_v21 = vld [vmem:[%s7303_s0 + $0x190] sm:$0xff] }
  0x88   : > { %1586 = vmatprep.subr.mxu0 %v1000_v22  ;;  %1693 = vmatprep.subr.mxu1 %v1002_v23  ;;  %v691_v22 = vld [vmem:[%s4584_s6 + $0x9e0] sm:$0xff]  ;;  %v693_v23 = vld [vmem:[%s4584_s6 + $0x9f0] sm:$0xff] }
  0x8b   : > { %1587 = vmatpush2.xpose.msra.mxu0 %v999_v24  ;;  %1694 = vmatpush2.xpose.msra.mxu1 %v1001_v25  ;;  %v668_v24 = vld [vmem:[%s4584_s6 + $0x928] sm:$0xff]  ;;  %v670_v25 = vld [vmem:[%s4584_s6 + $0x938] sm:$0xff] }
  0x8c   : > { %1588 = vmatprep.subr.mxu0 %v976_v26  ;;  %1695 = vmatprep.subr.mxu1 %v978_v27  ;;  %v280_v26 = vld [vmem:[%s7303_s0 + $0x248] sm:$0xff]  ;;  %v282_v27 = vld [vmem:[%s7303_s0 + $0x258] sm:$0xff] }
  0x8f   : > { %1589 = vmatpush2.xpose.msra.mxu0 %v975_v28  ;;  %1696 = vmatpush2.xpose.msra.mxu1 %v977_v29  ;;  %v279_v28 = vld [vmem:[%s7303_s0 + $0x240] sm:$0xff]  ;;  %v281_v29 = vld [vmem:[%s7303_s0 + $0x250] sm:$0xff] }
  0x90   : > { %1590 = vmatprep.subr.mxu0 %v952_v30  ;;  %1697 = vmatprep.subr.mxu1 %v954_v31  ;;  %v667_v30 = vld [vmem:[%s4584_s6 + $0x920] sm:$0xff]  ;;  %v669_v31 = vld [vmem:[%s4584_s6 + $0x930] sm:$0xff] }
  0x93   : > { %1591 = vmatpush2.xpose.msra.mxu0 %v951_v32  ;;  %1698 = vmatpush2.xpose.msra.mxu1 %v953_v33  ;;  %v644_v32 = vld [vmem:[%s4584_s6 + $0x868] sm:$0xff]  ;;  %v646_v33 = vld [vmem:[%s4584_s6 + $0x878] sm:$0xff] }
  0x94   : > { %1592 = vmatprep.subr.mxu0 %v928_v34  ;;  %1699 = vmatprep.subr.mxu1 %v930_v35  ;;  %v304_v34 = vld [vmem:[%s7303_s0 + $0x308] sm:$0xff]  ;;  %v306_v35 = vld [vmem:[%s7303_s0 + $0x318] sm:$0xff] }
  0x97   : > { %1593 = vmatpush2.xpose.msra.mxu0 %v927_v36  ;;  %1700 = vmatpush2.xpose.msra.mxu1 %v929_v37  ;;  %v303_v36 = vld [vmem:[%s7303_s0 + $0x300] sm:$0xff]  ;;  %v305_v37 = vld [vmem:[%s7303_s0 + $0x310] sm:$0xff] }
  0x98   : > { %1594 = vmatprep.subr.mxu0 %v904_v38  ;;  %1701 = vmatprep.subr.mxu1 %v906_v39  ;;  %v643_v38 = vld [vmem:[%s4584_s6 + $0x860] sm:$0xff]  ;;  %v645_v39 = vld [vmem:[%s4584_s6 + $0x870] sm:$0xff] }
  0x9b   : > { %1595 = vmatpush2.xpose.msra.mxu0 %v903_v40  ;;  %1702 = vmatpush2.xpose.msra.mxu1 %v905_v41  ;;  %v620_v40 = vld [vmem:[%s4584_s6 + $0x7a8] sm:$0xff]  ;;  %v622_v41 = vld [vmem:[%s4584_s6 + $0x7b8] sm:$0xff] }
  0x9c   : > { %1596 = vmatprep.subr.mxu0 %v880_v42  ;;  %1703 = vmatprep.subr.mxu1 %v882_v43  ;;  %v328_v42 = vld [vmem:[%s7303_s0 + $0x3c8] sm:$0xff]  ;;  %v330_v43 = vld [vmem:[%s7303_s0 + $0x3d8] sm:$0xff] }
  0x9f   : > { %1597 = vmatpush2.xpose.msra.mxu0 %v879_v44  ;;  %1704 = vmatpush2.xpose.msra.mxu1 %v881_v45  ;;  %v327_v44 = vld [vmem:[%s7303_s0 + $0x3c0] sm:$0xff]  ;;  %v329_v45 = vld [vmem:[%s7303_s0 + $0x3d0] sm:$0xff] }
  0xa0   : > { %1598 = vmatprep.subr.mxu0 %v856_v46  ;;  %1705 = vmatprep.subr.mxu1 %v858_v47  ;;  %v619_v46 = vld [vmem:[%s4584_s6 + $0x7a0] sm:$0xff]  ;;  %v621_v47 = vld [vmem:[%s4584_s6 + $0x7b0] sm:$0xff] }
  0xa3   : > { %1599 = vmatpush2.xpose.msra.mxu0 %v855_v48  ;;  %1706 = vmatpush2.xpose.msra.mxu1 %v857_v49  ;;  %v596_v48 = vld [vmem:[%s4584_s6 + $0x6e8] sm:$0xff]  ;;  %v598_v49 = vld [vmem:[%s4584_s6 + $0x6f8] sm:$0xff] }
  0xa4   : > { %1600 = vmatprep.subr.mxu0 %v832_v50  ;;  %1707 = vmatprep.subr.mxu1 %v834_v51  ;;  %v352_v50 = vld [vmem:[%s7303_s0 + $0x488] sm:$0x1]  ;;  %v354_v51 = vld [vmem:[%s7303_s0 + $0x498] sm:$0x1] }
  0xa7   : > { %1601 = vmatpush2.xpose.msra.mxu0 %v831_v52  ;;  %1708 = vmatpush2.xpose.msra.mxu1 %v833_v53  ;;  %v351_v52 = vld [vmem:[%s7303_s0 + $0x480] sm:$0x1]  ;;  %v353_v53 = vld [vmem:[%s7303_s0 + $0x490] sm:$0x1] }
  0xa8   : > { %1602 = vmatprep.subr.mxu0 %v808_v54  ;;  %1709 = vmatprep.subr.mxu1 %v810_v55  ;;  %v595_v54 = vld [vmem:[%s4584_s6 + $0x6e0] sm:$0xff]  ;;  %v597_v55 = vld [vmem:[%s4584_s6 + $0x6f0] sm:$0xff] }
  0xab   : > { %1603 = vmatpush2.xpose.msra.mxu0 %v807_v56  ;;  %1710 = vmatpush2.xpose.msra.mxu1 %v809_v57  ;;  %v572_v56 = vld [vmem:[%s4584_s6 + $0x628] sm:$0xff]  ;;  %v574_v57 = vld [vmem:[%s4584_s6 + $0x638] sm:$0xff] }
  0xac   : > { %1604 = vmatprep.subr.mxu0 %v784_v58  ;;  %1711 = vmatprep.subr.mxu1 %v786_v59  ;;  %v212_v58 = vld [vmem:[%s7303_s0 + $0x28] sm:$0xff]  ;;  %v214_v59 = vld [vmem:[%s7303_s0 + $0x38] sm:$0xff] }
  0xaf   : > { %1605 = vmatpush2.xpose.msra.mxu0 %v783_v60  ;;  %1712 = vmatpush2.xpose.msra.mxu1 %v785_v61  ;;  %v571_v60 = vld [vmem:[%s4584_s6 + $0x620] sm:$0xff]  ;;  %v573_v61 = vld [vmem:[%s4584_s6 + $0x630] sm:$0xff] }
  0xb0   : > { %1606 = vmatprep.subr.mxu0 %v760_v62  ;;  %1713 = vmatprep.subr.mxu1 %v762_v63  ;;  %v548_v62 = vld [vmem:[%s4584_s6 + $0x568] sm:$0xff]  ;;  %v550_v63 = vld [vmem:[%s4584_s6 + $0x578] sm:$0xff] }
  0xb3   : > { %1607 = vmatpush2.xpose.msra.mxu0 %v759_v0  ;;  %1714 = vmatpush2.xpose.msra.mxu1 %v761_v1  ;;  %v547_v0 = vld [vmem:[%s4584_s6 + $0x560] sm:$0xff]  ;;  %v549_v1 = vld [vmem:[%s4584_s6 + $0x570] sm:$0xff] }
  0xb4   : > { %1758 = vmatprep.subr.mxu0 %v740_v2  ;;  %1865 = vmatprep.subr.mxu1 %v742_v3  ;;  %v524_v2 = vld [vmem:[%s4584_s6 + $0x4a8] sm:$0xff]  ;;  %v526_v3 = vld [vmem:[%s4584_s6 + $0x4b8] sm:$0xff] }
  0xb6   : > { %1609 = vmatmul.mubr.f32.vlgmr.msra.gmra.mxu0 %v207_v4  ;;  %1716 = vmatmul.mubr.f32.vlgmr.msra.gmra.mxu1 %v209_v5  ;;  %v523_v4 = vld [vmem:[%s4584_s6 + $0x4a0] sm:$0xff]  ;;  %v525_v5 = vld [vmem:[%s4584_s6 + $0x4b0] sm:$0xff] }
  0xb7   : > { %1759 = vmatpush1.xpose.msra.mxu0 %v739_v6  ;;  %1866 = vmatpush1.xpose.msra.mxu1 %v741_v7  ;;  %v500_v6 = vld [vmem:[%s4584_s6 + $0x3e8] sm:$0xff]  ;;  %v502_v7 = vld [vmem:[%s4584_s6 + $0x3f8] sm:$0xff] }
  0xb8   : > { %1760 = vmatprep.subr.mxu0 %v716_v8  ;;  %1867 = vmatprep.subr.mxu1 %v718_v9  ;;  %v499_v8 = vld [vmem:[%s4584_s6 + $0x3e0] sm:$0xff]  ;;  %v501_v9 = vld [vmem:[%s4584_s6 + $0x3f0] sm:$0xff] }
  0xb9   : > { %1614 = vmatprep.mubr.f32.mxu0 %v232_v10  ;;  %1721 = vmatprep.mubr.f32.mxu1 %v234_v11  ;;  %v476_v10 = vld [vmem:[%s4584_s6 + $0x328] sm:$0xff]  ;;  %v478_v11 = vld [vmem:[%s4584_s6 + $0x338] sm:$0xff] }
  0xba   : > { %1615 = vmatmul.mubr.f32.gmra.mxu0 %v231_v12  ;;  %1722 = vmatmul.mubr.f32.gmra.mxu1 %v233_v13  ;;  %v475_v12 = vld [vmem:[%s4584_s6 + $0x320] sm:$0xff]  ;;  %v477_v13 = vld [vmem:[%s4584_s6 + $0x330] sm:$0xff] }
  0xbb   : > { %1761 = vmatpush1.xpose.msra.mxu0 %v715_v14  ;;  %1868 = vmatpush1.xpose.msra.mxu1 %v717_v15  ;;  %v452_v14 = vld [vmem:[%s4584_s6 + $0x268] sm:$0xff]  ;;  %v454_v15 = vld [vmem:[%s4584_s6 + $0x278] sm:$0xff] }
  0xbc   : > { %1762 = vmatprep.subr.mxu0 %v692_v16  ;;  %1869 = vmatprep.subr.mxu1 %v694_v17  ;;  %v451_v16 = vld [vmem:[%s4584_s6 + $0x260] sm:$0xff]  ;;  %v453_v17 = vld [vmem:[%s4584_s6 + $0x270] sm:$0xff] }
  0xbd   : > { %1620 = vmatprep.mubr.f32.mxu0 %v256_v18  ;;  %1727 = vmatprep.mubr.f32.mxu1 %v258_v19  ;;  %v428_v18 = vld [vmem:[%s4584_s6 + $0x1a8] sm:$0xff]  ;;  %v430_v19 = vld [vmem:[%s4584_s6 + $0x1b8] sm:$0xff] }
  0xbe   : > { %1621 = vmatmul.mubr.f32.gmra.mxu0 %v255_v20  ;;  %1728 = vmatmul.mubr.f32.gmra.mxu1 %v257_v21  ;;  %v427_v20 = vld [vmem:[%s4584_s6 + $0x1a0] sm:$0xff]  ;;  %v429_v21 = vld [vmem:[%s4584_s6 + $0x1b0] sm:$0xff] }
  0xbf   : > { %1763 = vmatpush1.xpose.msra.mxu0 %v691_v22  ;;  %1870 = vmatpush1.xpose.msra.mxu1 %v693_v23  ;;  %v404_v22 = vld [vmem:[%s4584_s6 + $0xe8] sm:$0xff]  ;;  %v406_v23 = vld [vmem:[%s4584_s6 + $0xf8] sm:$0xff] }
  0xc0   : > { %1764 = vmatprep.subr.mxu0 %v668_v24  ;;  %1871 = vmatprep.subr.mxu1 %v670_v25  ;;  %v403_v24 = vld [vmem:[%s4584_s6 + $0xe0] sm:$0xff]  ;;  %v405_v25 = vld [vmem:[%s4584_s6 + $0xf0] sm:$0xff] }
  0xc1   : > { %1626 = vmatprep.mubr.f32.mxu0 %v280_v26  ;;  %1733 = vmatprep.mubr.f32.mxu1 %v282_v27  ;;  %v380_v26 = vld [vmem:[%s4584_s6 + $0x28] sm:$0xff]  ;;  %v382_v27 = vld [vmem:[%s4584_s6 + $0x38] sm:$0xff] }
  0xc2   : > { %1627 = vmatmul.mubr.f32.gmra.mxu0 %v279_v28  ;;  %1734 = vmatmul.mubr.f32.gmra.mxu1 %v281_v29  ;;  %v379_v28 = vld [vmem:[%s4584_s6 + $0x20] sm:$0xff]  ;;  %v381_v29 = vld [vmem:[%s4584_s6 + $0x30] sm:$0xff] }
  0xc3   : > { %1765 = vmatpush1.xpose.msra.mxu0 %v667_v30  ;;  %1872 = vmatpush1.xpose.msra.mxu1 %v669_v31  ;;  %v1124_v30 = vld [vmem:[%s4584_s6 + $0x1768] sm:$0xff]  ;;  %v1126_v31 = vld [vmem:[%s4584_s6 + $0x1778] sm:$0xff] }
  0xc4   : > { %1766 = vmatprep.subr.mxu0 %v644_v32  ;;  %1873 = vmatprep.subr.mxu1 %v646_v33  ;;  %v1123_v32 = vld [vmem:[%s4584_s6 + $0x1760] sm:$0xff]  ;;  %v1125_v33 = vld [vmem:[%s4584_s6 + $0x1770] sm:$0xff] }
  0xc5   : > { %1632 = vmatprep.mubr.f32.mxu0 %v304_v34  ;;  %1739 = vmatprep.mubr.f32.mxu1 %v306_v35  ;;  %v1100_v34 = vld [vmem:[%s4584_s6 + $0x16a8] sm:$0xff]  ;;  %v1102_v35 = vld [vmem:[%s4584_s6 + $0x16b8] sm:$0xff] }
  0xc6   : > { %1633 = vmatmul.mubr.f32.gmra.mxu0 %v303_v36  ;;  %1740 = vmatmul.mubr.f32.gmra.mxu1 %v305_v37  ;;  %v1099_v36 = vld [vmem:[%s4584_s6 + $0x16a0] sm:$0xff]  ;;  %v1101_v37 = vld [vmem:[%s4584_s6 + $0x16b0] sm:$0xff] }
  0xc7   : > { %1767 = vmatpush1.xpose.msra.mxu0 %v643_v38  ;;  %1874 = vmatpush1.xpose.msra.mxu1 %v645_v39  ;;  %v1076_v38 = vld [vmem:[%s4584_s6 + $0x15e8] sm:$0xff]  ;;  %v1078_v39 = vld [vmem:[%s4584_s6 + $0x15f8] sm:$0xff] }
  0xc8   : > { %1768 = vmatprep.subr.mxu0 %v620_v40  ;;  %1875 = vmatprep.subr.mxu1 %v622_v41  ;;  %v1075_v40 = vld [vmem:[%s4584_s6 + $0x15e0] sm:$0xff]  ;;  %v1077_v41 = vld [vmem:[%s4584_s6 + $0x15f0] sm:$0xff] }
  0xc9   : > { %1638 = vmatprep.mubr.f32.mxu0 %v328_v42  ;;  %1745 = vmatprep.mubr.f32.mxu1 %v330_v43  ;;  %v1052_v42 = vld [vmem:[%s4584_s6 + $0x1528] sm:$0xff]  ;;  %v1054_v43 = vld [vmem:[%s4584_s6 + $0x1538] sm:$0xff] }
  0xca   : > { %1639 = vmatmul.mubr.f32.gmra.mxu0 %v327_v44  ;;  %1746 = vmatmul.mubr.f32.gmra.mxu1 %v329_v45  ;;  %v1051_v44 = vld [vmem:[%s4584_s6 + $0x1520] sm:$0xff]  ;;  %v1053_v45 = vld [vmem:[%s4584_s6 + $0x1530] sm:$0xff] }
  0xcb   : > { %1769 = vmatpush1.xpose.msra.mxu0 %v619_v46  ;;  %1876 = vmatpush1.xpose.msra.mxu1 %v621_v47  ;;  %v1028_v46 = vld [vmem:[%s4584_s6 + $0x1468] sm:$0xff]  ;;  %v1030_v47 = vld [vmem:[%s4584_s6 + $0x1478] sm:$0xff] }
  0xcc   : > { %1770 = vmatprep.subr.mxu0 %v596_v48  ;;  %1877 = vmatprep.subr.mxu1 %v598_v49  ;;  %v1027_v48 = vld [vmem:[%s4584_s6 + $0x1460] sm:$0xff]  ;;  %v1029_v49 = vld [vmem:[%s4584_s6 + $0x1470] sm:$0xff] }
  0xcd   : > { %1644 = vmatprep.mubr.f32.mxu0 %v352_v50  ;;  %1751 = vmatprep.mubr.f32.mxu1 %v354_v51  ;;  %v1004_v50 = vld [vmem:[%s4584_s6 + $0x13a8] sm:$0xff]  ;;  %v1006_v51 = vld [vmem:[%s4584_s6 + $0x13b8] sm:$0xff] }
  0xce   : > { %1645 = vmatmul.mubr.f32.gmra.mxu0 %v351_v52  ;;  %1752 = vmatmul.mubr.f32.gmra.mxu1 %v353_v53  ;;  %v1003_v52 = vld [vmem:[%s4584_s6 + $0x13a0] sm:$0xff]  ;;  %v1005_v53 = vld [vmem:[%s4584_s6 + $0x13b0] sm:$0xff] }
  0xcf   : > { %1771 = vmatpush1.xpose.msra.mxu0 %v595_v54  ;;  %1878 = vmatpush1.xpose.msra.mxu1 %v597_v55  ;;  %v980_v54 = vld [vmem:[%s4584_s6 + $0x12e8] sm:$0xff]  ;;  %v982_v55 = vld [vmem:[%s4584_s6 + $0x12f8] sm:$0xff] }
  0xd0   : > { %1772 = vmatprep.subr.mxu0 %v572_v56  ;;  %1879 = vmatprep.subr.mxu1 %v574_v57  ;;  %v979_v56 = vld [vmem:[%s4584_s6 + $0x12e0] sm:$0xff]  ;;  %v981_v57 = vld [vmem:[%s4584_s6 + $0x12f0] sm:$0xff] }
  0xd1   : > { %1822 = vmatprep.mubr.f32.mxu0 %v212_v58  ;;  %1929 = vmatprep.mubr.f32.mxu1 %v214_v59  ;;  %v956_v58 = vld [vmem:[%s4584_s6 + $0x1228] sm:$0xff]  ;;  %v958_v59 = vld [vmem:[%s4584_s6 + $0x1238] sm:$0xff] }
  0xd3   : > { %1773 = vmatpush1.xpose.msra.mxu0 %v571_v60  ;;  %1880 = vmatpush1.xpose.msra.mxu1 %v573_v61  ;;  %v955_v60 = vld [vmem:[%s4584_s6 + $0x1220] sm:$0xff]  ;;  %v957_v61 = vld [vmem:[%s4584_s6 + $0x1230] sm:$0xff] }
  0xd4   : > { %1774 = vmatprep.subr.mxu0 %v548_v62  ;;  %1881 = vmatprep.subr.mxu1 %v550_v63  ;;  %v932_v62 = vld [vmem:[%s4584_s6 + $0x1168] sm:$0xff]  ;;  %v934_v63 = vld [vmem:[%s4584_s6 + $0x1178] sm:$0xff] }
  0xd7   : > { %1775 = vmatpush1.xpose.msra.mxu0 %v547_v0  ;;  %1882 = vmatpush1.xpose.msra.mxu1 %v549_v1  ;;  %v931_v0 = vld [vmem:[%s4584_s6 + $0x1160] sm:$0xff]  ;;  %v933_v1 = vld [vmem:[%s4584_s6 + $0x1170] sm:$0xff] }
  0xd8   : > { %1776 = vmatprep.subr.mxu0 %v524_v2  ;;  %1883 = vmatprep.subr.mxu1 %v526_v3  ;;  %v908_v2 = vld [vmem:[%s4584_s6 + $0x10a8] sm:$0xff]  ;;  %v910_v3 = vld [vmem:[%s4584_s6 + $0x10b8] sm:$0xff] }
  0xdb   : > { %1777 = vmatpush1.xpose.msra.mxu0 %v523_v4  ;;  %1884 = vmatpush1.xpose.msra.mxu1 %v525_v5  ;;  %v907_v4 = vld [vmem:[%s4584_s6 + $0x10a0] sm:$0xff]  ;;  %v909_v5 = vld [vmem:[%s4584_s6 + $0x10b0] sm:$0xff] }
  0xdc   : > { %1778 = vmatprep.subr.mxu0 %v500_v6  ;;  %1885 = vmatprep.subr.mxu1 %v502_v7  ;;  %v884_v6 = vld [vmem:[%s4584_s6 + $0xfe8] sm:$0xff]  ;;  %v886_v7 = vld [vmem:[%s4584_s6 + $0xff8] sm:$0xff] }
  0xdf   : > { %1779 = vmatpush1.xpose.msra.mxu0 %v499_v8  ;;  %1886 = vmatpush1.xpose.msra.mxu1 %v501_v9  ;;  %v883_v8 = vld [vmem:[%s4584_s6 + $0xfe0] sm:$0xff]  ;;  %v885_v9 = vld [vmem:[%s4584_s6 + $0xff0] sm:$0xff] }
  0xe0   : > { %1780 = vmatprep.subr.mxu0 %v476_v10  ;;  %1887 = vmatprep.subr.mxu1 %v478_v11  ;;  %v860_v10 = vld [vmem:[%s4584_s6 + $0xf28] sm:$0xff]  ;;  %v862_v11 = vld [vmem:[%s4584_s6 + $0xf38] sm:$0xff] }
  0xe3   : > { %1781 = vmatpush1.xpose.msra.mxu0 %v475_v12  ;;  %1888 = vmatpush1.xpose.msra.mxu1 %v477_v13  ;;  %v859_v12 = vld [vmem:[%s4584_s6 + $0xf20] sm:$0xff]  ;;  %v861_v13 = vld [vmem:[%s4584_s6 + $0xf30] sm:$0xff] }
  0xe4   : > { %1782 = vmatprep.subr.mxu0 %v452_v14  ;;  %1889 = vmatprep.subr.mxu1 %v454_v15  ;;  %v836_v14 = vld [vmem:[%s4584_s6 + $0xe68] sm:$0xff]  ;;  %v838_v15 = vld [vmem:[%s4584_s6 + $0xe78] sm:$0xff] }
  0xe7   : > { %1783 = vmatpush1.xpose.msra.mxu0 %v451_v16  ;;  %1890 = vmatpush1.xpose.msra.mxu1 %v453_v17  ;;  %v835_v16 = vld [vmem:[%s4584_s6 + $0xe60] sm:$0xff]  ;;  %v837_v17 = vld [vmem:[%s4584_s6 + $0xe70] sm:$0xff] }
  0xe8   : > { %1784 = vmatprep.subr.mxu0 %v428_v18  ;;  %1891 = vmatprep.subr.mxu1 %v430_v19  ;;  %v812_v18 = vld [vmem:[%s4584_s6 + $0xda8] sm:$0xff]  ;;  %v814_v19 = vld [vmem:[%s4584_s6 + $0xdb8] sm:$0xff] }
  0xeb   : > { %1785 = vmatpush1.xpose.msra.mxu0 %v427_v20  ;;  %1892 = vmatpush1.xpose.msra.mxu1 %v429_v21  ;;  %v811_v20 = vld [vmem:[%s4584_s6 + $0xda0] sm:$0xff]  ;;  %v813_v21 = vld [vmem:[%s4584_s6 + $0xdb0] sm:$0xff] }
  0xec   : > { %1786 = vmatprep.subr.mxu0 %v404_v22  ;;  %1893 = vmatprep.subr.mxu1 %v406_v23  ;;  %v788_v22 = vld [vmem:[%s4584_s6 + $0xce8] sm:$0xff]  ;;  %v790_v23 = vld [vmem:[%s4584_s6 + $0xcf8] sm:$0xff] }
  0xef   : > { %1787 = vmatpush1.xpose.msra.mxu0 %v403_v24  ;;  %1894 = vmatpush1.xpose.msra.mxu1 %v405_v25  ;;  %v787_v24 = vld [vmem:[%s4584_s6 + $0xce0] sm:$0xff]  ;;  %v789_v25 = vld [vmem:[%s4584_s6 + $0xcf0] sm:$0xff] }
  0xf0   : > { %1788 = vmatprep.subr.mxu0 %v380_v26  ;;  %1895 = vmatprep.subr.mxu1 %v382_v27  ;;  %v764_v26 = vld [vmem:[%s4584_s6 + $0xc28] sm:$0xff]  ;;  %v766_v27 = vld [vmem:[%s4584_s6 + $0xc38] sm:$0xff] }
  0xf3   : > { %1789 = vmatpush1.xpose.msra.mxu0 %v379_v28  ;;  %1896 = vmatpush1.xpose.msra.mxu1 %v381_v29  ;;  %v763_v28 = vld [vmem:[%s4584_s6 + $0xc20] sm:$0xff]  ;;  %v765_v29 = vld [vmem:[%s4584_s6 + $0xc30] sm:$0xff] }
  0xf4   : > { %1790 = vmatprep.subr.mxu0 %v1124_v30  ;;  %1897 = vmatprep.subr.mxu1 %v1126_v31  ;;  %v744_v30 = vld [vmem:[%s4584_s6 + $0xb88] sm:$0xff]  ;;  %v746_v31 = vld [vmem:[%s4584_s6 + $0xb98] sm:$0xff] }
  0xf7   : > { %1791 = vmatpush2.xpose.msra.mxu0 %v1123_v32  ;;  %1898 = vmatpush2.xpose.msra.mxu1 %v1125_v33  ;;  %v211_v32 = vld [vmem:[%s7303_s0 + $0x20] sm:$0xff]  ;;  %v213_v33 = vld [vmem:[%s7303_s0 + $0x30] sm:$0xff] }
  0xf8   : > { %1792 = vmatprep.subr.mxu0 %v1100_v34  ;;  %1899 = vmatprep.subr.mxu1 %v1102_v35  ;;  %v743_v34 = vld [vmem:[%s4584_s6 + $0xb80] sm:$0xff]  ;;  %v745_v35 = vld [vmem:[%s4584_s6 + $0xb90] sm:$0xff] }
  0xfb   : > { %1793 = vmatpush2.xpose.msra.mxu0 %v1099_v36  ;;  %1900 = vmatpush2.xpose.msra.mxu1 %v1101_v37  ;;  %v236_v36 = vld [vmem:[%s7303_s0 + $0xe8] sm:$0xff] }
  0xfc   : > { %1794 = vmatprep.subr.mxu0 %v1076_v38  ;;  %1901 = vmatprep.subr.mxu1 %v1078_v39  ;;  %v720_v37 = vld [vmem:[%s4584_s6 + $0xac8] sm:$0xff]  ;;  %v722_v38 = vld [vmem:[%s4584_s6 + $0xad8] sm:$0xff] }
  0xfd   : > { %v238_v39 = vld [vmem:[%s7303_s0 + $0xf8] sm:$0xff] }
  0xff   : > { %1795 = vmatpush2.xpose.msra.mxu0 %v1075_v40  ;;  %1902 = vmatpush2.xpose.msra.mxu1 %v1077_v41  ;;  %v235_v40 = vld [vmem:[%s7303_s0 + $0xe0] sm:$0xff]  ;;  %v237_v41 = vld [vmem:[%s7303_s0 + $0xf0] sm:$0xff] }
 0x100   : > { %1796 = vmatprep.subr.mxu0 %v1052_v42  ;;  %1903 = vmatprep.subr.mxu1 %v1054_v43  ;;  %v719_v42 = vld [vmem:[%s4584_s6 + $0xac0] sm:$0xff]  ;;  %v721_v43 = vld [vmem:[%s4584_s6 + $0xad0] sm:$0xff] }
 0x103   : > { %1797 = vmatpush2.xpose.msra.mxu0 %v1051_v44  ;;  %1904 = vmatpush2.xpose.msra.mxu1 %v1053_v45  ;;  %v260_v44 = vld [vmem:[%s7303_s0 + $0x1a8] sm:$0xff] }
 0x104   : > { %1798 = vmatprep.subr.mxu0 %v1028_v46  ;;  %1905 = vmatprep.subr.mxu1 %v1030_v47  ;;  %v696_v45 = vld [vmem:[%s4584_s6 + $0xa08] sm:$0xff]  ;;  %v698_v46 = vld [vmem:[%s4584_s6 + $0xa18] sm:$0xff] }
 0x105   : > { %v262_v47 = vld [vmem:[%s7303_s0 + $0x1b8] sm:$0xff] }
 0x107   : > { %1799 = vmatpush2.xpose.msra.mxu0 %v1027_v48  ;;  %1906 = vmatpush2.xpose.msra.mxu1 %v1029_v49  ;;  %v259_v48 = vld [vmem:[%s7303_s0 + $0x1a0] sm:$0xff]  ;;  %v261_v49 = vld [vmem:[%s7303_s0 + $0x1b0] sm:$0xff] }
 0x108   : > { %1800 = vmatprep.subr.mxu0 %v1004_v50  ;;  %1907 = vmatprep.subr.mxu1 %v1006_v51  ;;  %v695_v50 = vld [vmem:[%s4584_s6 + $0xa00] sm:$0xff]  ;;  %v697_v51 = vld [vmem:[%s4584_s6 + $0xa10] sm:$0xff] }
 0x10b   : > { %1801 = vmatpush2.xpose.msra.mxu0 %v1003_v52  ;;  %1908 = vmatpush2.xpose.msra.mxu1 %v1005_v53  ;;  %v284_v52 = vld [vmem:[%s7303_s0 + $0x268] sm:$0xff] }
 0x10c   : > { %1802 = vmatprep.subr.mxu0 %v980_v54  ;;  %1909 = vmatprep.subr.mxu1 %v982_v55  ;;  %v672_v53 = vld [vmem:[%s4584_s6 + $0x948] sm:$0xff]  ;;  %v674_v54 = vld [vmem:[%s4584_s6 + $0x958] sm:$0xff] }
 0x10d   : > { %v286_v55 = vld [vmem:[%s7303_s0 + $0x278] sm:$0xff] }
 0x10f   : > { %1803 = vmatpush2.xpose.msra.mxu0 %v979_v56  ;;  %1910 = vmatpush2.xpose.msra.mxu1 %v981_v57  ;;  %v283_v56 = vld [vmem:[%s7303_s0 + $0x260] sm:$0xff]  ;;  %v285_v57 = vld [vmem:[%s7303_s0 + $0x270] sm:$0xff] }
 0x110   : > { %1804 = vmatprep.subr.mxu0 %v956_v58  ;;  %1911 = vmatprep.subr.mxu1 %v958_v59  ;;  %v671_v58 = vld [vmem:[%s4584_s6 + $0x940] sm:$0xff]  ;;  %v673_v59 = vld [vmem:[%s4584_s6 + $0x950] sm:$0xff] }
 0x113   : > { %1805 = vmatpush2.xpose.msra.mxu0 %v955_v60  ;;  %1912 = vmatpush2.xpose.msra.mxu1 %v957_v61  ;;  %v308_v60 = vld [vmem:[%s7303_s0 + $0x328] sm:$0xff] }
 0x114   : > { %1806 = vmatprep.subr.mxu0 %v932_v62  ;;  %1913 = vmatprep.subr.mxu1 %v934_v63  ;;  %v648_v61 = vld [vmem:[%s4584_s6 + $0x888] sm:$0xff]  ;;  %v650_v62 = vld [vmem:[%s4584_s6 + $0x898] sm:$0xff] }
 0x115   : > { %v310_v63 = vld [vmem:[%s7303_s0 + $0x338] sm:$0xff] }
 0x117   : > { %1807 = vmatpush2.xpose.msra.mxu0 %v931_v0  ;;  %1914 = vmatpush2.xpose.msra.mxu1 %v933_v1  ;;  %v307_v0 = vld [vmem:[%s7303_s0 + $0x320] sm:$0xff]  ;;  %v309_v1 = vld [vmem:[%s7303_s0 + $0x330] sm:$0xff] }
 0x118   : > { %1808 = vmatprep.subr.mxu0 %v908_v2  ;;  %1915 = vmatprep.subr.mxu1 %v910_v3  ;;  %v647_v2 = vld [vmem:[%s4584_s6 + $0x880] sm:$0xff]  ;;  %v649_v3 = vld [vmem:[%s4584_s6 + $0x890] sm:$0xff] }
 0x11b   : > { %1809 = vmatpush2.xpose.msra.mxu0 %v907_v4  ;;  %1916 = vmatpush2.xpose.msra.mxu1 %v909_v5  ;;  %v332_v4 = vld [vmem:[%s7303_s0 + $0x3e8] sm:$0xff] }
 0x11c   : > { %1810 = vmatprep.subr.mxu0 %v884_v6  ;;  %1917 = vmatprep.subr.mxu1 %v886_v7  ;;  %v624_v5 = vld [vmem:[%s4584_s6 + $0x7c8] sm:$0xff]  ;;  %v626_v6 = vld [vmem:[%s4584_s6 + $0x7d8] sm:$0xff] }
 0x11d   : > { %v334_v7 = vld [vmem:[%s7303_s0 + $0x3f8] sm:$0xff] }
 0x11f   : > { %1811 = vmatpush2.xpose.msra.mxu0 %v883_v8  ;;  %1918 = vmatpush2.xpose.msra.mxu1 %v885_v9  ;;  %v331_v8 = vld [vmem:[%s7303_s0 + $0x3e0] sm:$0xff]  ;;  %v333_v9 = vld [vmem:[%s7303_s0 + $0x3f0] sm:$0xff] }
 0x120   : > { %1812 = vmatprep.subr.mxu0 %v860_v10  ;;  %1919 = vmatprep.subr.mxu1 %v862_v11  ;;  %v623_v10 = vld [vmem:[%s4584_s6 + $0x7c0] sm:$0xff]  ;;  %v625_v11 = vld [vmem:[%s4584_s6 + $0x7d0] sm:$0xff] }
 0x123   : > { %1813 = vmatpush2.xpose.msra.mxu0 %v859_v12  ;;  %1920 = vmatpush2.xpose.msra.mxu1 %v861_v13  ;;  %v356_v12 = vld [vmem:[%s7303_s0 + $0x4a8] sm:$0x1] }
 0x124   : > { %1814 = vmatprep.subr.mxu0 %v836_v14  ;;  %1921 = vmatprep.subr.mxu1 %v838_v15  ;;  %v600_v13 = vld [vmem:[%s4584_s6 + $0x708] sm:$0xff]  ;;  %v602_v14 = vld [vmem:[%s4584_s6 + $0x718] sm:$0xff] }
 0x125   : > { %v358_v15 = vld [vmem:[%s7303_s0 + $0x4b8] sm:$0x1] }
 0x127   : > { %1815 = vmatpush2.xpose.msra.mxu0 %v835_v16  ;;  %1922 = vmatpush2.xpose.msra.mxu1 %v837_v17  ;;  %v355_v16 = vld [vmem:[%s7303_s0 + $0x4a0] sm:$0x1]  ;;  %v357_v17 = vld [vmem:[%s7303_s0 + $0x4b0] sm:$0x1] }
 0x128   : > { %1816 = vmatprep.subr.mxu0 %v812_v18  ;;  %1923 = vmatprep.subr.mxu1 %v814_v19  ;;  %v599_v18 = vld [vmem:[%s4584_s6 + $0x700] sm:$0xff]  ;;  %v601_v19 = vld [vmem:[%s4584_s6 + $0x710] sm:$0xff] }
 0x12b   : > { %1817 = vmatpush2.xpose.msra.mxu0 %v811_v20  ;;  %1924 = vmatpush2.xpose.msra.mxu1 %v813_v21  ;;  %v576_v20 = vld [vmem:[%s4584_s6 + $0x648] sm:$0xff]  ;;  %v578_v21 = vld [vmem:[%s4584_s6 + $0x658] sm:$0xff] }
 0x12c   : > { %1818 = vmatprep.subr.mxu0 %v788_v22  ;;  %1925 = vmatprep.subr.mxu1 %v790_v23  ;;  %v216_v22 = vld [vmem:[%s7303_s0 + $0x48] sm:$0xff]  ;;  %v218_v23 = vld [vmem:[%s7303_s0 + $0x58] sm:$0xff] }
 0x12f   : > { %1819 = vmatpush2.xpose.msra.mxu0 %v787_v24  ;;  %1926 = vmatpush2.xpose.msra.mxu1 %v789_v25  ;;  %v575_v24 = vld [vmem:[%s4584_s6 + $0x640] sm:$0xff]  ;;  %v577_v25 = vld [vmem:[%s4584_s6 + $0x650] sm:$0xff] }
 0x130   : > { %1820 = vmatprep.subr.mxu0 %v764_v26  ;;  %1927 = vmatprep.subr.mxu1 %v766_v27  ;;  %v552_v26 = vld [vmem:[%s4584_s6 + $0x588] sm:$0xff]  ;;  %v554_v27 = vld [vmem:[%s4584_s6 + $0x598] sm:$0xff] }
 0x133   : > { %1821 = vmatpush2.xpose.msra.mxu0 %v763_v28  ;;  %1928 = vmatpush2.xpose.msra.mxu1 %v765_v29  ;;  %v551_v28 = vld [vmem:[%s4584_s6 + $0x580] sm:$0xff]  ;;  %v553_v29 = vld [vmem:[%s4584_s6 + $0x590] sm:$0xff] }
 0x134   : > { %1972 = vmatprep.subr.mxu0 %v744_v30  ;;  %2079 = vmatprep.subr.mxu1 %v746_v31  ;;  %v528_v30 = vld [vmem:[%s4584_s6 + $0x4c8] sm:$0xff]  ;;  %v530_v31 = vld [vmem:[%s4584_s6 + $0x4d8] sm:$0xff] }
 0x136   : > { %1823 = vmatmul.mubr.f32.vlgmr.msra.gmra.mxu0 %v211_v32  ;;  %1930 = vmatmul.mubr.f32.vlgmr.msra.gmra.mxu1 %v213_v33  ;;  %v527_v32 = vld [vmem:[%s4584_s6 + $0x4c0] sm:$0xff]  ;;  %v529_v33 = vld [vmem:[%s4584_s6 + $0x4d0] sm:$0xff] }
 0x137   : > { %1973 = vmatpush1.xpose.msra.mxu0 %v743_v34  ;;  %2080 = vmatpush1.xpose.msra.mxu1 %v745_v35  ;;  %v504_v34 = vld [vmem:[%s4584_s6 + $0x408] sm:$0xff]  ;;  %v506_v35 = vld [vmem:[%s4584_s6 + $0x418] sm:$0xff] }
 0x138   : > { %1828 = vmatprep.mubr.f32.mxu0 %v236_v36  ;;  %1974 = vmatprep.subr.mxu0 %v720_v37  ;;  %v503_v36 = vld [vmem:[%s4584_s6 + $0x400] sm:$0xff]  ;;  %v505_v37 = vld [vmem:[%s4584_s6 + $0x410] sm:$0xff] }
 0x139   : > { %2081 = vmatprep.subr.mxu1 %v722_v38  ;;  %1935 = vmatprep.mubr.f32.mxu1 %v238_v39  ;;  %v480_v38 = vld [vmem:[%s4584_s6 + $0x348] sm:$0xff]  ;;  %v482_v39 = vld [vmem:[%s4584_s6 + $0x358] sm:$0xff] }
 0x13a   : > { %1829 = vmatmul.mubr.f32.gmra.mxu0 %v235_v40  ;;  %1936 = vmatmul.mubr.f32.gmra.mxu1 %v237_v41  ;;  %v479_v40 = vld [vmem:[%s4584_s6 + $0x340] sm:$0xff]  ;;  %v481_v41 = vld [vmem:[%s4584_s6 + $0x350] sm:$0xff] }
 0x13b   : > { %1975 = vmatpush1.xpose.msra.mxu0 %v719_v42  ;;  %2082 = vmatpush1.xpose.msra.mxu1 %v721_v43  ;;  %v456_v42 = vld [vmem:[%s4584_s6 + $0x288] sm:$0xff]  ;;  %v458_v43 = vld [vmem:[%s4584_s6 + $0x298] sm:$0xff] }
 0x13c   : > { %1834 = vmatprep.mubr.f32.mxu0 %v260_v44  ;;  %1976 = vmatprep.subr.mxu0 %v696_v45  ;;  %v455_v44 = vld [vmem:[%s4584_s6 + $0x280] sm:$0xff]  ;;  %v457_v45 = vld [vmem:[%s4584_s6 + $0x290] sm:$0xff] }
 0x13d   : > { %2083 = vmatprep.subr.mxu1 %v698_v46  ;;  %1941 = vmatprep.mubr.f32.mxu1 %v262_v47  ;;  %v432_v46 = vld [vmem:[%s4584_s6 + $0x1c8] sm:$0xff]  ;;  %v434_v47 = vld [vmem:[%s4584_s6 + $0x1d8] sm:$0xff] }
 0x13e   : > { %1835 = vmatmul.mubr.f32.gmra.mxu0 %v259_v48  ;;  %1942 = vmatmul.mubr.f32.gmra.mxu1 %v261_v49  ;;  %v1529_v48 = vlaneseq  ;;  %v431_v49 = vld [vmem:[%s4584_s6 + $0x1c0] sm:$0xff] }
 0x13f   : > { %1977 = vmatpush1.xpose.msra.mxu0 %v695_v50  ;;  %2084 = vmatpush1.xpose.msra.mxu1 %v697_v51  ;;  %v433_v50 = vld [vmem:[%s4584_s6 + $0x1d0] sm:$0xff]  ;;  %v408_v51 = vld [vmem:[%s4584_s6 + $0x108] sm:$0xff] }
 0x140   : > { %1840 = vmatprep.mubr.f32.mxu0 %v284_v52  ;;  %1978 = vmatprep.subr.mxu0 %v672_v53  ;;  %v410_v52 = vld [vmem:[%s4584_s6 + $0x118] sm:$0xff]  ;;  %v5079_v53 = vshrl.u32 %v1529_v48, 7  ;;  %v1007_v48 = vld [vmem:[%s4584_s6 + $0x13c0] sm:$0xff] }
 0x141   : > { %2085 = vmatprep.subr.mxu1 %v674_v54  ;;  %1947 = vmatprep.mubr.f32.mxu1 %v286_v55  ;;  %v407_v54 = vld [vmem:[%s4584_s6 + $0x100] sm:$0xff]  ;;  %v409_v55 = vld [vmem:[%s4584_s6 + $0x110] sm:$0xff] }
 0x142   : > { %1841 = vmatmul.mubr.f32.gmra.mxu0 %v283_v56  ;;  %1948 = vmatmul.mubr.f32.gmra.mxu1 %v285_v57  ;;  %7314 = vst [vmem:[#allocation6_spill] sm:$0xff] %v5079_v53  ;;  %v384_v56 = vld [vmem:[%s4584_s6 + $0x48] sm:$0xff]  ;;  %v386_v57 = vld [vmem:[%s4584_s6 + $0x58] sm:$0xff] }
 0x143   : > { %1979 = vmatpush1.xpose.msra.mxu0 %v671_v58  ;;  %2086 = vmatpush1.xpose.msra.mxu1 %v673_v59  ;;  %v1531_v58 = vsub.s32 0, %v5079_v53  ;;  %v383_v59 = vld [vmem:[%s4584_s6 + $0x40] sm:$0xff] }
 0x144   : > { %1846 = vmatprep.mubr.f32.mxu0 %v308_v60  ;;  %1980 = vmatprep.subr.mxu0 %v648_v61  ;;  %v385_v60 = vld [vmem:[%s4584_s6 + $0x50] sm:$0xff]  ;;  %v1527_v61 = vld [vmem:[%s5088_s5] sm:$0x7] }
 0x145   : > { %2087 = vmatprep.subr.mxu1 %v650_v62  ;;  %1953 = vmatprep.mubr.f32.mxu1 %v310_v63  ;;  %v1128_v62 = vld [vmem:[%s4584_s6 + $0x1788] sm:$0xff]  ;;  %v1130_v63 = vld [vmem:[%s4584_s6 + $0x1798] sm:$0xff] }
 0x146   : > { %1847 = vmatmul.mubr.f32.gmra.mxu0 %v307_v0  ;;  %1954 = vmatmul.mubr.f32.gmra.mxu1 %v309_v1  ;;  %v5096_v0 = vrot.slane %v1527_v61, %v1531_v58  ;;  %v1127_v1 = vld [vmem:[%s4584_s6 + $0x1780] sm:$0xff] }
 0x147   : > { %1981 = vmatpush1.xpose.msra.mxu0 %v647_v2  ;;  %2088 = vmatpush1.xpose.msra.mxu1 %v649_v3  ;;  %v1129_v2 = vld [vmem:[%s4584_s6 + $0x1790] sm:$0xff]  ;;  %v1104_v3 = vld [vmem:[%s4584_s6 + $0x16c8] sm:$0xff] }
 0x148   : > { %1852 = vmatprep.mubr.f32.mxu0 %v332_v4  ;;  %1982 = vmatprep.subr.mxu0 %v624_v5  ;;  %v1106_v4 = vld [vmem:[%s4584_s6 + $0x16d8] sm:$0xff] }
 0x149   : > { %2089 = vmatprep.subr.mxu1 %v626_v6  ;;  %1959 = vmatprep.mubr.f32.mxu1 %v334_v7 }
 0x14a   : > { %1853 = vmatmul.mubr.f32.gmra.mxu0 %v331_v8  ;;  %1960 = vmatmul.mubr.f32.gmra.mxu1 %v333_v9 }
 0x14b   : > { %1983 = vmatpush1.xpose.msra.mxu0 %v623_v10  ;;  %2090 = vmatpush1.xpose.msra.mxu1 %v625_v11  ;;  %v1103_v10 = vld [vmem:[%s4584_s6 + $0x16c0] sm:$0xff]  ;;  %v1105_v11 = vld [vmem:[%s4584_s6 + $0x16d0] sm:$0xff] }
 0x14c   : > { %1858 = vmatprep.mubr.f32.mxu0 %v356_v12  ;;  %1984 = vmatprep.subr.mxu0 %v600_v13  ;;  %v1080_v13 = vld [vmem:[%s4584_s6 + $0x1608] sm:$0xff] }
 0x14d   : > { %2091 = vmatprep.subr.mxu1 %v602_v14  ;;  %1965 = vmatprep.mubr.f32.mxu1 %v358_v15  ;;  %v1082_v14 = vld [vmem:[%s4584_s6 + $0x1618] sm:$0xff] }
 0x14e   : > { %1859 = vmatmul.mubr.f32.gmra.mxu0 %v355_v16  ;;  %1966 = vmatmul.mubr.f32.gmra.mxu1 %v357_v17 }
 0x14f   : > { %1985 = vmatpush1.xpose.msra.mxu0 %v599_v18  ;;  %2092 = vmatpush1.xpose.msra.mxu1 %v601_v19  ;;  %v1079_v18 = vld [vmem:[%s4584_s6 + $0x1600] sm:$0xff]  ;;  %v1081_v19 = vld [vmem:[%s4584_s6 + $0x1610] sm:$0xff] }
 0x150   : > { %1986 = vmatprep.subr.mxu0 %v576_v20  ;;  %2093 = vmatprep.subr.mxu1 %v578_v21 }
 0x151   : > { %2036 = vmatprep.mubr.f32.mxu0 %v216_v22  ;;  %2143 = vmatprep.mubr.f32.mxu1 %v218_v23  ;;  %v1056_v22 = vld [vmem:[%s4584_s6 + $0x1548] sm:$0xff]  ;;  %v1058_v23 = vld [vmem:[%s4584_s6 + $0x1558] sm:$0xff] }
 0x153   : > { %1987 = vmatpush1.xpose.msra.mxu0 %v575_v24  ;;  %2094 = vmatpush1.xpose.msra.mxu1 %v577_v25 }
 0x154   : > { %1988 = vmatprep.subr.mxu0 %v552_v26  ;;  %2095 = vmatprep.subr.mxu1 %v554_v27 }
 0x157   : > { %1989 = vmatpush1.xpose.msra.mxu0 %v551_v28  ;;  %2096 = vmatpush1.xpose.msra.mxu1 %v553_v29  ;;  %v1055_v28 = vld [vmem:[%s4584_s6 + $0x1540] sm:$0xff]  ;;  %v1057_v29 = vld [vmem:[%s4584_s6 + $0x1550] sm:$0xff] }
 0x158   : > { %1990 = vmatprep.subr.mxu0 %v528_v30  ;;  %2097 = vmatprep.subr.mxu1 %v530_v31 }
 0x15b   : > { %1991 = vmatpush1.xpose.msra.mxu0 %v527_v32  ;;  %2098 = vmatpush1.xpose.msra.mxu1 %v529_v33  ;;  %v1032_v32 = vld [vmem:[%s4584_s6 + $0x1488] sm:$0xff]  ;;  %v1034_v33 = vld [vmem:[%s4584_s6 + $0x1498] sm:$0xff] }
 0x15c   : > { %1992 = vmatprep.subr.mxu0 %v504_v34  ;;  %2099 = vmatprep.subr.mxu1 %v506_v35 }
 0x15f   : > { %1993 = vmatpush1.xpose.msra.mxu0 %v503_v36  ;;  %2100 = vmatpush1.xpose.msra.mxu1 %v505_v37 }
 0x160   : > { %1994 = vmatprep.subr.mxu0 %v480_v38  ;;  %2101 = vmatprep.subr.mxu1 %v482_v39  ;;  %v1031_v38 = vld [vmem:[%s4584_s6 + $0x1480] sm:$0xff]  ;;  %v1033_v39 = vld [vmem:[%s4584_s6 + $0x1490] sm:$0xff] }
 0x163   : > { %1995 = vmatpush1.xpose.msra.mxu0 %v479_v40  ;;  %2102 = vmatpush1.xpose.msra.mxu1 %v481_v41 }
 0x164   : > { %1996 = vmatprep.subr.mxu0 %v456_v42  ;;  %2103 = vmatprep.subr.mxu1 %v458_v43  ;;  %v1008_v42 = vld [vmem:[%s4584_s6 + $0x13c8] sm:$0xff]  ;;  %v1010_v43 = vld [vmem:[%s4584_s6 + $0x13d8] sm:$0xff] }
 0x167   : > { %1997 = vmatpush1.xpose.msra.mxu0 %v455_v44  ;;  %2104 = vmatpush1.xpose.msra.mxu1 %v457_v45 }
 0x168   : > { %1998 = vmatprep.subr.mxu0 %v432_v46  ;;  %2105 = vmatprep.subr.mxu1 %v434_v47 }
 0x16b   : > { %1999 = vmatpush1.xpose.msra.mxu0 %v431_v49  ;;  %2106 = vmatpush1.xpose.msra.mxu1 %v433_v50  ;;  %v1009_v49 = vld [vmem:[%s4584_s6 + $0x13d0] sm:$0xff] }
 0x16c   : > { %2000 = vmatprep.subr.mxu0 %v408_v51  ;;  %2107 = vmatprep.subr.mxu1 %v410_v52  ;;  %v984_v52 = vld [vmem:[%s4584_s6 + $0x1308] sm:$0xff] }
 0x16f   : > { %2001 = vmatpush1.xpose.msra.mxu0 %v407_v54  ;;  %2108 = vmatpush1.xpose.msra.mxu1 %v409_v55  ;;  %v986_v54 = vld [vmem:[%s4584_s6 + $0x1318] sm:$0xff] }
 0x170   : > { %2002 = vmatprep.subr.mxu0 %v384_v56  ;;  %2109 = vmatprep.subr.mxu1 %v386_v57 }
 0x173   : > { %2003 = vmatpush1.xpose.msra.mxu0 %v383_v59  ;;  %2110 = vmatpush1.xpose.msra.mxu1 %v385_v60  ;;  %v983_v59 = vld [vmem:[%s4584_s6 + $0x1300] sm:$0xff]  ;;  %v985_v60 = vld [vmem:[%s4584_s6 + $0x1310] sm:$0xff] }
 0x174   : > { %2004 = vmatprep.subr.mxu0 %v1128_v62  ;;  %2111 = vmatprep.subr.mxu1 %v1130_v63  ;;  %v960_v63 = vld [vmem:[%s4584_s6 + $0x1248] sm:$0xff] }
 0x176   : > { %v1610_v5 = vpop.f32.mrf.mxu0  ;;  %v1717_v6 = vpop.f32.mrf.mxu1 }
 0x177   : > { %v1611_v7 = vadd.f32 %v1610_v5, %v5096_v0  ;;  %2005 = vmatpush2.xpose.msra.mxu0 %v1127_v1  ;;  %2112 = vmatpush2.xpose.msra.mxu1 %v1129_v2  ;;  %v962_v1 = vld [vmem:[%s4584_s6 + $0x1258] sm:$0xff]  ;;  %v959_v5 = vld [vmem:[%s4584_s6 + $0x1240] sm:$0xff] }
 0x178   : > { %v5103_v8 = vpop.f32.mrf.mxu0  ;;  %v5105_v9 = vpop.f32.mrf.mxu1  ;;  %2006 = vmatprep.subr.mxu0 %v1104_v3  ;;  %2113 = vmatprep.subr.mxu1 %v1106_v4 }
 0x179   : > { %v5109_v12 = vadd.f32 %v1717_v6, %v1611_v7  ;;  %v961_v6 = vld [vmem:[%s4584_s6 + $0x1250] sm:$0xff] }
 0x17a   : > { %v1616_v15 = vpop.f32.mrf.mxu0  ;;  %v1723_v16 = vpop.f32.mrf.mxu1 }
 0x17b   : > { %2007 = vmatpush2.xpose.msra.mxu0 %v1103_v10  ;;  %2114 = vmatpush2.xpose.msra.mxu1 %v1105_v11  ;;  %v1617_v17 = vadd.f32 %v1616_v15, %v5096_v0  ;;  %v936_v10 = vld [vmem:[%s4584_s6 + $0x1188] sm:$0xff]  ;;  %v938_v11 = vld [vmem:[%s4584_s6 + $0x1198] sm:$0xff] }
 0x17c   : > { %2008 = vmatprep.subr.mxu0 %v1080_v13  ;;  %2115 = vmatprep.subr.mxu1 %v1082_v14  ;;  %v5116_v20 = vpop.f32.mrf.mxu0  ;;  %v5118_v21 = vpop.f32.mrf.mxu1  ;;  %v935_v14 = vld [vmem:[%s4584_s6 + $0x1180] sm:$0xff]  ;;  %v912_v15 = vld [vmem:[%s4584_s6 + $0x10c8] sm:$0xff] }
 0x17d   : > { %v5122_v24 = vadd.f32 %v1723_v16, %v1617_v17  ;;  %v914_v16 = vld [vmem:[%s4584_s6 + $0x10d8] sm:$0xff]  ;;  %v911_v17 = vld [vmem:[%s4584_s6 + $0x10c0] sm:$0xff] }
 0x17e   : > { %v1622_v25 = vpop.f32.mrf.mxu0  ;;  %v1729_v26 = vpop.f32.mrf.mxu1 }
 0x17f   : > { %2009 = vmatpush2.xpose.msra.mxu0 %v1079_v18  ;;  %2116 = vmatpush2.xpose.msra.mxu1 %v1081_v19  ;;  %v1623_v27 = vadd.f32 %v1622_v25, %v5096_v0  ;;  %v913_v18 = vld [vmem:[%s4584_s6 + $0x10d0] sm:$0xff]  ;;  %v888_v19 = vld [vmem:[%s4584_s6 + $0x1008] sm:$0xff] }
 0x180   : > { %2010 = vmatprep.subr.mxu0 %v1056_v22  ;;  %2117 = vmatprep.subr.mxu1 %v1058_v23  ;;  %v5127_v30 = vpop.f32.mrf.mxu0  ;;  %v5129_v31 = vpop.f32.mrf.mxu1  ;;  %v890_v22 = vld [vmem:[%s4584_s6 + $0x1018] sm:$0xff]  ;;  %v887_v23 = vld [vmem:[%s4584_s6 + $0x1000] sm:$0xff]  ;;  %v889_v25 = vld [vmem:[%s4584_s6 + $0x1010] sm:$0xff] }
 0x181   : > { %v5133_v34 = vadd.f32 %v1729_v26, %v1623_v27  ;;  %v864_v26 = vld [vmem:[%s4584_s6 + $0xf48] sm:$0xff]  ;;  %v866_v27 = vld [vmem:[%s4584_s6 + $0xf58] sm:$0xff] }
 0x182   : > { %v1628_v35 = vpop.f32.mrf.mxu0  ;;  %v1735_v36 = vpop.f32.mrf.mxu1 }
 0x183   : > { %2011 = vmatpush2.xpose.msra.mxu0 %v1055_v28  ;;  %2118 = vmatpush2.xpose.msra.mxu1 %v1057_v29  ;;  %v1629_v37 = vadd.f32 %v1628_v35, %v5096_v0  ;;  %v863_v28 = vld [vmem:[%s4584_s6 + $0xf40] sm:$0xff]  ;;  %v865_v29 = vld [vmem:[%s4584_s6 + $0xf50] sm:$0xff] }
 0x184   : > { %2012 = vmatprep.subr.mxu0 %v1032_v32  ;;  %2119 = vmatprep.subr.mxu1 %v1034_v33  ;;  %v5138_v40 = vpop.f32.mrf.mxu0  ;;  %v5140_v41 = vpop.f32.mrf.mxu1  ;;  %v840_v32 = vld [vmem:[%s4584_s6 + $0xe88] sm:$0xff]  ;;  %v842_v33 = vld [vmem:[%s4584_s6 + $0xe98] sm:$0xff]  ;;  %v839_v35 = vld [vmem:[%s4584_s6 + $0xe80] sm:$0xff] }
 0x185   : > { %v5144_v44 = vadd.f32 %v1735_v36, %v1629_v37  ;;  %v841_v36 = vld [vmem:[%s4584_s6 + $0xe90] sm:$0xff]  ;;  %v816_v37 = vld [vmem:[%s4584_s6 + $0xdc8] sm:$0xff] }
 0x186   : > { %v1634_v45 = vpop.f32.mrf.mxu0  ;;  %v1741_v46 = vpop.f32.mrf.mxu1 }
 0x187   : > { %2013 = vmatpush2.xpose.msra.mxu0 %v1031_v38  ;;  %2120 = vmatpush2.xpose.msra.mxu1 %v1033_v39  ;;  %v1635_v47 = vadd.f32 %v1634_v45, %v5096_v0  ;;  %v818_v38 = vld [vmem:[%s4584_s6 + $0xdd8] sm:$0xff]  ;;  %v815_v39 = vld [vmem:[%s4584_s6 + $0xdc0] sm:$0xff] }
 0x188   : > { %2014 = vmatprep.subr.mxu0 %v1008_v42  ;;  %2121 = vmatprep.subr.mxu1 %v1010_v43  ;;  %v5149_v50 = vpop.f32.mrf.mxu0  ;;  %v5151_v51 = vpop.f32.mrf.mxu1  ;;  %v817_v42 = vld [vmem:[%s4584_s6 + $0xdd0] sm:$0xff]  ;;  %v792_v43 = vld [vmem:[%s4584_s6 + $0xd08] sm:$0xff]  ;;  %v794_v45 = vld [vmem:[%s4584_s6 + $0xd18] sm:$0xff] }
 0x189   : > { %v5155_v55 = vadd.f32 %v1741_v46, %v1635_v47  ;;  %v791_v46 = vld [vmem:[%s4584_s6 + $0xd00] sm:$0xff]  ;;  %v793_v47 = vld [vmem:[%s4584_s6 + $0xd10] sm:$0xff] }
 0x18a   : > { %v1640_v56 = vpop.f32.mrf.mxu0  ;;  %v1747_v57 = vpop.f32.mrf.mxu1 }
 0x18b   : > { %2015 = vmatpush2.xpose.msra.mxu0 %v1007_v48  ;;  %2122 = vmatpush2.xpose.msra.mxu1 %v1009_v49  ;;  %v1641_v58 = vadd.f32 %v1640_v56, %v5096_v0  ;;  %v768_v48 = vld [vmem:[%s4584_s6 + $0xc48] sm:$0xff]  ;;  %v770_v49 = vld [vmem:[%s4584_s6 + $0xc58] sm:$0xff] }
 0x18c   : > { %2016 = vmatprep.subr.mxu0 %v984_v52  ;;  %2123 = vmatprep.subr.mxu1 %v986_v54  ;;  %v5160_v61 = vpop.f32.mrf.mxu0  ;;  %v5162_v62 = vpop.f32.mrf.mxu1  ;;  %v767_v52 = vld [vmem:[%s4584_s6 + $0xc40] sm:$0xff]  ;;  %v769_v54 = vld [vmem:[%s4584_s6 + $0xc50] sm:$0xff]  ;;  %v748_v56 = vld [vmem:[%s4584_s6 + $0xba8] sm:$0xff] }
 0x18d   : > { %v5166_v2 = vadd.f32 %v1747_v57, %v1641_v58  ;;  %v750_v57 = vld [vmem:[%s4584_s6 + $0xbb8] sm:$0xff]  ;;  %v215_v58 = vld [vmem:[%s7303_s0 + $0x40] sm:$0xff] }
 0x18e   : > { %v1646_v3 = vpop.f32.mrf.mxu0  ;;  %v1753_v7 = vpop.f32.mrf.mxu1 }
 0x18f   : > { %2017 = vmatpush2.xpose.msra.mxu0 %v983_v59  ;;  %2124 = vmatpush2.xpose.msra.mxu1 %v985_v60  ;;  %v1647_v4 = vadd.f32 %v1646_v3, %v5096_v0  ;;  %v937_v0 = vld [vmem:[%s4584_s6 + $0x1190] sm:$0xff]  ;;  %v747_v60 = vld [vmem:[%s4584_s6 + $0xba0] sm:$0xff]  ;;  %v724_v3 = vld [vmem:[%s4584_s6 + $0xae8] sm:$0xff] }
 0x190   : > { %2018 = vmatprep.subr.mxu0 %v960_v63  ;;  %2125 = vmatprep.subr.mxu1 %v962_v1  ;;  %v217_v59 = vld [vmem:[%s7303_s0 + $0x50] sm:$0xff]  ;;  %v240_v1 = vld [vmem:[%s7303_s0 + $0x108] sm:$0xff] }
 0x191   : > { %v5173_v13 = vadd.f32 %v1753_v7, %v1647_v4  ;;  %v749_v63 = vld [vmem:[%s4584_s6 + $0xbb0] sm:$0xff]  ;;  %v726_v4 = vld [vmem:[%s4584_s6 + $0xaf8] sm:$0xff] }
 0x192   : > { %v241_v7 = vld [vmem:[%s7303_s0 + $0x110] sm:$0xff] }
 0x193   : > { %2019 = vmatpush2.xpose.msra.mxu0 %v959_v5  ;;  %2126 = vmatpush2.xpose.msra.mxu1 %v961_v6  ;;  %v242_v5 = vld [vmem:[%s7303_s0 + $0x118] sm:$0xff]  ;;  %v239_v6 = vld [vmem:[%s7303_s0 + $0x100] sm:$0xff] }
 0x194   : > { %2020 = vmatprep.subr.mxu0 %v936_v10  ;;  %2127 = vmatprep.subr.mxu1 %v938_v11  ;;  %v723_v10 = vld [vmem:[%s4584_s6 + $0xae0] sm:$0xff]  ;;  %v725_v11 = vld [vmem:[%s4584_s6 + $0xaf0] sm:$0xff] }
 0x197   : > { %2021 = vmatpush2.xpose.msra.mxu0 %v935_v14  ;;  %2128 = vmatpush2.xpose.msra.mxu1 %v937_v0  ;;  %v264_v14 = vld [vmem:[%s7303_s0 + $0x1c8] sm:$0xff] }
 0x198   : > { %2022 = vmatprep.subr.mxu0 %v912_v15  ;;  %2129 = vmatprep.subr.mxu1 %v914_v16  ;;  %v700_v0 = vld [vmem:[%s4584_s6 + $0xa28] sm:$0xff]  ;;  %v702_v15 = vld [vmem:[%s4584_s6 + $0xa38] sm:$0xff] }
 0x199   : > { %v266_v16 = vld [vmem:[%s7303_s0 + $0x1d8] sm:$0xff] }
 0x19b   : > { %2023 = vmatpush2.xpose.msra.mxu0 %v911_v17  ;;  %2130 = vmatpush2.xpose.msra.mxu1 %v913_v18  ;;  %v263_v17 = vld [vmem:[%s7303_s0 + $0x1c0] sm:$0xff]  ;;  %v265_v18 = vld [vmem:[%s7303_s0 + $0x1d0] sm:$0xff] }
 0x19c   : > { %2024 = vmatprep.subr.mxu0 %v888_v19  ;;  %2131 = vmatprep.subr.mxu1 %v890_v22  ;;  %v699_v19 = vld [vmem:[%s4584_s6 + $0xa20] sm:$0xff]  ;;  %v701_v22 = vld [vmem:[%s4584_s6 + $0xa30] sm:$0xff] }
 0x19f   : > { %2025 = vmatpush2.xpose.msra.mxu0 %v887_v23  ;;  %2132 = vmatpush2.xpose.msra.mxu1 %v889_v25  ;;  %v288_v23 = vld [vmem:[%s7303_s0 + $0x288] sm:$0xff] }
 0x1a0   : > { %2026 = vmatprep.subr.mxu0 %v864_v26  ;;  %2133 = vmatprep.subr.mxu1 %v866_v27  ;;  %v676_v25 = vld [vmem:[%s4584_s6 + $0x968] sm:$0xff]  ;;  %v678_v26 = vld [vmem:[%s4584_s6 + $0x978] sm:$0xff] }
 0x1a1   : > { %v290_v27 = vld [vmem:[%s7303_s0 + $0x298] sm:$0xff] }
 0x1a3   : > { %2027 = vmatpush2.xpose.msra.mxu0 %v863_v28  ;;  %2134 = vmatpush2.xpose.msra.mxu1 %v865_v29  ;;  %v287_v28 = vld [vmem:[%s7303_s0 + $0x280] sm:$0xff]  ;;  %v289_v29 = vld [vmem:[%s7303_s0 + $0x290] sm:$0xff] }
 0x1a4   : > { %2028 = vmatprep.subr.mxu0 %v840_v32  ;;  %2135 = vmatprep.subr.mxu1 %v842_v33  ;;  %v675_v32 = vld [vmem:[%s4584_s6 + $0x960] sm:$0xff]  ;;  %v677_v33 = vld [vmem:[%s4584_s6 + $0x970] sm:$0xff] }
 0x1a7   : > { %2029 = vmatpush2.xpose.msra.mxu0 %v839_v35  ;;  %2136 = vmatpush2.xpose.msra.mxu1 %v841_v36  ;;  %v312_v35 = vld [vmem:[%s7303_s0 + $0x348] sm:$0xff] }
 0x1a8   : > { %2030 = vmatprep.subr.mxu0 %v816_v37  ;;  %2137 = vmatprep.subr.mxu1 %v818_v38  ;;  %v652_v36 = vld [vmem:[%s4584_s6 + $0x8a8] sm:$0xff]  ;;  %v654_v37 = vld [vmem:[%s4584_s6 + $0x8b8] sm:$0xff] }
 0x1a9   : > { %v314_v38 = vld [vmem:[%s7303_s0 + $0x358] sm:$0xff] }
 0x1ab   : > { %2031 = vmatpush2.xpose.msra.mxu0 %v815_v39  ;;  %2138 = vmatpush2.xpose.msra.mxu1 %v817_v42  ;;  %v311_v39 = vld [vmem:[%s7303_s0 + $0x340] sm:$0xff]  ;;  %v313_v42 = vld [vmem:[%s7303_s0 + $0x350] sm:$0xff] }
 0x1ac   : > { %2032 = vmatprep.subr.mxu0 %v792_v43  ;;  %2139 = vmatprep.subr.mxu1 %v794_v45  ;;  %v651_v43 = vld [vmem:[%s4584_s6 + $0x8a0] sm:$0xff]  ;;  %v653_v45 = vld [vmem:[%s4584_s6 + $0x8b0] sm:$0xff] }
 0x1af   : > { %2033 = vmatpush2.xpose.msra.mxu0 %v791_v46  ;;  %2140 = vmatpush2.xpose.msra.mxu1 %v793_v47  ;;  %v336_v46 = vld [vmem:[%s7303_s0 + $0x408] sm:$0xff] }
 0x1b0   : > { %2034 = vmatprep.subr.mxu0 %v768_v48  ;;  %2141 = vmatprep.subr.mxu1 %v770_v49  ;;  %v628_v47 = vld [vmem:[%s4584_s6 + $0x7e8] sm:$0xff]  ;;  %v630_v48 = vld [vmem:[%s4584_s6 + $0x7f8] sm:$0xff] }
 0x1b1   : > { %v338_v49 = vld [vmem:[%s7303_s0 + $0x418] sm:$0xff] }
 0x1b3   : > { %2035 = vmatpush2.xpose.msra.mxu0 %v767_v52  ;;  %2142 = vmatpush2.xpose.msra.mxu1 %v769_v54  ;;  %v335_v52 = vld [vmem:[%s7303_s0 + $0x400] sm:$0xff]  ;;  %v337_v54 = vld [vmem:[%s7303_s0 + $0x410] sm:$0xff] }
 0x1b4   : > { %2186 = vmatprep.subr.mxu0 %v748_v56  ;;  %2293 = vmatprep.subr.mxu1 %v750_v57  ;;  %v627_v56 = vld [vmem:[%s4584_s6 + $0x7e0] sm:$0xff]  ;;  %v629_v57 = vld [vmem:[%s4584_s6 + $0x7f0] sm:$0xff] }
 0x1b6   : > { %2037 = vmatmul.mubr.f32.vlgmr.msra.gmra.mxu0 %v215_v58  ;;  %2144 = vmatmul.mubr.f32.vlgmr.msra.gmra.mxu1 %v217_v59  ;;  %v360_v58 = vld [vmem:[%s7303_s0 + $0x4c8] sm:$0x1] }
 0x1b7   : > { %2187 = vmatpush1.xpose.msra.mxu0 %v747_v60  ;;  %2294 = vmatpush1.xpose.msra.mxu1 %v749_v63  ;;  %v604_v59 = vld [vmem:[%s4584_s6 + $0x728] sm:$0xff]  ;;  %v606_v60 = vld [vmem:[%s4584_s6 + $0x738] sm:$0xff] }
 0x1b8   : > { %2042 = vmatprep.mubr.f32.mxu0 %v240_v1  ;;  %2188 = vmatprep.subr.mxu0 %v724_v3  ;;  %v362_v63 = vld [vmem:[%s7303_s0 + $0x4d8] sm:$0x1]  ;;  %v359_v1 = vld [vmem:[%s7303_s0 + $0x4c0] sm:$0x1]  ;;  %v361_v3 = vld [vmem:[%s7303_s0 + $0x4d0] sm:$0x1] }
 0x1b9   : > { %2295 = vmatprep.subr.mxu1 %v726_v4  ;;  %2149 = vmatprep.mubr.f32.mxu1 %v242_v5  ;;  %v603_v4 = vld [vmem:[%s4584_s6 + $0x720] sm:$0xff]  ;;  %v605_v5 = vld [vmem:[%s4584_s6 + $0x730] sm:$0xff] }
 0x1ba   : > { %2043 = vmatmul.mubr.f32.gmra.mxu0 %v239_v6  ;;  %2150 = vmatmul.mubr.f32.gmra.mxu1 %v241_v7  ;;  %v580_v6 = vld [vmem:[%s4584_s6 + $0x668] sm:$0xff]  ;;  %v582_v7 = vld [vmem:[%s4584_s6 + $0x678] sm:$0xff] }
 0x1bb   : > { %2189 = vmatpush1.xpose.msra.mxu0 %v723_v10  ;;  %2296 = vmatpush1.xpose.msra.mxu1 %v725_v11  ;;  %v220_v10 = vld [vmem:[%s7303_s0 + $0x68] sm:$0xff]  ;;  %v222_v11 = vld [vmem:[%s7303_s0 + $0x78] sm:$0xff] }
 0x1bc   : > { %2048 = vmatprep.mubr.f32.mxu0 %v264_v14  ;;  %2190 = vmatprep.subr.mxu0 %v700_v0  ;;  %v579_v14 = vld [vmem:[%s4584_s6 + $0x660] sm:$0xff]  ;;  %v581_v0 = vld [vmem:[%s4584_s6 + $0x670] sm:$0xff] }
 0x1bd   : > { %2297 = vmatprep.subr.mxu1 %v702_v15  ;;  %2155 = vmatprep.mubr.f32.mxu1 %v266_v16  ;;  %v556_v15 = vld [vmem:[%s4584_s6 + $0x5a8] sm:$0xff]  ;;  %v558_v16 = vld [vmem:[%s4584_s6 + $0x5b8] sm:$0xff] }
 0x1be   : > { %2049 = vmatmul.mubr.f32.gmra.mxu0 %v263_v17  ;;  %2156 = vmatmul.mubr.f32.gmra.mxu1 %v265_v18  ;;  %v555_v17 = vld [vmem:[%s4584_s6 + $0x5a0] sm:$0xff]  ;;  %v557_v18 = vld [vmem:[%s4584_s6 + $0x5b0] sm:$0xff] }
 0x1bf   : > { %2191 = vmatpush1.xpose.msra.mxu0 %v699_v19  ;;  %2298 = vmatpush1.xpose.msra.mxu1 %v701_v22  ;;  %v532_v19 = vld [vmem:[%s4584_s6 + $0x4e8] sm:$0xff]  ;;  %v534_v22 = vld [vmem:[%s4584_s6 + $0x4f8] sm:$0xff] }
 0x1c0   : > { %2054 = vmatprep.mubr.f32.mxu0 %v288_v23  ;;  %2192 = vmatprep.subr.mxu0 %v676_v25  ;;  %v531_v23 = vld [vmem:[%s4584_s6 + $0x4e0] sm:$0xff]  ;;  %v533_v25 = vld [vmem:[%s4584_s6 + $0x4f0] sm:$0xff] }
 0x1c1   : > { %2299 = vmatprep.subr.mxu1 %v678_v26  ;;  %2161 = vmatprep.mubr.f32.mxu1 %v290_v27  ;;  %v508_v26 = vld [vmem:[%s4584_s6 + $0x428] sm:$0xff]  ;;  %v510_v27 = vld [vmem:[%s4584_s6 + $0x438] sm:$0xff] }
 0x1c2   : > { %2055 = vmatmul.mubr.f32.gmra.mxu0 %v287_v28  ;;  %2162 = vmatmul.mubr.f32.gmra.mxu1 %v289_v29  ;;  %v507_v28 = vld [vmem:[%s4584_s6 + $0x420] sm:$0xff]  ;;  %v509_v29 = vld [vmem:[%s4584_s6 + $0x430] sm:$0xff] }
 0x1c3   : > { %2193 = vmatpush1.xpose.msra.mxu0 %v675_v32  ;;  %2300 = vmatpush1.xpose.msra.mxu1 %v677_v33  ;;  %v484_v32 = vld [vmem:[%s4584_s6 + $0x368] sm:$0xff]  ;;  %v486_v33 = vld [vmem:[%s4584_s6 + $0x378] sm:$0xff] }
 0x1c4   : > { %2060 = vmatprep.mubr.f32.mxu0 %v312_v35  ;;  %2194 = vmatprep.subr.mxu0 %v652_v36  ;;  %v483_v35 = vld [vmem:[%s4584_s6 + $0x360] sm:$0xff]  ;;  %v485_v36 = vld [vmem:[%s4584_s6 + $0x370] sm:$0xff] }
 0x1c5   : > { %2301 = vmatprep.subr.mxu1 %v654_v37  ;;  %2167 = vmatprep.mubr.f32.mxu1 %v314_v38  ;;  %v460_v37 = vld [vmem:[%s4584_s6 + $0x2a8] sm:$0xff]  ;;  %v462_v38 = vld [vmem:[%s4584_s6 + $0x2b8] sm:$0xff] }
 0x1c6   : > { %2061 = vmatmul.mubr.f32.gmra.mxu0 %v311_v39  ;;  %2168 = vmatmul.mubr.f32.gmra.mxu1 %v313_v42  ;;  %v459_v39 = vld [vmem:[%s4584_s6 + $0x2a0] sm:$0xff]  ;;  %v461_v42 = vld [vmem:[%s4584_s6 + $0x2b0] sm:$0xff] }
 0x1c7   : > { %2195 = vmatpush1.xpose.msra.mxu0 %v651_v43  ;;  %2302 = vmatpush1.xpose.msra.mxu1 %v653_v45  ;;  %v436_v43 = vld [vmem:[%s4584_s6 + $0x1e8] sm:$0xff]  ;;  %v438_v45 = vld [vmem:[%s4584_s6 + $0x1f8] sm:$0xff] }
 0x1c8   : > { %2066 = vmatprep.mubr.f32.mxu0 %v336_v46  ;;  %2196 = vmatprep.subr.mxu0 %v628_v47  ;;  %v435_v46 = vld [vmem:[%s4584_s6 + $0x1e0] sm:$0xff]  ;;  %v437_v47 = vld [vmem:[%s4584_s6 + $0x1f0] sm:$0xff] }
 0x1c9   : > { %2303 = vmatprep.subr.mxu1 %v630_v48  ;;  %2173 = vmatprep.mubr.f32.mxu1 %v338_v49  ;;  %v412_v48 = vld [vmem:[%s4584_s6 + $0x128] sm:$0xff]  ;;  %v414_v49 = vld [vmem:[%s4584_s6 + $0x138] sm:$0xff] }
 0x1ca   : > { %2067 = vmatmul.mubr.f32.gmra.mxu0 %v335_v52  ;;  %2174 = vmatmul.mubr.f32.gmra.mxu1 %v337_v54  ;;  %v411_v52 = vld [vmem:[%s4584_s6 + $0x120] sm:$0xff]  ;;  %v413_v54 = vld [vmem:[%s4584_s6 + $0x130] sm:$0xff] }
 0x1cb   : > { %2197 = vmatpush1.xpose.msra.mxu0 %v627_v56  ;;  %2304 = vmatpush1.xpose.msra.mxu1 %v629_v57  ;;  %v388_v56 = vld [vmem:[%s4584_s6 + $0x68] sm:$0xff]  ;;  %v390_v57 = vld [vmem:[%s4584_s6 + $0x78] sm:$0xff] }
 0x1cc   : > { %2072 = vmatprep.mubr.f32.mxu0 %v360_v58  ;;  %2198 = vmatprep.subr.mxu0 %v604_v59  ;;  %v387_v58 = vld [vmem:[%s4584_s6 + $0x60] sm:$0xff]  ;;  %v389_v59 = vld [vmem:[%s4584_s6 + $0x70] sm:$0xff] }
 0x1cd   : > { %2305 = vmatprep.subr.mxu1 %v606_v60  ;;  %2179 = vmatprep.mubr.f32.mxu1 %v362_v63  ;;  %v1132_v60 = vld [vmem:[%s4584_s6 + $0x17a8] sm:$0xff]  ;;  %v1134_v63 = vld [vmem:[%s4584_s6 + $0x17b8] sm:$0xff] }
 0x1ce   : > { %2073 = vmatmul.mubr.f32.gmra.mxu0 %v359_v1  ;;  %2180 = vmatmul.mubr.f32.gmra.mxu1 %v361_v3  ;;  %v5355_v1 = vpop.f32.mrf.mxu0  ;;  %v5357_v3 = vpop.f32.mrf.mxu1 }
 0x1cf   : > { %2199 = vmatpush1.xpose.msra.mxu0 %v603_v4  ;;  %2306 = vmatpush1.xpose.msra.mxu1 %v605_v5  ;;  %v1131_v4 = vld [vmem:[%s4584_s6 + $0x17a0] sm:$0xff]  ;;  %v1133_v5 = vld [vmem:[%s4584_s6 + $0x17b0] sm:$0xff] }
 0x1d0   : > { %2200 = vmatprep.subr.mxu0 %v580_v6  ;;  %2307 = vmatprep.subr.mxu1 %v582_v7  ;;  %v1108_v6 = vld [vmem:[%s4584_s6 + $0x16e8] sm:$0xff]  ;;  %v1110_v7 = vld [vmem:[%s4584_s6 + $0x16f8] sm:$0xff] }
 0x1d1   : > { %2250 = vmatprep.mubr.f32.mxu0 %v220_v10  ;;  %2357 = vmatprep.mubr.f32.mxu1 %v222_v11 }
 0x1d3   : > { %2201 = vmatpush1.xpose.msra.mxu0 %v579_v14  ;;  %2308 = vmatpush1.xpose.msra.mxu1 %v581_v0 }
 0x1d4   : > { %2202 = vmatprep.subr.mxu0 %v556_v15  ;;  %2309 = vmatprep.subr.mxu1 %v558_v16  ;;  %v1107_v16 = vld [vmem:[%s4584_s6 + $0x16e0] sm:$0xff] }
 0x1d7   : > { %2203 = vmatpush1.xpose.msra.mxu0 %v555_v17  ;;  %2310 = vmatpush1.xpose.msra.mxu1 %v557_v18  ;;  %v1109_v17 = vld [vmem:[%s4584_s6 + $0x16f0] sm:$0xff] }
 0x1d8   : > { %2204 = vmatprep.subr.mxu0 %v532_v19  ;;  %2311 = vmatprep.subr.mxu1 %v534_v22  ;;  %v1084_v19 = vld [vmem:[%s4584_s6 + $0x1628] sm:$0xff]  ;;  %v1086_v22 = vld [vmem:[%s4584_s6 + $0x1638] sm:$0xff] }
 0x1db   : > { %2205 = vmatpush1.xpose.msra.mxu0 %v531_v23  ;;  %2312 = vmatpush1.xpose.msra.mxu1 %v533_v25 }
 0x1dc   : > { %2206 = vmatprep.subr.mxu0 %v508_v26  ;;  %2313 = vmatprep.subr.mxu1 %v510_v27 }
 0x1df   : > { %2207 = vmatpush1.xpose.msra.mxu0 %v507_v28  ;;  %2314 = vmatpush1.xpose.msra.mxu1 %v509_v29  ;;  %v1083_v28 = vld [vmem:[%s4584_s6 + $0x1620] sm:$0xff]  ;;  %v1085_v29 = vld [vmem:[%s4584_s6 + $0x1630] sm:$0xff] }
 0x1e0   : > { %2208 = vmatprep.subr.mxu0 %v484_v32  ;;  %2315 = vmatprep.subr.mxu1 %v486_v33  ;;  %v1060_v33 = vld [vmem:[%s4584_s6 + $0x1568] sm:$0xff] }
 0x1e3   : > { %2209 = vmatpush1.xpose.msra.mxu0 %v483_v35  ;;  %2316 = vmatpush1.xpose.msra.mxu1 %v485_v36  ;;  %v1062_v35 = vld [vmem:[%s4584_s6 + $0x1578] sm:$0xff] }
 0x1e4   : > { %2210 = vmatprep.subr.mxu0 %v460_v37  ;;  %2317 = vmatprep.subr.mxu1 %v462_v38 }
 0x1e7   : > { %2211 = vmatpush1.xpose.msra.mxu0 %v459_v39  ;;  %2318 = vmatpush1.xpose.msra.mxu1 %v461_v42  ;;  %v1059_v42 = vld [vmem:[%s4584_s6 + $0x1560] sm:$0xff] }
 0x1e8   : > { %2212 = vmatprep.subr.mxu0 %v436_v43  ;;  %2319 = vmatprep.subr.mxu1 %v438_v45  ;;  %v1061_v43 = vld [vmem:[%s4584_s6 + $0x1570] sm:$0xff] }
 0x1eb   : > { %2213 = vmatpush1.xpose.msra.mxu0 %v435_v46  ;;  %2320 = vmatpush1.xpose.msra.mxu1 %v437_v47  ;;  %v1036_v46 = vld [vmem:[%s4584_s6 + $0x14a8] sm:$0xff]  ;;  %v1038_v47 = vld [vmem:[%s4584_s6 + $0x14b8] sm:$0xff] }
 0x1ec   : > { %2214 = vmatprep.subr.mxu0 %v412_v48  ;;  %2321 = vmatprep.subr.mxu1 %v414_v49 }
 0x1ef   : > { %2215 = vmatpush1.xpose.msra.mxu0 %v411_v52  ;;  %2322 = vmatpush1.xpose.msra.mxu1 %v413_v54 }
 0x1f0   : > { %2216 = vmatprep.subr.mxu0 %v388_v56  ;;  %2323 = vmatprep.subr.mxu1 %v390_v57  ;;  %v1035_v56 = vld [vmem:[%s4584_s6 + $0x14a0] sm:$0xff]  ;;  %v1037_v57 = vld [vmem:[%s4584_s6 + $0x14b0] sm:$0xff] }
 0x1f3   : > { %2217 = vmatpush1.xpose.msra.mxu0 %v387_v58  ;;  %2324 = vmatpush1.xpose.msra.mxu1 %v389_v59  ;;  %v1012_v59 = vld [vmem:[%s4584_s6 + $0x13e8] sm:$0xff] }
 0x1f4   : > { %2218 = vmatprep.subr.mxu0 %v1132_v60  ;;  %2325 = vmatprep.subr.mxu1 %v1134_v63  ;;  %v1014_v60 = vld [vmem:[%s4584_s6 + $0x13f8] sm:$0xff] }
 0x1f6   : > { %v1824_v10 = vpop.f32.mrf.mxu0  ;;  %v1931_v11 = vpop.f32.mrf.mxu1 }
 0x1f7   : > { %v1825_v14 = vadd.f32 %v1824_v10, %v5109_v12  ;;  %2219 = vmatpush2.xpose.msra.mxu0 %v1131_v4  ;;  %2326 = vmatpush2.xpose.msra.mxu1 %v1133_v5  ;;  %v1013_v10 = vld [vmem:[%s4584_s6 + $0x13f0] sm:$0xff] }
 0x1f8   : > { %v5364_v0 = vpop.f32.mrf.mxu0  ;;  %v5366_v15 = vpop.f32.mrf.mxu1  ;;  %2220 = vmatprep.subr.mxu0 %v1108_v6  ;;  %2327 = vmatprep.subr.mxu1 %v1110_v7  ;;  %v1011_v7 = vld [vmem:[%s4584_s6 + $0x13e0] sm:$0xff] }
 0x1f9   : > { %v5370_v18 = vadd.f32 %v1931_v11, %v1825_v14  ;;  %v988_v14 = vld [vmem:[%s4584_s6 + $0x1328] sm:$0xff] }
 0x1fa   : > { %v1830_v23 = vpop.f32.mrf.mxu0  ;;  %v1937_v12 = vpop.f32.mrf.mxu1 }
 0x1fb   : > { %v1831_v25 = vadd.f32 %v1830_v23, %v5122_v24  ;;  %2221 = vmatpush2.xpose.msra.mxu0 %v1107_v16  ;;  %2328 = vmatpush2.xpose.msra.mxu1 %v1109_v17  ;;  %v990_v16 = vld [vmem:[%s4584_s6 + $0x1338] sm:$0xff] }
 0x1fc   : > { %v5375_v26 = vpop.f32.mrf.mxu0  ;;  %v5377_v27 = vpop.f32.mrf.mxu1  ;;  %2222 = vmatprep.subr.mxu0 %v1084_v19  ;;  %2329 = vmatprep.subr.mxu1 %v1086_v22 }
 0x1fd   : > { %v5381_v32 = vadd.f32 %v1937_v12, %v1831_v25  ;;  %v987_v12 = vld [vmem:[%s4584_s6 + $0x1320] sm:$0xff]  ;;  %v989_v25 = vld [vmem:[%s4584_s6 + $0x1330] sm:$0xff] }
 0x1fe   : > { %v1836_v36 = vpop.f32.mrf.mxu0  ;;  %v1943_v24 = vpop.f32.mrf.mxu1 }
 0x1ff   : > { %v1837_v37 = vadd.f32 %v1836_v36, %v5133_v34  ;;  %2223 = vmatpush2.xpose.msra.mxu0 %v1083_v28  ;;  %2330 = vmatpush2.xpose.msra.mxu1 %v1085_v29  ;;  %v964_v29 = vld [vmem:[%s4584_s6 + $0x1268] sm:$0xff] }
 0x200   : > { %v5386_v38 = vpop.f32.mrf.mxu0  ;;  %v5388_v39 = vpop.f32.mrf.mxu1  ;;  %2224 = vmatprep.subr.mxu0 %v1060_v33  ;;  %2331 = vmatprep.subr.mxu1 %v1062_v35  ;;  %v966_v33 = vld [vmem:[%s4584_s6 + $0x1278] sm:$0xff] }
 0x201   : > { %v5392_v45 = vadd.f32 %v1943_v24, %v1837_v37  ;;  %v963_v24 = vld [vmem:[%s4584_s6 + $0x1260] sm:$0xff]  ;;  %v965_v37 = vld [vmem:[%s4584_s6 + $0x1270] sm:$0xff] }
 0x202   : > { %v1842_v48 = vpop.f32.mrf.mxu0  ;;  %v1949_v34 = vpop.f32.mrf.mxu1 }
 0x203   : > { %v1843_v49 = vadd.f32 %v1842_v48, %v5144_v44  ;;  %2225 = vmatpush2.xpose.msra.mxu0 %v1059_v42  ;;  %2332 = vmatpush2.xpose.msra.mxu1 %v1061_v43  ;;  %v940_v43 = vld [vmem:[%s4584_s6 + $0x11a8] sm:$0xff] }
 0x204   : > { %v5397_v52 = vpop.f32.mrf.mxu0  ;;  %v5399_v54 = vpop.f32.mrf.mxu1  ;;  %2226 = vmatprep.subr.mxu0 %v1036_v46  ;;  %2333 = vmatprep.subr.mxu1 %v1038_v47  ;;  %v942_v46 = vld [vmem:[%s4584_s6 + $0x11b8] sm:$0xff]  ;;  %v941_v47 = vld [vmem:[%s4584_s6 + $0x11b0] sm:$0xff]  ;;  %v916_v48 = vld [vmem:[%s4584_s6 + $0x10e8] sm:$0xff] }
 0x205   : > { %v5403_v58 = vadd.f32 %v1949_v34, %v1843_v49  ;;  %v918_v34 = vld [vmem:[%s4584_s6 + $0x10f8] sm:$0xff]  ;;  %v915_v49 = vld [vmem:[%s4584_s6 + $0x10e0] sm:$0xff] }
 0x206   : > { %v1848_v63 = vpop.f32.mrf.mxu0  ;;  %v1955_v44 = vpop.f32.mrf.mxu1 }
 0x207   : > { %v1849_v4 = vadd.f32 %v1848_v63, %v5155_v55  ;;  %2227 = vmatpush2.xpose.msra.mxu0 %v1035_v56  ;;  %2334 = vmatpush2.xpose.msra.mxu1 %v1037_v57  ;;  %v917_v56 = vld [vmem:[%s4584_s6 + $0x10f0] sm:$0xff]  ;;  %v892_v57 = vld [vmem:[%s4584_s6 + $0x1028] sm:$0xff] }
 0x208   : > { %v5408_v5 = vpop.f32.mrf.mxu0  ;;  %v5410_v6 = vpop.f32.mrf.mxu1  ;;  %2228 = vmatprep.subr.mxu0 %v1012_v59  ;;  %2335 = vmatprep.subr.mxu1 %v1014_v60  ;;  %v894_v59 = vld [vmem:[%s4584_s6 + $0x1038] sm:$0xff]  ;;  %v891_v60 = vld [vmem:[%s4584_s6 + $0x1020] sm:$0xff]  ;;  %v893_v63 = vld [vmem:[%s4584_s6 + $0x1030] sm:$0xff] }
 0x209   : > { %v5414_v11 = vadd.f32 %v1955_v44, %v1849_v4  ;;  %v868_v44 = vld [vmem:[%s4584_s6 + $0xf68] sm:$0xff]  ;;  %v870_v4 = vld [vmem:[%s4584_s6 + $0xf78] sm:$0xff] }
 0x20a   : > { %v1854_v17 = vpop.f32.mrf.mxu0  ;;  %v1961_v55 = vpop.f32.mrf.mxu1 }
 0x20b   : > { %v1855_v19 = vadd.f32 %v1854_v17, %v5166_v2  ;;  %2229 = vmatpush2.xpose.msra.mxu0 %v1011_v7  ;;  %2336 = vmatpush2.xpose.msra.mxu1 %v1013_v10  ;;  %v867_v7 = vld [vmem:[%s4584_s6 + $0xf60] sm:$0xff]  ;;  %v869_v10 = vld [vmem:[%s4584_s6 + $0xf70] sm:$0xff] }
 0x20c   : > { %v5419_v22 = vpop.f32.mrf.mxu0  ;;  %v5421_v23 = vpop.f32.mrf.mxu1  ;;  %2230 = vmatprep.subr.mxu0 %v988_v14  ;;  %2337 = vmatprep.subr.mxu1 %v990_v16  ;;  %v844_v14 = vld [vmem:[%s4584_s6 + $0xea8] sm:$0xff]  ;;  %v846_v16 = vld [vmem:[%s4584_s6 + $0xeb8] sm:$0xff]  ;;  %v843_v17 = vld [vmem:[%s4584_s6 + $0xea0] sm:$0xff] }
 0x20d   : > { %v5425_v28 = vadd.f32 %v1961_v55, %v1855_v19  ;;  %v845_v55 = vld [vmem:[%s4584_s6 + $0xeb0] sm:$0xff]  ;;  %v820_v19 = vld [vmem:[%s4584_s6 + $0xde8] sm:$0xff] }
 0x20e   : > { %v1860_v35 = vpop.f32.mrf.mxu0  ;;  %v1967_v2 = vpop.f32.mrf.mxu1 }
 0x20f   : > { %v1861_v36 = vadd.f32 %v1860_v35, %v5173_v13  ;;  %2231 = vmatpush2.xpose.msra.mxu0 %v987_v12  ;;  %2338 = vmatpush2.xpose.msra.mxu1 %v989_v25  ;;  %v939_v13 = vld [vmem:[%s4584_s6 + $0x11a0] sm:$0xff]  ;;  %v822_v12 = vld [vmem:[%s4584_s6 + $0xdf8] sm:$0xff] }
 0x210   : > { %2232 = vmatprep.subr.mxu0 %v964_v29  ;;  %2339 = vmatprep.subr.mxu1 %v966_v33  ;;  %v819_v25 = vld [vmem:[%s4584_s6 + $0xde0] sm:$0xff]  ;;  %v821_v29 = vld [vmem:[%s4584_s6 + $0xdf0] sm:$0xff]  ;;  %v796_v33 = vld [vmem:[%s4584_s6 + $0xd28] sm:$0xff] }
 0x211   : > { %v5432_v42 = vadd.f32 %v1967_v2, %v1861_v36  ;;  %v798_v35 = vld [vmem:[%s4584_s6 + $0xd38] sm:$0xff]  ;;  %v795_v2 = vld [vmem:[%s4584_s6 + $0xd20] sm:$0xff]  ;;  %v797_v36 = vld [vmem:[%s4584_s6 + $0xd30] sm:$0xff] }
 0x213   : > { %2233 = vmatpush2.xpose.msra.mxu0 %v963_v24  ;;  %2340 = vmatpush2.xpose.msra.mxu1 %v965_v37  ;;  %v772_v24 = vld [vmem:[%s4584_s6 + $0xc68] sm:$0xff]  ;;  %v774_v37 = vld [vmem:[%s4584_s6 + $0xc78] sm:$0xff] }
 0x214   : > { %2234 = vmatprep.subr.mxu0 %v940_v43  ;;  %2341 = vmatprep.subr.mxu1 %v942_v46  ;;  %v771_v43 = vld [vmem:[%s4584_s6 + $0xc60] sm:$0xff]  ;;  %v773_v46 = vld [vmem:[%s4584_s6 + $0xc70] sm:$0xff] }
 0x217   : > { %2235 = vmatpush2.xpose.msra.mxu0 %v939_v13  ;;  %2342 = vmatpush2.xpose.msra.mxu1 %v941_v47  ;;  %v752_v13 = vld [vmem:[%s4584_s6 + $0xbc8] sm:$0xff]  ;;  %v754_v47 = vld [vmem:[%s4584_s6 + $0xbd8] sm:$0xff] }
 0x218   : > { %2236 = vmatprep.subr.mxu0 %v916_v48  ;;  %2343 = vmatprep.subr.mxu1 %v918_v34  ;;  %v219_v48 = vld [vmem:[%s7303_s0 + $0x60] sm:$0xff]  ;;  %v221_v34 = vld [vmem:[%s7303_s0 + $0x70] sm:$0xff] }
 0x21b   : > { %2237 = vmatpush2.xpose.msra.mxu0 %v915_v49  ;;  %2344 = vmatpush2.xpose.msra.mxu1 %v917_v56  ;;  %v751_v49 = vld [vmem:[%s4584_s6 + $0xbc0] sm:$0xff]  ;;  %v753_v56 = vld [vmem:[%s4584_s6 + $0xbd0] sm:$0xff] }
 0x21c   : > { %2238 = vmatprep.subr.mxu0 %v892_v57  ;;  %2345 = vmatprep.subr.mxu1 %v894_v59  ;;  %v244_v57 = vld [vmem:[%s7303_s0 + $0x128] sm:$0xff] }
 0x21d   : > { %v728_v59 = vld [vmem:[%s4584_s6 + $0xb08] sm:$0xff] }
 0x21f   : > { %2239 = vmatpush2.xpose.msra.mxu0 %v891_v60  ;;  %2346 = vmatpush2.xpose.msra.mxu1 %v893_v63  ;;  %v730_v60 = vld [vmem:[%s4584_s6 + $0xb18] sm:$0xff] }
 0x220   : > { %2240 = vmatprep.subr.mxu0 %v868_v44  ;;  %2347 = vmatprep.subr.mxu1 %v870_v4  ;;  %v246_v63 = vld [vmem:[%s7303_s0 + $0x138] sm:$0xff]  ;;  %v243_v44 = vld [vmem:[%s7303_s0 + $0x120] sm:$0xff]  ;;  %v245_v4 = vld [vmem:[%s7303_s0 + $0x130] sm:$0xff] }
 0x223   : > { %2241 = vmatpush2.xpose.msra.mxu0 %v867_v7  ;;  %2348 = vmatpush2.xpose.msra.mxu1 %v869_v10  ;;  %v727_v7 = vld [vmem:[%s4584_s6 + $0xb00] sm:$0xff]  ;;  %v729_v10 = vld [vmem:[%s4584_s6 + $0xb10] sm:$0xff] }
 0x224   : > { %2242 = vmatprep.subr.mxu0 %v844_v14  ;;  %2349 = vmatprep.subr.mxu1 %v846_v16  ;;  %v268_v14 = vld [vmem:[%s7303_s0 + $0x1e8] sm:$0xff] }
 0x225   : > { %v704_v16 = vld [vmem:[%s4584_s6 + $0xa48] sm:$0xff] }
 0x227   : > { %2243 = vmatpush2.xpose.msra.mxu0 %v843_v17  ;;  %2350 = vmatpush2.xpose.msra.mxu1 %v845_v55  ;;  %v706_v17 = vld [vmem:[%s4584_s6 + $0xa58] sm:$0xff] }
 0x228   : > { %2244 = vmatprep.subr.mxu0 %v820_v19  ;;  %2351 = vmatprep.subr.mxu1 %v822_v12  ;;  %v270_v55 = vld [vmem:[%s7303_s0 + $0x1f8] sm:$0xff]  ;;  %v267_v19 = vld [vmem:[%s7303_s0 + $0x1e0] sm:$0xff]  ;;  %v269_v12 = vld [vmem:[%s7303_s0 + $0x1f0] sm:$0xff] }
 0x22b   : > { %2245 = vmatpush2.xpose.msra.mxu0 %v819_v25  ;;  %2352 = vmatpush2.xpose.msra.mxu1 %v821_v29  ;;  %v703_v25 = vld [vmem:[%s4584_s6 + $0xa40] sm:$0xff]  ;;  %v705_v29 = vld [vmem:[%s4584_s6 + $0xa50] sm:$0xff] }
 0x22c   : > { %2246 = vmatprep.subr.mxu0 %v796_v33  ;;  %2353 = vmatprep.subr.mxu1 %v798_v35  ;;  %v292_v33 = vld [vmem:[%s7303_s0 + $0x2a8] sm:$0xff] }
 0x22d   : > { %v680_v35 = vld [vmem:[%s4584_s6 + $0x988] sm:$0xff] }
 0x22f   : > { %2247 = vmatpush2.xpose.msra.mxu0 %v795_v2  ;;  %2354 = vmatpush2.xpose.msra.mxu1 %v797_v36  ;;  %v682_v2 = vld [vmem:[%s4584_s6 + $0x998] sm:$0xff] }
 0x230   : > { %2248 = vmatprep.subr.mxu0 %v772_v24  ;;  %2355 = vmatprep.subr.mxu1 %v774_v37  ;;  %v294_v36 = vld [vmem:[%s7303_s0 + $0x2b8] sm:$0xff]  ;;  %v291_v24 = vld [vmem:[%s7303_s0 + $0x2a0] sm:$0xff]  ;;  %v293_v37 = vld [vmem:[%s7303_s0 + $0x2b0] sm:$0xff] }
 0x233   : > { %2249 = vmatpush2.xpose.msra.mxu0 %v771_v43  ;;  %2356 = vmatpush2.xpose.msra.mxu1 %v773_v46  ;;  %v679_v43 = vld [vmem:[%s4584_s6 + $0x980] sm:$0xff]  ;;  %v681_v46 = vld [vmem:[%s4584_s6 + $0x990] sm:$0xff] }
 0x234   : > { %2400 = vmatprep.subr.mxu0 %v752_v13  ;;  %2507 = vmatprep.subr.mxu1 %v754_v47  ;;  %v316_v13 = vld [vmem:[%s7303_s0 + $0x368] sm:$0xff] }
 0x235   : > { %v656_v47 = vld [vmem:[%s4584_s6 + $0x8c8] sm:$0xff] }
 0x236   : > { %2251 = vmatmul.mubr.f32.vlgmr.msra.gmra.mxu0 %v219_v48  ;;  %2358 = vmatmul.mubr.f32.vlgmr.msra.gmra.mxu1 %v221_v34  ;;  %v658_v48 = vld [vmem:[%s4584_s6 + $0x8d8] sm:$0xff] }
 0x237   : > { %2401 = vmatpush1.xpose.msra.mxu0 %v751_v49  ;;  %2508 = vmatpush1.xpose.msra.mxu1 %v753_v56  ;;  %v318_v34 = vld [vmem:[%s7303_s0 + $0x378] sm:$0xff]  ;;  %v315_v49 = vld [vmem:[%s7303_s0 + $0x360] sm:$0xff]  ;;  %v317_v56 = vld [vmem:[%s7303_s0 + $0x370] sm:$0xff] }
 0x238   : > { %2256 = vmatprep.mubr.f32.mxu0 %v244_v57  ;;  %2402 = vmatprep.subr.mxu0 %v728_v59  ;;  %v655_v57 = vld [vmem:[%s4584_s6 + $0x8c0] sm:$0xff]  ;;  %v657_v59 = vld [vmem:[%s4584_s6 + $0x8d0] sm:$0xff] }
 0x239   : > { %2509 = vmatprep.subr.mxu1 %v730_v60  ;;  %2363 = vmatprep.mubr.f32.mxu1 %v246_v63  ;;  %v340_v60 = vld [vmem:[%s7303_s0 + $0x428] sm:$0xff] }
 0x23a   : > { %2257 = vmatmul.mubr.f32.gmra.mxu0 %v243_v44  ;;  %2364 = vmatmul.mubr.f32.gmra.mxu1 %v245_v4  ;;  %v632_v63 = vld [vmem:[%s4584_s6 + $0x808] sm:$0xff]  ;;  %v634_v44 = vld [vmem:[%s4584_s6 + $0x818] sm:$0xff] }
 0x23b   : > { %2403 = vmatpush1.xpose.msra.mxu0 %v727_v7  ;;  %2510 = vmatpush1.xpose.msra.mxu1 %v729_v10  ;;  %v342_v4 = vld [vmem:[%s7303_s0 + $0x438] sm:$0xff]  ;;  %v339_v7 = vld [vmem:[%s7303_s0 + $0x420] sm:$0xff]  ;;  %v341_v10 = vld [vmem:[%s7303_s0 + $0x430] sm:$0xff] }
 0x23c   : > { %2262 = vmatprep.mubr.f32.mxu0 %v268_v14  ;;  %2404 = vmatprep.subr.mxu0 %v704_v16  ;;  %v631_v14 = vld [vmem:[%s4584_s6 + $0x800] sm:$0xff]  ;;  %v633_v16 = vld [vmem:[%s4584_s6 + $0x810] sm:$0xff] }
 0x23d   : > { %2511 = vmatprep.subr.mxu1 %v706_v17  ;;  %2369 = vmatprep.mubr.f32.mxu1 %v270_v55  ;;  %v364_v17 = vld [vmem:[%s7303_s0 + $0x4e8] sm:$0x1] }
 0x23e   : > { %2263 = vmatmul.mubr.f32.gmra.mxu0 %v267_v19  ;;  %2370 = vmatmul.mubr.f32.gmra.mxu1 %v269_v12  ;;  %v608_v55 = vld [vmem:[%s4584_s6 + $0x748] sm:$0xff]  ;;  %v610_v19 = vld [vmem:[%s4584_s6 + $0x758] sm:$0xff] }
 0x23f   : > { %2405 = vmatpush1.xpose.msra.mxu0 %v703_v25  ;;  %2512 = vmatpush1.xpose.msra.mxu1 %v705_v29  ;;  %v366_v12 = vld [vmem:[%s7303_s0 + $0x4f8] sm:$0x1]  ;;  %v363_v25 = vld [vmem:[%s7303_s0 + $0x4e0] sm:$0x1]  ;;  %v365_v29 = vld [vmem:[%s7303_s0 + $0x4f0] sm:$0x1] }
 0x240   : > { %2268 = vmatprep.mubr.f32.mxu0 %v292_v33  ;;  %2406 = vmatprep.subr.mxu0 %v680_v35  ;;  %v607_v33 = vld [vmem:[%s4584_s6 + $0x740] sm:$0xff]  ;;  %v609_v35 = vld [vmem:[%s4584_s6 + $0x750] sm:$0xff] }
 0x241   : > { %2513 = vmatprep.subr.mxu1 %v682_v2  ;;  %2375 = vmatprep.mubr.f32.mxu1 %v294_v36  ;;  %v584_v2 = vld [vmem:[%s4584_s6 + $0x688] sm:$0xff]  ;;  %v586_v36 = vld [vmem:[%s4584_s6 + $0x698] sm:$0xff] }
 0x242   : > { %2269 = vmatmul.mubr.f32.gmra.mxu0 %v291_v24  ;;  %2376 = vmatmul.mubr.f32.gmra.mxu1 %v293_v37  ;;  %v224_v24 = vld [vmem:[%s7303_s0 + $0x88] sm:$0xff]  ;;  %v226_v37 = vld [vmem:[%s7303_s0 + $0x98] sm:$0xff] }
 0x243   : > { %2407 = vmatpush1.xpose.msra.mxu0 %v679_v43  ;;  %2514 = vmatpush1.xpose.msra.mxu1 %v681_v46  ;;  %v583_v43 = vld [vmem:[%s4584_s6 + $0x680] sm:$0xff]  ;;  %v585_v46 = vld [vmem:[%s4584_s6 + $0x690] sm:$0xff] }
 0x244   : > { %2274 = vmatprep.mubr.f32.mxu0 %v316_v13  ;;  %2408 = vmatprep.subr.mxu0 %v656_v47  ;;  %v560_v13 = vld [vmem:[%s4584_s6 + $0x5c8] sm:$0xff]  ;;  %v562_v47 = vld [vmem:[%s4584_s6 + $0x5d8] sm:$0xff] }
 0x245   : > { %2515 = vmatprep.subr.mxu1 %v658_v48  ;;  %2381 = vmatprep.mubr.f32.mxu1 %v318_v34  ;;  %v559_v48 = vld [vmem:[%s4584_s6 + $0x5c0] sm:$0xff]  ;;  %v561_v34 = vld [vmem:[%s4584_s6 + $0x5d0] sm:$0xff] }
 0x246   : > { %2275 = vmatmul.mubr.f32.gmra.mxu0 %v315_v49  ;;  %2382 = vmatmul.mubr.f32.gmra.mxu1 %v317_v56  ;;  %v536_v49 = vld [vmem:[%s4584_s6 + $0x508] sm:$0xff]  ;;  %v538_v56 = vld [vmem:[%s4584_s6 + $0x518] sm:$0xff] }
 0x247   : > { %2409 = vmatpush1.xpose.msra.mxu0 %v655_v57  ;;  %2516 = vmatpush1.xpose.msra.mxu1 %v657_v59  ;;  %v535_v57 = vld [vmem:[%s4584_s6 + $0x500] sm:$0xff]  ;;  %v537_v59 = vld [vmem:[%s4584_s6 + $0x510] sm:$0xff] }
 0x248   : > { %2280 = vmatprep.mubr.f32.mxu0 %v340_v60  ;;  %2410 = vmatprep.subr.mxu0 %v632_v63  ;;  %v512_v60 = vld [vmem:[%s4584_s6 + $0x448] sm:$0xff]  ;;  %v514_v63 = vld [vmem:[%s4584_s6 + $0x458] sm:$0xff] }
 0x249   : > { %2517 = vmatprep.subr.mxu1 %v634_v44  ;;  %2387 = vmatprep.mubr.f32.mxu1 %v342_v4  ;;  %v511_v44 = vld [vmem:[%s4584_s6 + $0x440] sm:$0xff]  ;;  %v513_v4 = vld [vmem:[%s4584_s6 + $0x450] sm:$0xff] }
 0x24a   : > { %2281 = vmatmul.mubr.f32.gmra.mxu0 %v339_v7  ;;  %2388 = vmatmul.mubr.f32.gmra.mxu1 %v341_v10  ;;  %v488_v7 = vld [vmem:[%s4584_s6 + $0x388] sm:$0xff]  ;;  %v490_v10 = vld [vmem:[%s4584_s6 + $0x398] sm:$0xff] }
 0x24b   : > { %2411 = vmatpush1.xpose.msra.mxu0 %v631_v14  ;;  %2518 = vmatpush1.xpose.msra.mxu1 %v633_v16  ;;  %v487_v14 = vld [vmem:[%s4584_s6 + $0x380] sm:$0xff]  ;;  %v489_v16 = vld [vmem:[%s4584_s6 + $0x390] sm:$0xff] }
 0x24c   : > { %2286 = vmatprep.mubr.f32.mxu0 %v364_v17  ;;  %2412 = vmatprep.subr.mxu0 %v608_v55  ;;  %v464_v17 = vld [vmem:[%s4584_s6 + $0x2c8] sm:$0xff]  ;;  %v466_v55 = vld [vmem:[%s4584_s6 + $0x2d8] sm:$0xff] }
 0x24d   : > { %2519 = vmatprep.subr.mxu1 %v610_v19  ;;  %2393 = vmatprep.mubr.f32.mxu1 %v366_v12  ;;  %v463_v19 = vld [vmem:[%s4584_s6 + $0x2c0] sm:$0xff]  ;;  %v465_v12 = vld [vmem:[%s4584_s6 + $0x2d0] sm:$0xff] }
 0x24e   : > { %2287 = vmatmul.mubr.f32.gmra.mxu0 %v363_v25  ;;  %2394 = vmatmul.mubr.f32.gmra.mxu1 %v365_v29  ;;  %v440_v25 = vld [vmem:[%s4584_s6 + $0x208] sm:$0xff]  ;;  %v442_v29 = vld [vmem:[%s4584_s6 + $0x218] sm:$0xff] }
 0x24f   : > { %2413 = vmatpush1.xpose.msra.mxu0 %v607_v33  ;;  %2520 = vmatpush1.xpose.msra.mxu1 %v609_v35  ;;  %v439_v33 = vld [vmem:[%s4584_s6 + $0x200] sm:$0xff]  ;;  %v441_v35 = vld [vmem:[%s4584_s6 + $0x210] sm:$0xff] }
 0x250   : > { %2414 = vmatprep.subr.mxu0 %v584_v2  ;;  %2521 = vmatprep.subr.mxu1 %v586_v36  ;;  %v416_v2 = vld [vmem:[%s4584_s6 + $0x148] sm:$0xff]  ;;  %v418_v36 = vld [vmem:[%s4584_s6 + $0x158] sm:$0xff] }
 0x251   : > { %2464 = vmatprep.mubr.f32.mxu0 %v224_v24  ;;  %2571 = vmatprep.mubr.f32.mxu1 %v226_v37  ;;  %v415_v24 = vld [vmem:[%s4584_s6 + $0x140] sm:$0xff]  ;;  %v417_v37 = vld [vmem:[%s4584_s6 + $0x150] sm:$0xff] }
 0x253   : > { %2415 = vmatpush1.xpose.msra.mxu0 %v583_v43  ;;  %2522 = vmatpush1.xpose.msra.mxu1 %v585_v46  ;;  %v392_v43 = vld [vmem:[%s4584_s6 + $0x88] sm:$0xff]  ;;  %v394_v46 = vld [vmem:[%s4584_s6 + $0x98] sm:$0xff] }
 0x254   : > { %2416 = vmatprep.subr.mxu0 %v560_v13  ;;  %2523 = vmatprep.subr.mxu1 %v562_v47  ;;  %v391_v13 = vld [vmem:[%s4584_s6 + $0x80] sm:$0xff]  ;;  %v393_v47 = vld [vmem:[%s4584_s6 + $0x90] sm:$0xff] }
 0x257   : > { %2417 = vmatpush1.xpose.msra.mxu0 %v559_v48  ;;  %2524 = vmatpush1.xpose.msra.mxu1 %v561_v34  ;;  %v1136_v48 = vld [vmem:[%s4584_s6 + $0x17c8] sm:$0xff]  ;;  %v1138_v34 = vld [vmem:[%s4584_s6 + $0x17d8] sm:$0xff] }
 0x258   : > { %2418 = vmatprep.subr.mxu0 %v536_v49  ;;  %2525 = vmatprep.subr.mxu1 %v538_v56  ;;  %v5616_v49 = vpop.f32.mrf.mxu0  ;;  %v5618_v56 = vpop.f32.mrf.mxu1 }
 0x25b   : > { %2419 = vmatpush1.xpose.msra.mxu0 %v535_v57  ;;  %2526 = vmatpush1.xpose.msra.mxu1 %v537_v59  ;;  %v1135_v57 = vld [vmem:[%s4584_s6 + $0x17c0] sm:$0xff]  ;;  %v1137_v59 = vld [vmem:[%s4584_s6 + $0x17d0] sm:$0xff] }
 0x25c   : > { %2420 = vmatprep.subr.mxu0 %v512_v60  ;;  %2527 = vmatprep.subr.mxu1 %v514_v63  ;;  %v1112_v60 = vld [vmem:[%s4584_s6 + $0x1708] sm:$0xff]  ;;  %v1114_v63 = vld [vmem:[%s4584_s6 + $0x1718] sm:$0xff] }
 0x25f   : > { %2421 = vmatpush1.xpose.msra.mxu0 %v511_v44  ;;  %2528 = vmatpush1.xpose.msra.mxu1 %v513_v4 }
 0x260   : > { %2422 = vmatprep.subr.mxu0 %v488_v7  ;;  %2529 = vmatprep.subr.mxu1 %v490_v10 }
 0x263   : > { %2423 = vmatpush1.xpose.msra.mxu0 %v487_v14  ;;  %2530 = vmatpush1.xpose.msra.mxu1 %v489_v16  ;;  %v1111_v16 = vld [vmem:[%s4584_s6 + $0x1700] sm:$0xff] }
 0x264   : > { %2424 = vmatprep.subr.mxu0 %v464_v17  ;;  %2531 = vmatprep.subr.mxu1 %v466_v55  ;;  %v1113_v17 = vld [vmem:[%s4584_s6 + $0x1710] sm:$0xff] }
 0x267   : > { %2425 = vmatpush1.xpose.msra.mxu0 %v463_v19  ;;  %2532 = vmatpush1.xpose.msra.mxu1 %v465_v12  ;;  %v1088_v19 = vld [vmem:[%s4584_s6 + $0x1648] sm:$0xff]  ;;  %v1090_v12 = vld [vmem:[%s4584_s6 + $0x1658] sm:$0xff] }
 0x268   : > { %2426 = vmatprep.subr.mxu0 %v440_v25  ;;  %2533 = vmatprep.subr.mxu1 %v442_v29 }
 0x26b   : > { %2427 = vmatpush1.xpose.msra.mxu0 %v439_v33  ;;  %2534 = vmatpush1.xpose.msra.mxu1 %v441_v35 }
 0x26c   : > { %2428 = vmatprep.subr.mxu0 %v416_v2  ;;  %2535 = vmatprep.subr.mxu1 %v418_v36  ;;  %v1087_v2 = vld [vmem:[%s4584_s6 + $0x1640] sm:$0xff]  ;;  %v1089_v36 = vld [vmem:[%s4584_s6 + $0x1650] sm:$0xff] }
 0x26f   : > { %2429 = vmatpush1.xpose.msra.mxu0 %v415_v24  ;;  %2536 = vmatpush1.xpose.msra.mxu1 %v417_v37  ;;  %v1064_v37 = vld [vmem:[%s4584_s6 + $0x1588] sm:$0xff] }
 0x270   : > { %2430 = vmatprep.subr.mxu0 %v392_v43  ;;  %2537 = vmatprep.subr.mxu1 %v394_v46  ;;  %v1066_v43 = vld [vmem:[%s4584_s6 + $0x1598] sm:$0xff] }
 0x273   : > { %2431 = vmatpush1.xpose.msra.mxu0 %v391_v13  ;;  %2538 = vmatpush1.xpose.msra.mxu1 %v393_v47 }
 0x274   : > { %2432 = vmatprep.subr.mxu0 %v1136_v48  ;;  %2539 = vmatprep.subr.mxu1 %v1138_v34  ;;  %v1063_v34 = vld [vmem:[%s4584_s6 + $0x1580] sm:$0xff] }
 0x276   : > { %v2038_v44 = vpop.f32.mrf.mxu0  ;;  %v2145_v4 = vpop.f32.mrf.mxu1 }
 0x277   : > { %v2039_v7 = vadd.f32 %v2038_v44, %v5370_v18  ;;  %2433 = vmatpush2.xpose.msra.mxu0 %v1135_v57  ;;  %2540 = vmatpush2.xpose.msra.mxu1 %v1137_v59  ;;  %v1065_v57 = vld [vmem:[%s4584_s6 + $0x1590] sm:$0xff] }
 0x278   : > { %v5625_v10 = vpop.f32.mrf.mxu0  ;;  %v5627_v14 = vpop.f32.mrf.mxu1  ;;  %2434 = vmatprep.subr.mxu0 %v1112_v60  ;;  %2541 = vmatprep.subr.mxu1 %v1114_v63  ;;  %v1040_v60 = vld [vmem:[%s4584_s6 + $0x14c8] sm:$0xff]  ;;  %v1042_v63 = vld [vmem:[%s4584_s6 + $0x14d8] sm:$0xff] }
 0x279   : > { %v5631_v55 = vadd.f32 %v2145_v4, %v2039_v7 }
 0x27a   : > { %v2044_v25 = vpop.f32.mrf.mxu0  ;;  %v2151_v18 = vpop.f32.mrf.mxu1 }
 0x27b   : > { %v2045_v29 = vadd.f32 %v2044_v25, %v5381_v32  ;;  %2435 = vmatpush2.xpose.msra.mxu0 %v1111_v16  ;;  %2542 = vmatpush2.xpose.msra.mxu1 %v1113_v17  ;;  %v1039_v17 = vld [vmem:[%s4584_s6 + $0x14c0] sm:$0xff]  ;;  %v1016_v25 = vld [vmem:[%s4584_s6 + $0x1408] sm:$0xff] }
 0x27c   : > { %v5636_v33 = vpop.f32.mrf.mxu0  ;;  %v5638_v35 = vpop.f32.mrf.mxu1  ;;  %2436 = vmatprep.subr.mxu0 %v1088_v19  ;;  %2543 = vmatprep.subr.mxu1 %v1090_v12  ;;  %v1041_v19 = vld [vmem:[%s4584_s6 + $0x14d0] sm:$0xff] }
 0x27d   : > { %v5642_v24 = vadd.f32 %v2151_v18, %v2045_v29  ;;  %v1018_v18 = vld [vmem:[%s4584_s6 + $0x1418] sm:$0xff] }
 0x27e   : > { %v2050_v46 = vpop.f32.mrf.mxu0  ;;  %v2157_v32 = vpop.f32.mrf.mxu1 }
 0x27f   : > { %v2051_v13 = vadd.f32 %v2050_v46, %v5392_v45  ;;  %2437 = vmatpush2.xpose.msra.mxu0 %v1087_v2  ;;  %2544 = vmatpush2.xpose.msra.mxu1 %v1089_v36  ;;  %v1017_v46 = vld [vmem:[%s4584_s6 + $0x1410] sm:$0xff] }
 0x280   : > { %v5647_v47 = vpop.f32.mrf.mxu0  ;;  %v5649_v48 = vpop.f32.mrf.mxu1  ;;  %2438 = vmatprep.subr.mxu0 %v1064_v37  ;;  %2545 = vmatprep.subr.mxu1 %v1066_v43  ;;  %v1015_v43 = vld [vmem:[%s4584_s6 + $0x1400] sm:$0xff] }
 0x281   : > { %v5653_v59 = vadd.f32 %v2157_v32, %v2051_v13  ;;  %v992_v13 = vld [vmem:[%s4584_s6 + $0x1348] sm:$0xff] }
 0x282   : > { %v2056_v44 = vpop.f32.mrf.mxu0  ;;  %v2163_v45 = vpop.f32.mrf.mxu1 }
 0x283   : > { %v2057_v4 = vadd.f32 %v2056_v44, %v5403_v58  ;;  %2439 = vmatpush2.xpose.msra.mxu0 %v1063_v34  ;;  %2546 = vmatpush2.xpose.msra.mxu1 %v1065_v57  ;;  %v994_v34 = vld [vmem:[%s4584_s6 + $0x1358] sm:$0xff] }
 0x284   : > { %v5658_v7 = vpop.f32.mrf.mxu0  ;;  %v5660_v16 = vpop.f32.mrf.mxu1  ;;  %2440 = vmatprep.subr.mxu0 %v1040_v60  ;;  %2547 = vmatprep.subr.mxu1 %v1042_v63 }
 0x285   : > { %7315 = vst [vmem:[#allocation7_spill] sm:$0xff] %v5660_v16  ;;  %v5664_v12 = vadd.f32 %v2163_v45, %v2057_v4  ;;  %v991_v45 = vld [vmem:[%s4584_s6 + $0x1340] sm:$0xff]  ;;  %v993_v4 = vld [vmem:[%s4584_s6 + $0x1350] sm:$0xff] }
 0x286   : > { %v2062_v29 = vpop.f32.mrf.mxu0  ;;  %v2169_v58 = vpop.f32.mrf.mxu1 }
 0x287   : > { %7316 = vst [vmem:[#allocation8_spill] sm:$0xff] %v5664_v12  ;;  %v2063_v2 = vadd.f32 %v2062_v29, %v5414_v11  ;;  %2441 = vmatpush2.xpose.msra.mxu0 %v1039_v17  ;;  %2548 = vmatpush2.xpose.msra.mxu1 %v1041_v19  ;;  %v968_v19 = vld [vmem:[%s4584_s6 + $0x1288] sm:$0xff] }
 0x288   : > { %v5669_v36 = vpop.f32.mrf.mxu0  ;;  %v5671_v37 = vpop.f32.mrf.mxu1  ;;  %2442 = vmatprep.subr.mxu0 %v1016_v25  ;;  %2549 = vmatprep.subr.mxu1 %v1018_v18  ;;  %v970_v25 = vld [vmem:[%s4584_s6 + $0x1298] sm:$0xff] }
 0x289   : > { %7317 = vst [vmem:[#allocation9_spill] sm:$0xff] %v5671_v37  ;;  %v5675_v32 = vadd.f32 %v2169_v58, %v2063_v2  ;;  %v967_v58 = vld [vmem:[%s4584_s6 + $0x1280] sm:$0xff]  ;;  %v969_v2 = vld [vmem:[%s4584_s6 + $0x1290] sm:$0xff] }
 0x28a   : > { %v2068_v57 = vpop.f32.mrf.mxu0  ;;  %v2175_v11 = vpop.f32.mrf.mxu1 }
 0x28b   : > { %7318 = vst [vmem:[#allocation10_spill] sm:$0xff] %v5675_v32  ;;  %v2069_v60 = vadd.f32 %v2068_v57, %v5425_v28  ;;  %2443 = vmatpush2.xpose.msra.mxu0 %v1015_v43  ;;  %2550 = vmatpush2.xpose.msra.mxu1 %v1017_v46  ;;  %v944_v46 = vld [vmem:[%s4584_s6 + $0x11c8] sm:$0xff] }
 0x28c   : > { %v5680_v63 = vpop.f32.mrf.mxu0  ;;  %v5682_v44 = vpop.f32.mrf.mxu1  ;;  %2444 = vmatprep.subr.mxu0 %v992_v13  ;;  %2551 = vmatprep.subr.mxu1 %v994_v34  ;;  %v946_v13 = vld [vmem:[%s4584_s6 + $0x11d8] sm:$0xff]  ;;  %v945_v34 = vld [vmem:[%s4584_s6 + $0x11d0] sm:$0xff]  ;;  %v920_v57 = vld [vmem:[%s4584_s6 + $0x1108] sm:$0xff] }
 0x28d   : > { %7319 = vst [vmem:[#allocation11_spill] sm:$0xff] %v5682_v44  ;;  %v5686_v17 = vadd.f32 %v2175_v11, %v2069_v60  ;;  %v922_v11 = vld [vmem:[%s4584_s6 + $0x1118] sm:$0xff]  ;;  %v919_v60 = vld [vmem:[%s4584_s6 + $0x1100] sm:$0xff] }
 0x28e   : > { %v2074_v18 = vpop.f32.mrf.mxu0  ;;  %v2181_v28 = vpop.f32.mrf.mxu1 }
 0x28f   : > { %7320 = vst [vmem:[#allocation12_spill] sm:$0xff] %v5686_v17  ;;  %v2075_v29 = vadd.f32 %v2074_v18, %v5432_v42  ;;  %2445 = vmatpush2.xpose.msra.mxu0 %v991_v45  ;;  %2552 = vmatpush2.xpose.msra.mxu1 %v993_v4  ;;  %v943_v42 = vld [vmem:[%s4584_s6 + $0x11c0] sm:$0xff]  ;;  %v921_v45 = vld [vmem:[%s4584_s6 + $0x1110] sm:$0xff]  ;;  %v896_v4 = vld [vmem:[%s4584_s6 + $0x1048] sm:$0xff] }
 0x290   : > { %2446 = vmatprep.subr.mxu0 %v968_v19  ;;  %2553 = vmatprep.subr.mxu1 %v970_v25  ;;  %v898_v19 = vld [vmem:[%s4584_s6 + $0x1058] sm:$0xff]  ;;  %v895_v25 = vld [vmem:[%s4584_s6 + $0x1040] sm:$0xff]  ;;  %v897_v18 = vld [vmem:[%s4584_s6 + $0x1050] sm:$0xff] }
 0x291   : > { %v5693_v43 = vadd.f32 %v2181_v28, %v2075_v29  ;;  %v872_v28 = vld [vmem:[%s4584_s6 + $0xf88] sm:$0xff]  ;;  %v874_v29 = vld [vmem:[%s4584_s6 + $0xf98] sm:$0xff] }
 0x293   : > { %7321 = vst [vmem:[#allocation13_spill] sm:$0xff] %v5693_v43  ;;  %2447 = vmatpush2.xpose.msra.mxu0 %v967_v58  ;;  %2554 = vmatpush2.xpose.msra.mxu1 %v969_v2  ;;  %v871_v58 = vld [vmem:[%s4584_s6 + $0xf80] sm:$0xff]  ;;  %v873_v2 = vld [vmem:[%s4584_s6 + $0xf90] sm:$0xff]  ;;  %v1294_v43 = vld [vmem:[%s4584_s6 + $0x1cb8] sm:$0xff] }
 0x294   : > { %2448 = vmatprep.subr.mxu0 %v944_v46  ;;  %2555 = vmatprep.subr.mxu1 %v946_v13  ;;  %v848_v46 = vld [vmem:[%s4584_s6 + $0xec8] sm:$0xff]  ;;  %v850_v13 = vld [vmem:[%s4584_s6 + $0xed8] sm:$0xff] }
 0x297   : > { %2449 = vmatpush2.xpose.msra.mxu0 %v943_v42  ;;  %2556 = vmatpush2.xpose.msra.mxu1 %v945_v34  ;;  %v847_v42 = vld [vmem:[%s4584_s6 + $0xec0] sm:$0xff]  ;;  %v849_v34 = vld [vmem:[%s4584_s6 + $0xed0] sm:$0xff] }
 0x298   : > { %2450 = vmatprep.subr.mxu0 %v920_v57  ;;  %2557 = vmatprep.subr.mxu1 %v922_v11  ;;  %v824_v57 = vld [vmem:[%s4584_s6 + $0xe08] sm:$0xff]  ;;  %v826_v11 = vld [vmem:[%s4584_s6 + $0xe18] sm:$0xff] }
 0x29b   : > { %2451 = vmatpush2.xpose.msra.mxu0 %v919_v60  ;;  %2558 = vmatpush2.xpose.msra.mxu1 %v921_v45  ;;  %v823_v60 = vld [vmem:[%s4584_s6 + $0xe00] sm:$0xff]  ;;  %v825_v45 = vld [vmem:[%s4584_s6 + $0xe10] sm:$0xff] }
 0x29c   : > { %2452 = vmatprep.subr.mxu0 %v896_v4  ;;  %2559 = vmatprep.subr.mxu1 %v898_v19  ;;  %v800_v4 = vld [vmem:[%s4584_s6 + $0xd48] sm:$0xff]  ;;  %v802_v19 = vld [vmem:[%s4584_s6 + $0xd58] sm:$0xff] }
 0x29f   : > { %2453 = vmatpush2.xpose.msra.mxu0 %v895_v25  ;;  %2560 = vmatpush2.xpose.msra.mxu1 %v897_v18  ;;  %v799_v25 = vld [vmem:[%s4584_s6 + $0xd40] sm:$0xff]  ;;  %v801_v18 = vld [vmem:[%s4584_s6 + $0xd50] sm:$0xff] }
 0x2a0   : > { %2454 = vmatprep.subr.mxu0 %v872_v28  ;;  %2561 = vmatprep.subr.mxu1 %v874_v29  ;;  %v776_v28 = vld [vmem:[%s4584_s6 + $0xc88] sm:$0xff]  ;;  %v778_v29 = vld [vmem:[%s4584_s6 + $0xc98] sm:$0xff] }
 0x2a3   : > { %2455 = vmatpush2.xpose.msra.mxu0 %v871_v58  ;;  %2562 = vmatpush2.xpose.msra.mxu1 %v873_v2  ;;  %v775_v58 = vld [vmem:[%s4584_s6 + $0xc80] sm:$0xff]  ;;  %v777_v2 = vld [vmem:[%s4584_s6 + $0xc90] sm:$0xff] }
 0x2a4   : > { %2456 = vmatprep.subr.mxu0 %v848_v46  ;;  %2563 = vmatprep.subr.mxu1 %v850_v13  ;;  %v756_v46 = vld [vmem:[%s4584_s6 + $0xbe8] sm:$0xff]  ;;  %v758_v13 = vld [vmem:[%s4584_s6 + $0xbf8] sm:$0xff] }
 0x2a7   : > { %2457 = vmatpush2.xpose.msra.mxu0 %v847_v42  ;;  %2564 = vmatpush2.xpose.msra.mxu1 %v849_v34  ;;  %v223_v42 = vld [vmem:[%s7303_s0 + $0x80] sm:$0xff]  ;;  %v225_v34 = vld [vmem:[%s7303_s0 + $0x90] sm:$0xff] }
 0x2a8   : > { %2458 = vmatprep.subr.mxu0 %v824_v57  ;;  %2565 = vmatprep.subr.mxu1 %v826_v11  ;;  %v755_v57 = vld [vmem:[%s4584_s6 + $0xbe0] sm:$0xff]  ;;  %v757_v11 = vld [vmem:[%s4584_s6 + $0xbf0] sm:$0xff] }
 0x2ab   : > { %2459 = vmatpush2.xpose.msra.mxu0 %v823_v60  ;;  %2566 = vmatpush2.xpose.msra.mxu1 %v825_v45  ;;  %v248_v60 = vld [vmem:[%s7303_s0 + $0x148] sm:$0xff] }
 0x2ac   : > { %2460 = vmatprep.subr.mxu0 %v800_v4  ;;  %2567 = vmatprep.subr.mxu1 %v802_v19  ;;  %v732_v45 = vld [vmem:[%s4584_s6 + $0xb28] sm:$0xff]  ;;  %v734_v4 = vld [vmem:[%s4584_s6 + $0xb38] sm:$0xff] }
 0x2ad   : > { %v250_v19 = vld [vmem:[%s7303_s0 + $0x158] sm:$0xff] }
 0x2af   : > { %2461 = vmatpush2.xpose.msra.mxu0 %v799_v25  ;;  %2568 = vmatpush2.xpose.msra.mxu1 %v801_v18  ;;  %v247_v25 = vld [vmem:[%s7303_s0 + $0x140] sm:$0xff]  ;;  %v249_v18 = vld [vmem:[%s7303_s0 + $0x150] sm:$0xff] }
 0x2b0   : > { %2462 = vmatprep.subr.mxu0 %v776_v28  ;;  %2569 = vmatprep.subr.mxu1 %v778_v29  ;;  %v731_v28 = vld [vmem:[%s4584_s6 + $0xb20] sm:$0xff]  ;;  %v733_v29 = vld [vmem:[%s4584_s6 + $0xb30] sm:$0xff] }
 0x2b3   : > { %2463 = vmatpush2.xpose.msra.mxu0 %v775_v58  ;;  %2570 = vmatpush2.xpose.msra.mxu1 %v777_v2  ;;  %v272_v58 = vld [vmem:[%s7303_s0 + $0x208] sm:$0xff] }
 0x2b4   : > { %2614 = vmatprep.subr.mxu0 %v756_v46  ;;  %2721 = vmatprep.subr.mxu1 %v758_v13  ;;  %v708_v2 = vld [vmem:[%s4584_s6 + $0xa68] sm:$0xff]  ;;  %v710_v46 = vld [vmem:[%s4584_s6 + $0xa78] sm:$0xff] }
 0x2b5   : > { %v274_v13 = vld [vmem:[%s7303_s0 + $0x218] sm:$0xff] }
 0x2b6   : > { %2465 = vmatmul.mubr.f32.vlgmr.msra.gmra.mxu0 %v223_v42  ;;  %2572 = vmatmul.mubr.f32.vlgmr.msra.gmra.mxu1 %v225_v34  ;;  %v271_v42 = vld [vmem:[%s7303_s0 + $0x200] sm:$0xff]  ;;  %v273_v34 = vld [vmem:[%s7303_s0 + $0x210] sm:$0xff] }
 0x2b7   : > { %2615 = vmatpush1.xpose.msra.mxu0 %v755_v57  ;;  %2722 = vmatpush1.xpose.msra.mxu1 %v757_v11  ;;  %v707_v57 = vld [vmem:[%s4584_s6 + $0xa60] sm:$0xff]  ;;  %v709_v11 = vld [vmem:[%s4584_s6 + $0xa70] sm:$0xff] }
 0x2b8   : > { %2470 = vmatprep.mubr.f32.mxu0 %v248_v60  ;;  %2616 = vmatprep.subr.mxu0 %v732_v45  ;;  %v296_v60 = vld [vmem:[%s7303_s0 + $0x2c8] sm:$0xff] }
 0x2b9   : > { %2723 = vmatprep.subr.mxu1 %v734_v4  ;;  %2577 = vmatprep.mubr.f32.mxu1 %v250_v19  ;;  %v684_v45 = vld [vmem:[%s4584_s6 + $0x9a8] sm:$0xff]  ;;  %v686_v4 = vld [vmem:[%s4584_s6 + $0x9b8] sm:$0xff] }
 0x2ba   : > { %2471 = vmatmul.mubr.f32.gmra.mxu0 %v247_v25  ;;  %2578 = vmatmul.mubr.f32.gmra.mxu1 %v249_v18  ;;  %v298_v19 = vld [vmem:[%s7303_s0 + $0x2d8] sm:$0xff]  ;;  %v295_v25 = vld [vmem:[%s7303_s0 + $0x2c0] sm:$0xff]  ;;  %v297_v18 = vld [vmem:[%s7303_s0 + $0x2d0] sm:$0xff] }
 0x2bb   : > { %2617 = vmatpush1.xpose.msra.mxu0 %v731_v28  ;;  %2724 = vmatpush1.xpose.msra.mxu1 %v733_v29  ;;  %v683_v28 = vld [vmem:[%s4584_s6 + $0x9a0] sm:$0xff]  ;;  %v685_v29 = vld [vmem:[%s4584_s6 + $0x9b0] sm:$0xff] }
 0x2bc   : > { %2476 = vmatprep.mubr.f32.mxu0 %v272_v58  ;;  %2618 = vmatprep.subr.mxu0 %v708_v2  ;;  %v320_v58 = vld [vmem:[%s7303_s0 + $0x388] sm:$0xff] }
 0x2bd   : > { %2725 = vmatprep.subr.mxu1 %v710_v46  ;;  %2583 = vmatprep.mubr.f32.mxu1 %v274_v13  ;;  %v660_v2 = vld [vmem:[%s4584_s6 + $0x8e8] sm:$0xff]  ;;  %v662_v46 = vld [vmem:[%s4584_s6 + $0x8f8] sm:$0xff] }
 0x2be   : > { %2477 = vmatmul.mubr.f32.gmra.mxu0 %v271_v42  ;;  %2584 = vmatmul.mubr.f32.gmra.mxu1 %v273_v34  ;;  %v322_v13 = vld [vmem:[%s7303_s0 + $0x398] sm:$0xff]  ;;  %v319_v42 = vld [vmem:[%s7303_s0 + $0x380] sm:$0xff]  ;;  %v321_v34 = vld [vmem:[%s7303_s0 + $0x390] sm:$0xff] }
 0x2bf   : > { %2619 = vmatpush1.xpose.msra.mxu0 %v707_v57  ;;  %2726 = vmatpush1.xpose.msra.mxu1 %v709_v11  ;;  %v659_v57 = vld [vmem:[%s4584_s6 + $0x8e0] sm:$0xff]  ;;  %v661_v11 = vld [vmem:[%s4584_s6 + $0x8f0] sm:$0xff] }
 0x2c0   : > { %2482 = vmatprep.mubr.f32.mxu0 %v296_v60  ;;  %2620 = vmatprep.subr.mxu0 %v684_v45  ;;  %v344_v60 = vld [vmem:[%s7303_s0 + $0x448] sm:$0xff] }
 0x2c1   : > { %2727 = vmatprep.subr.mxu1 %v686_v4  ;;  %2589 = vmatprep.mubr.f32.mxu1 %v298_v19  ;;  %v636_v45 = vld [vmem:[%s4584_s6 + $0x828] sm:$0xff]  ;;  %v638_v4 = vld [vmem:[%s4584_s6 + $0x838] sm:$0xff] }
 0x2c2   : > { %2483 = vmatmul.mubr.f32.gmra.mxu0 %v295_v25  ;;  %2590 = vmatmul.mubr.f32.gmra.mxu1 %v297_v18  ;;  %v346_v19 = vld [vmem:[%s7303_s0 + $0x458] sm:$0xff]  ;;  %v343_v25 = vld [vmem:[%s7303_s0 + $0x440] sm:$0xff]  ;;  %v345_v18 = vld [vmem:[%s7303_s0 + $0x450] sm:$0xff] }
 0x2c3   : > { %2621 = vmatpush1.xpose.msra.mxu0 %v683_v28  ;;  %2728 = vmatpush1.xpose.msra.mxu1 %v685_v29  ;;  %v635_v28 = vld [vmem:[%s4584_s6 + $0x820] sm:$0xff]  ;;  %v637_v29 = vld [vmem:[%s4584_s6 + $0x830] sm:$0xff] }
 0x2c4   : > { %2488 = vmatprep.mubr.f32.mxu0 %v320_v58  ;;  %2622 = vmatprep.subr.mxu0 %v660_v2  ;;  %v368_v58 = vld [vmem:[%s7303_s0 + $0x508] sm:$0x1] }
 0x2c5   : > { %2729 = vmatprep.subr.mxu1 %v662_v46  ;;  %2595 = vmatprep.mubr.f32.mxu1 %v322_v13  ;;  %v612_v2 = vld [vmem:[%s4584_s6 + $0x768] sm:$0xff]  ;;  %v614_v46 = vld [vmem:[%s4584_s6 + $0x778] sm:$0xff] }
 0x2c6   : > { %2489 = vmatmul.mubr.f32.gmra.mxu0 %v319_v42  ;;  %2596 = vmatmul.mubr.f32.gmra.mxu1 %v321_v34  ;;  %v370_v13 = vld [vmem:[%s7303_s0 + $0x518] sm:$0x1]  ;;  %v367_v42 = vld [vmem:[%s7303_s0 + $0x500] sm:$0x1]  ;;  %v369_v34 = vld [vmem:[%s7303_s0 + $0x510] sm:$0x1] }
 0x2c7   : > { %2623 = vmatpush1.xpose.msra.mxu0 %v659_v57  ;;  %2730 = vmatpush1.xpose.msra.mxu1 %v661_v11  ;;  %v611_v57 = vld [vmem:[%s4584_s6 + $0x760] sm:$0xff]  ;;  %v613_v11 = vld [vmem:[%s4584_s6 + $0x770] sm:$0xff] }
 0x2c8   : > { %2494 = vmatprep.mubr.f32.mxu0 %v344_v60  ;;  %2624 = vmatprep.subr.mxu0 %v636_v45  ;;  %v588_v60 = vld [vmem:[%s4584_s6 + $0x6a8] sm:$0xff]  ;;  %v590_v45 = vld [vmem:[%s4584_s6 + $0x6b8] sm:$0xff] }
 0x2c9   : > { %2731 = vmatprep.subr.mxu1 %v638_v4  ;;  %2601 = vmatprep.mubr.f32.mxu1 %v346_v19  ;;  %v228_v4 = vld [vmem:[%s7303_s0 + $0xa8] sm:$0xff]  ;;  %v230_v19 = vld [vmem:[%s7303_s0 + $0xb8] sm:$0xff] }
 0x2ca   : > { %2495 = vmatmul.mubr.f32.gmra.mxu0 %v343_v25  ;;  %2602 = vmatmul.mubr.f32.gmra.mxu1 %v345_v18  ;;  %v587_v25 = vld [vmem:[%s4584_s6 + $0x6a0] sm:$0xff]  ;;  %v589_v18 = vld [vmem:[%s4584_s6 + $0x6b0] sm:$0xff] }
 0x2cb   : > { %2625 = vmatpush1.xpose.msra.mxu0 %v635_v28  ;;  %2732 = vmatpush1.xpose.msra.mxu1 %v637_v29  ;;  %v564_v28 = vld [vmem:[%s4584_s6 + $0x5e8] sm:$0xff]  ;;  %v566_v29 = vld [vmem:[%s4584_s6 + $0x5f8] sm:$0xff] }
 0x2cc   : > { %2500 = vmatprep.mubr.f32.mxu0 %v368_v58  ;;  %2626 = vmatprep.subr.mxu0 %v612_v2  ;;  %v563_v58 = vld [vmem:[%s4584_s6 + $0x5e0] sm:$0xff]  ;;  %v565_v2 = vld [vmem:[%s4584_s6 + $0x5f0] sm:$0xff] }
 0x2cd   : > { %2733 = vmatprep.subr.mxu1 %v614_v46  ;;  %2607 = vmatprep.mubr.f32.mxu1 %v370_v13  ;;  %v540_v46 = vld [vmem:[%s4584_s6 + $0x528] sm:$0xff]  ;;  %v542_v13 = vld [vmem:[%s4584_s6 + $0x538] sm:$0xff] }
 0x2ce   : > { %2501 = vmatmul.mubr.f32.gmra.mxu0 %v367_v42  ;;  %2608 = vmatmul.mubr.f32.gmra.mxu1 %v369_v34  ;;  %v539_v42 = vld [vmem:[%s4584_s6 + $0x520] sm:$0xff]  ;;  %v541_v34 = vld [vmem:[%s4584_s6 + $0x530] sm:$0xff] }
 0x2cf   : > { %2627 = vmatpush1.xpose.msra.mxu0 %v611_v57  ;;  %2734 = vmatpush1.xpose.msra.mxu1 %v613_v11  ;;  %v516_v57 = vld [vmem:[%s4584_s6 + $0x468] sm:$0xff]  ;;  %v518_v11 = vld [vmem:[%s4584_s6 + $0x478] sm:$0xff] }
 0x2d0   : > { %2628 = vmatprep.subr.mxu0 %v588_v60  ;;  %2735 = vmatprep.subr.mxu1 %v590_v45  ;;  %v515_v60 = vld [vmem:[%s4584_s6 + $0x460] sm:$0xff]  ;;  %v517_v45 = vld [vmem:[%s4584_s6 + $0x470] sm:$0xff] }
 0x2d1   : > { %2678 = vmatprep.mubr.f32.mxu0 %v228_v4  ;;  %2785 = vmatprep.mubr.f32.mxu1 %v230_v19  ;;  %v492_v4 = vld [vmem:[%s4584_s6 + $0x3a8] sm:$0xff]  ;;  %v494_v19 = vld [vmem:[%s4584_s6 + $0x3b8] sm:$0xff] }
 0x2d3   : > { %2629 = vmatpush1.xpose.msra.mxu0 %v587_v25  ;;  %2736 = vmatpush1.xpose.msra.mxu1 %v589_v18  ;;  %v491_v25 = vld [vmem:[%s4584_s6 + $0x3a0] sm:$0xff]  ;;  %v493_v18 = vld [vmem:[%s4584_s6 + $0x3b0] sm:$0xff] }
 0x2d4   : > { %2630 = vmatprep.subr.mxu0 %v564_v28  ;;  %2737 = vmatprep.subr.mxu1 %v566_v29  ;;  %v468_v28 = vld [vmem:[%s4584_s6 + $0x2e8] sm:$0xff]  ;;  %v470_v29 = vld [vmem:[%s4584_s6 + $0x2f8] sm:$0xff] }
 0x2d7   : > { %2631 = vmatpush1.xpose.msra.mxu0 %v563_v58  ;;  %2738 = vmatpush1.xpose.msra.mxu1 %v565_v2  ;;  %v467_v58 = vld [vmem:[%s4584_s6 + $0x2e0] sm:$0xff]  ;;  %v469_v2 = vld [vmem:[%s4584_s6 + $0x2f0] sm:$0xff] }
 0x2d8   : > { %2632 = vmatprep.subr.mxu0 %v540_v46  ;;  %2739 = vmatprep.subr.mxu1 %v542_v13  ;;  %v444_v46 = vld [vmem:[%s4584_s6 + $0x228] sm:$0xff]  ;;  %v446_v13 = vld [vmem:[%s4584_s6 + $0x238] sm:$0xff] }
 0x2db   : > { %2633 = vmatpush1.xpose.msra.mxu0 %v539_v42  ;;  %2740 = vmatpush1.xpose.msra.mxu1 %v541_v34  ;;  %v443_v42 = vld [vmem:[%s4584_s6 + $0x220] sm:$0xff]  ;;  %v445_v34 = vld [vmem:[%s4584_s6 + $0x230] sm:$0xff] }
 0x2dc   : > { %2634 = vmatprep.subr.mxu0 %v516_v57  ;;  %2741 = vmatprep.subr.mxu1 %v518_v11  ;;  %v420_v57 = vld [vmem:[%s4584_s6 + $0x168] sm:$0xff]  ;;  %v422_v11 = vld [vmem:[%s4584_s6 + $0x178] sm:$0xff] }
 0x2df   : > { %2635 = vmatpush1.xpose.msra.mxu0 %v515_v60  ;;  %2742 = vmatpush1.xpose.msra.mxu1 %v517_v45  ;;  %v419_v60 = vld [vmem:[%s4584_s6 + $0x160] sm:$0xff]  ;;  %v421_v45 = vld [vmem:[%s4584_s6 + $0x170] sm:$0xff] }
 0x2e0   : > { %2636 = vmatprep.subr.mxu0 %v492_v4  ;;  %2743 = vmatprep.subr.mxu1 %v494_v19  ;;  %v396_v4 = vld [vmem:[%s4584_s6 + $0xa8] sm:$0xff]  ;;  %v398_v19 = vld [vmem:[%s4584_s6 + $0xb8] sm:$0xff] }
 0x2e3   : > { %2637 = vmatpush1.xpose.msra.mxu0 %v491_v25  ;;  %2744 = vmatpush1.xpose.msra.mxu1 %v493_v18  ;;  %v395_v25 = vld [vmem:[%s4584_s6 + $0xa0] sm:$0xff]  ;;  %v397_v18 = vld [vmem:[%s4584_s6 + $0xb0] sm:$0xff] }
 0x2e4   : > { %2638 = vmatprep.subr.mxu0 %v468_v28  ;;  %2745 = vmatprep.subr.mxu1 %v470_v29  ;;  %v1140_v28 = vld [vmem:[%s4584_s6 + $0x17e8] sm:$0xff]  ;;  %v1142_v29 = vld [vmem:[%s4584_s6 + $0x17f8] sm:$0xff] }
 0x2e7   : > { %2639 = vmatpush1.xpose.msra.mxu0 %v467_v58  ;;  %2746 = vmatpush1.xpose.msra.mxu1 %v469_v2  ;;  %v1139_v58 = vld [vmem:[%s4584_s6 + $0x17e0] sm:$0xff]  ;;  %v1141_v2 = vld [vmem:[%s4584_s6 + $0x17f0] sm:$0xff] }
 0x2e8   : > { %2640 = vmatprep.subr.mxu0 %v444_v46  ;;  %2747 = vmatprep.subr.mxu1 %v446_v13  ;;  %v1116_v46 = vld [vmem:[%s4584_s6 + $0x1728] sm:$0xff]  ;;  %v1118_v13 = vld [vmem:[%s4584_s6 + $0x1738] sm:$0xff] }
 0x2eb   : > { %2641 = vmatpush1.xpose.msra.mxu0 %v443_v42  ;;  %2748 = vmatpush1.xpose.msra.mxu1 %v445_v34  ;;  %v1115_v42 = vld [vmem:[%s4584_s6 + $0x1720] sm:$0xff]  ;;  %v1117_v34 = vld [vmem:[%s4584_s6 + $0x1730] sm:$0xff] }
 0x2ec   : > { %2642 = vmatprep.subr.mxu0 %v420_v57  ;;  %2749 = vmatprep.subr.mxu1 %v422_v11  ;;  %v1092_v57 = vld [vmem:[%s4584_s6 + $0x1668] sm:$0xff]  ;;  %v1094_v11 = vld [vmem:[%s4584_s6 + $0x1678] sm:$0xff] }
 0x2ef   : > { %2643 = vmatpush1.xpose.msra.mxu0 %v419_v60  ;;  %2750 = vmatpush1.xpose.msra.mxu1 %v421_v45  ;;  %v1091_v60 = vld [vmem:[%s4584_s6 + $0x1660] sm:$0xff]  ;;  %v1093_v45 = vld [vmem:[%s4584_s6 + $0x1670] sm:$0xff] }
 0x2f0   : > { %2644 = vmatprep.subr.mxu0 %v396_v4  ;;  %2751 = vmatprep.subr.mxu1 %v398_v19  ;;  %v1068_v4 = vld [vmem:[%s4584_s6 + $0x15a8] sm:$0xff]  ;;  %v1070_v19 = vld [vmem:[%s4584_s6 + $0x15b8] sm:$0xff] }
 0x2f3   : > { %2645 = vmatpush1.xpose.msra.mxu0 %v395_v25  ;;  %2752 = vmatpush1.xpose.msra.mxu1 %v397_v18  ;;  %v1067_v25 = vld [vmem:[%s4584_s6 + $0x15a0] sm:$0xff]  ;;  %v1069_v18 = vld [vmem:[%s4584_s6 + $0x15b0] sm:$0xff] }
 0x2f4   : > { %2646 = vmatprep.subr.mxu0 %v1140_v28  ;;  %2753 = vmatprep.subr.mxu1 %v1142_v29  ;;  %v1044_v28 = vld [vmem:[%s4584_s6 + $0x14e8] sm:$0xff]  ;;  %v1046_v29 = vld [vmem:[%s4584_s6 + $0x14f8] sm:$0xff] }
 0x2f7   : > { %2647 = vmatpush2.xpose.msra.mxu0 %v1139_v58  ;;  %2754 = vmatpush2.xpose.msra.mxu1 %v1141_v2  ;;  %v1043_v58 = vld [vmem:[%s4584_s6 + $0x14e0] sm:$0xff]  ;;  %v1045_v2 = vld [vmem:[%s4584_s6 + $0x14f0] sm:$0xff] }
 0x2f8   : > { %2648 = vmatprep.subr.mxu0 %v1116_v46  ;;  %2755 = vmatprep.subr.mxu1 %v1118_v13  ;;  %v1020_v46 = vld [vmem:[%s4584_s6 + $0x1428] sm:$0xff]  ;;  %v1022_v13 = vld [vmem:[%s4584_s6 + $0x1438] sm:$0xff] }
 0x2fb   : > { %2649 = vmatpush2.xpose.msra.mxu0 %v1115_v42  ;;  %2756 = vmatpush2.xpose.msra.mxu1 %v1117_v34  ;;  %v1019_v42 = vld [vmem:[%s4584_s6 + $0x1420] sm:$0xff]  ;;  %v1021_v34 = vld [vmem:[%s4584_s6 + $0x1430] sm:$0xff] }
 0x2fc   : > { %2650 = vmatprep.subr.mxu0 %v1092_v57  ;;  %2757 = vmatprep.subr.mxu1 %v1094_v11  ;;  %v996_v57 = vld [vmem:[%s4584_s6 + $0x1368] sm:$0xff]  ;;  %v998_v11 = vld [vmem:[%s4584_s6 + $0x1378] sm:$0xff] }
 0x2ff   : > { %2651 = vmatpush2.xpose.msra.mxu0 %v1091_v60  ;;  %2758 = vmatpush2.xpose.msra.mxu1 %v1093_v45  ;;  %v995_v60 = vld [vmem:[%s4584_s6 + $0x1360] sm:$0xff]  ;;  %v997_v45 = vld [vmem:[%s4584_s6 + $0x1370] sm:$0xff] }
 0x300   : > { %2652 = vmatprep.subr.mxu0 %v1068_v4  ;;  %2759 = vmatprep.subr.mxu1 %v1070_v19  ;;  %v972_v4 = vld [vmem:[%s4584_s6 + $0x12a8] sm:$0xff]  ;;  %v974_v19 = vld [vmem:[%s4584_s6 + $0x12b8] sm:$0xff] }
 0x303   : > { %2653 = vmatpush2.xpose.msra.mxu0 %v1067_v25  ;;  %2760 = vmatpush2.xpose.msra.mxu1 %v1069_v18  ;;  %v971_v25 = vld [vmem:[%s4584_s6 + $0x12a0] sm:$0xff]  ;;  %v973_v18 = vld [vmem:[%s4584_s6 + $0x12b0] sm:$0xff] }
 0x304   : > { %2654 = vmatprep.subr.mxu0 %v1044_v28  ;;  %2761 = vmatprep.subr.mxu1 %v1046_v29  ;;  %v948_v28 = vld [vmem:[%s4584_s6 + $0x11e8] sm:$0xff]  ;;  %v950_v29 = vld [vmem:[%s4584_s6 + $0x11f8] sm:$0xff] }
 0x307   : > { %2655 = vmatpush2.xpose.msra.mxu0 %v1043_v58  ;;  %2762 = vmatpush2.xpose.msra.mxu1 %v1045_v2  ;;  %v947_v58 = vld [vmem:[%s4584_s6 + $0x11e0] sm:$0xff]  ;;  %v949_v2 = vld [vmem:[%s4584_s6 + $0x11f0] sm:$0xff] }
 0x308   : > { %2656 = vmatprep.subr.mxu0 %v1020_v46  ;;  %2763 = vmatprep.subr.mxu1 %v1022_v13  ;;  %v924_v46 = vld [vmem:[%s4584_s6 + $0x1128] sm:$0xff]  ;;  %v926_v13 = vld [vmem:[%s4584_s6 + $0x1138] sm:$0xff] }
 0x30b   : > { %2657 = vmatpush2.xpose.msra.mxu0 %v1019_v42  ;;  %2764 = vmatpush2.xpose.msra.mxu1 %v1021_v34  ;;  %v923_v42 = vld [vmem:[%s4584_s6 + $0x1120] sm:$0xff]  ;;  %v925_v34 = vld [vmem:[%s4584_s6 + $0x1130] sm:$0xff] }
 0x30c   : > { %2658 = vmatprep.subr.mxu0 %v996_v57  ;;  %2765 = vmatprep.subr.mxu1 %v998_v11  ;;  %v900_v57 = vld [vmem:[%s4584_s6 + $0x1068] sm:$0xff]  ;;  %v902_v11 = vld [vmem:[%s4584_s6 + $0x1078] sm:$0xff] }
 0x30f   : > { %2659 = vmatpush2.xpose.msra.mxu0 %v995_v60  ;;  %2766 = vmatpush2.xpose.msra.mxu1 %v997_v45  ;;  %v899_v60 = vld [vmem:[%s4584_s6 + $0x1060] sm:$0xff]  ;;  %v901_v45 = vld [vmem:[%s4584_s6 + $0x1070] sm:$0xff] }
 0x310   : > { %2660 = vmatprep.subr.mxu0 %v972_v4  ;;  %2767 = vmatprep.subr.mxu1 %v974_v19  ;;  %v876_v4 = vld [vmem:[%s4584_s6 + $0xfa8] sm:$0xff]  ;;  %v878_v19 = vld [vmem:[%s4584_s6 + $0xfb8] sm:$0xff] }
 0x313   : > { %2661 = vmatpush2.xpose.msra.mxu0 %v971_v25  ;;  %2768 = vmatpush2.xpose.msra.mxu1 %v973_v18  ;;  %v875_v25 = vld [vmem:[%s4584_s6 + $0xfa0] sm:$0xff]  ;;  %v877_v18 = vld [vmem:[%s4584_s6 + $0xfb0] sm:$0xff] }
 0x314   : > { %2662 = vmatprep.subr.mxu0 %v948_v28  ;;  %2769 = vmatprep.subr.mxu1 %v950_v29  ;;  %v852_v28 = vld [vmem:[%s4584_s6 + $0xee8] sm:$0xff]  ;;  %v854_v29 = vld [vmem:[%s4584_s6 + $0xef8] sm:$0xff] }
 0x317   : > { %2663 = vmatpush2.xpose.msra.mxu0 %v947_v58  ;;  %2770 = vmatpush2.xpose.msra.mxu1 %v949_v2  ;;  %v851_v58 = vld [vmem:[%s4584_s6 + $0xee0] sm:$0xff]  ;;  %v853_v2 = vld [vmem:[%s4584_s6 + $0xef0] sm:$0xff] }
 0x318   : > { %2664 = vmatprep.subr.mxu0 %v924_v46  ;;  %2771 = vmatprep.subr.mxu1 %v926_v13  ;;  %v828_v46 = vld [vmem:[%s4584_s6 + $0xe28] sm:$0xff]  ;;  %v830_v13 = vld [vmem:[%s4584_s6 + $0xe38] sm:$0xff] }
 0x31b   : > { %2665 = vmatpush2.xpose.msra.mxu0 %v923_v42  ;;  %2772 = vmatpush2.xpose.msra.mxu1 %v925_v34  ;;  %v827_v42 = vld [vmem:[%s4584_s6 + $0xe20] sm:$0xff]  ;;  %v829_v34 = vld [vmem:[%s4584_s6 + $0xe30] sm:$0xff] }
 0x31c   : > { %2666 = vmatprep.subr.mxu0 %v900_v57  ;;  %2773 = vmatprep.subr.mxu1 %v902_v11  ;;  %v804_v57 = vld [vmem:[%s4584_s6 + $0xd68] sm:$0xff]  ;;  %v806_v11 = vld [vmem:[%s4584_s6 + $0xd78] sm:$0xff] }
 0x31f   : > { %2667 = vmatpush2.xpose.msra.mxu0 %v899_v60  ;;  %2774 = vmatpush2.xpose.msra.mxu1 %v901_v45  ;;  %v803_v60 = vld [vmem:[%s4584_s6 + $0xd60] sm:$0xff]  ;;  %v805_v45 = vld [vmem:[%s4584_s6 + $0xd70] sm:$0xff] }
 0x320   : > { %2668 = vmatprep.subr.mxu0 %v876_v4  ;;  %2775 = vmatprep.subr.mxu1 %v878_v19  ;;  %v780_v4 = vld [vmem:[%s4584_s6 + $0xca8] sm:$0xff]  ;;  %v782_v19 = vld [vmem:[%s4584_s6 + $0xcb8] sm:$0xff] }
 0x323   : > { %2669 = vmatpush2.xpose.msra.mxu0 %v875_v25  ;;  %2776 = vmatpush2.xpose.msra.mxu1 %v877_v18  ;;  %v779_v25 = vld [vmem:[%s4584_s6 + $0xca0] sm:$0xff]  ;;  %v781_v18 = vld [vmem:[%s4584_s6 + $0xcb0] sm:$0xff] }
 0x324   : > { %2670 = vmatprep.subr.mxu0 %v852_v28  ;;  %2777 = vmatprep.subr.mxu1 %v854_v29  ;;  %v1504_v28 = vld [vmem:[%s4584_s6 + $0x2348] sm:$0xff]  ;;  %v1506_v29 = vld [vmem:[%s4584_s6 + $0x2358] sm:$0xff] }
 0x327   : > { %2671 = vmatpush2.xpose.msra.mxu0 %v851_v58  ;;  %2778 = vmatpush2.xpose.msra.mxu1 %v853_v2  ;;  %v227_v58 = vld [vmem:[%s7303_s0 + $0xa0] sm:$0xff]  ;;  %v229_v2 = vld [vmem:[%s7303_s0 + $0xb0] sm:$0xff] }
 0x328   : > { %2672 = vmatprep.subr.mxu0 %v828_v46  ;;  %2779 = vmatprep.subr.mxu1 %v830_v13  ;;  %v1503_v46 = vld [vmem:[%s4584_s6 + $0x2340] sm:$0xff]  ;;  %v1505_v13 = vld [vmem:[%s4584_s6 + $0x2350] sm:$0xff] }
 0x32b   : > { %2673 = vmatpush2.xpose.msra.mxu0 %v827_v42  ;;  %2780 = vmatpush2.xpose.msra.mxu1 %v829_v34  ;;  %v252_v42 = vld [vmem:[%s7303_s0 + $0x168] sm:$0xff] }
 0x32c   : > { %2674 = vmatprep.subr.mxu0 %v804_v57  ;;  %2781 = vmatprep.subr.mxu1 %v806_v11  ;;  %v1480_v34 = vld [vmem:[%s4584_s6 + $0x2288] sm:$0xff]  ;;  %v1482_v57 = vld [vmem:[%s4584_s6 + $0x2298] sm:$0xff] }
 0x32d   : > { %v254_v11 = vld [vmem:[%s7303_s0 + $0x178] sm:$0xff] }
 0x32f   : > { %2675 = vmatpush2.xpose.msra.mxu0 %v803_v60  ;;  %2782 = vmatpush2.xpose.msra.mxu1 %v805_v45  ;;  %v251_v60 = vld [vmem:[%s7303_s0 + $0x160] sm:$0xff]  ;;  %v253_v45 = vld [vmem:[%s7303_s0 + $0x170] sm:$0xff] }
 0x330   : > { %2676 = vmatprep.subr.mxu0 %v780_v4  ;;  %2783 = vmatprep.subr.mxu1 %v782_v19  ;;  %v1479_v4 = vld [vmem:[%s4584_s6 + $0x2280] sm:$0xff]  ;;  %v1481_v19 = vld [vmem:[%s4584_s6 + $0x2290] sm:$0xff] }
 0x333   : > { %2677 = vmatpush2.xpose.msra.mxu0 %v779_v25  ;;  %2784 = vmatpush2.xpose.msra.mxu1 %v781_v18  ;;  %v276_v25 = vld [vmem:[%s7303_s0 + $0x228] sm:$0xff] }
 0x334   : > { %2828 = vmatprep.subr.mxu0 %v1504_v28  ;;  %2928 = vmatprep.subr.mxu1 %v1506_v29  ;;  %v1456_v18 = vld [vmem:[%s4584_s6 + $0x21c8] sm:$0xff]  ;;  %v1458_v28 = vld [vmem:[%s4584_s6 + $0x21d8] sm:$0xff] }
 0x335   : > { %v278_v29 = vld [vmem:[%s7303_s0 + $0x238] sm:$0xff] }
 0x336   : > { %2679 = vmatmul.mubr.f32.vlgmr.msra.gmra.mxu0 %v227_v58  ;;  %2786 = vmatmul.mubr.f32.vlgmr.msra.gmra.mxu1 %v229_v2  ;;  %v275_v58 = vld [vmem:[%s7303_s0 + $0x220] sm:$0xff]  ;;  %v277_v2 = vld [vmem:[%s7303_s0 + $0x230] sm:$0xff] }
 0x337   : > { %2829 = vmatpush1.xpose.msra.mxu0 %v1503_v46  ;;  %2929 = vmatpush1.xpose.msra.mxu1 %v1505_v13  ;;  %v1455_v46 = vld [vmem:[%s4584_s6 + $0x21c0] sm:$0xff]  ;;  %v1457_v13 = vld [vmem:[%s4584_s6 + $0x21d0] sm:$0xff] }
 0x338   : > { %2684 = vmatprep.mubr.f32.mxu0 %v252_v42  ;;  %2830 = vmatprep.subr.mxu0 %v1480_v34  ;;  %v300_v42 = vld [vmem:[%s7303_s0 + $0x2e8] sm:$0xff] }
 0x339   : > { %2930 = vmatprep.subr.mxu1 %v1482_v57  ;;  %2791 = vmatprep.mubr.f32.mxu1 %v254_v11  ;;  %v1432_v34 = vld [vmem:[%s4584_s6 + $0x2108] sm:$0xff]  ;;  %v1434_v57 = vld [vmem:[%s4584_s6 + $0x2118] sm:$0xff] }
 0x33a   : > { %2685 = vmatmul.mubr.f32.gmra.mxu0 %v251_v60  ;;  %2792 = vmatmul.mubr.f32.gmra.mxu1 %v253_v45  ;;  %v302_v11 = vld [vmem:[%s7303_s0 + $0x2f8] sm:$0xff]  ;;  %v299_v60 = vld [vmem:[%s7303_s0 + $0x2e0] sm:$0xff]  ;;  %v301_v45 = vld [vmem:[%s7303_s0 + $0x2f0] sm:$0xff] }
 0x33b   : > { %2831 = vmatpush1.xpose.msra.mxu0 %v1479_v4  ;;  %2931 = vmatpush1.xpose.msra.mxu1 %v1481_v19  ;;  %v1431_v4 = vld [vmem:[%s4584_s6 + $0x2100] sm:$0xff]  ;;  %v1433_v19 = vld [vmem:[%s4584_s6 + $0x2110] sm:$0xff] }
 0x33c   : > { %2690 = vmatprep.mubr.f32.mxu0 %v276_v25  ;;  %2832 = vmatprep.subr.mxu0 %v1456_v18  ;;  %v324_v25 = vld [vmem:[%s7303_s0 + $0x3a8] sm:$0xff] }
 0x33d   : > { %2932 = vmatprep.subr.mxu1 %v1458_v28  ;;  %2797 = vmatprep.mubr.f32.mxu1 %v278_v29  ;;  %v1408_v18 = vld [vmem:[%s4584_s6 + $0x2048] sm:$0xff]  ;;  %v1410_v28 = vld [vmem:[%s4584_s6 + $0x2058] sm:$0xff] }
 0x33e   : > { %2691 = vmatmul.mubr.f32.gmra.mxu0 %v275_v58  ;;  %2798 = vmatmul.mubr.f32.gmra.mxu1 %v277_v2  ;;  %v326_v29 = vld [vmem:[%s7303_s0 + $0x3b8] sm:$0xff]  ;;  %v323_v58 = vld [vmem:[%s7303_s0 + $0x3a0] sm:$0xff]  ;;  %v325_v2 = vld [vmem:[%s7303_s0 + $0x3b0] sm:$0xff] }
 0x33f   : > { %2833 = vmatpush1.xpose.msra.mxu0 %v1455_v46  ;;  %2933 = vmatpush1.xpose.msra.mxu1 %v1457_v13  ;;  %v1407_v46 = vld [vmem:[%s4584_s6 + $0x2040] sm:$0xff]  ;;  %v1409_v13 = vld [vmem:[%s4584_s6 + $0x2050] sm:$0xff] }
 0x340   : > { %2696 = vmatprep.mubr.f32.mxu0 %v300_v42  ;;  %2834 = vmatprep.subr.mxu0 %v1432_v34  ;;  %v348_v42 = vld [vmem:[%s7303_s0 + $0x468] sm:$0xff] }
 0x341   : > { %2934 = vmatprep.subr.mxu1 %v1434_v57  ;;  %2803 = vmatprep.mubr.f32.mxu1 %v302_v11  ;;  %v1384_v34 = vld [vmem:[%s4584_s6 + $0x1f88] sm:$0xff]  ;;  %v1386_v57 = vld [vmem:[%s4584_s6 + $0x1f98] sm:$0xff] }
 0x342   : > { %2697 = vmatmul.mubr.f32.gmra.mxu0 %v299_v60  ;;  %2804 = vmatmul.mubr.f32.gmra.mxu1 %v301_v45  ;;  %v350_v11 = vld [vmem:[%s7303_s0 + $0x478] sm:$0xff]  ;;  %v347_v60 = vld [vmem:[%s7303_s0 + $0x460] sm:$0xff]  ;;  %v349_v45 = vld [vmem:[%s7303_s0 + $0x470] sm:$0xff] }
 0x343   : > { %2835 = vmatpush1.xpose.msra.mxu0 %v1431_v4  ;;  %2935 = vmatpush1.xpose.msra.mxu1 %v1433_v19  ;;  %v1383_v4 = vld [vmem:[%s4584_s6 + $0x1f80] sm:$0xff]  ;;  %v1385_v19 = vld [vmem:[%s4584_s6 + $0x1f90] sm:$0xff] }
 0x344   : > { %2702 = vmatprep.mubr.f32.mxu0 %v324_v25  ;;  %2836 = vmatprep.subr.mxu0 %v1408_v18  ;;  %v372_v25 = vld [vmem:[%s7303_s0 + $0x528] sm:$0x1] }
 0x345   : > { %2936 = vmatprep.subr.mxu1 %v1410_v28  ;;  %2809 = vmatprep.mubr.f32.mxu1 %v326_v29  ;;  %v1360_v18 = vld [vmem:[%s4584_s6 + $0x1ec8] sm:$0xff]  ;;  %v1362_v28 = vld [vmem:[%s4584_s6 + $0x1ed8] sm:$0xff] }
 0x346   : > { %2703 = vmatmul.mubr.f32.gmra.mxu0 %v323_v58  ;;  %2810 = vmatmul.mubr.f32.gmra.mxu1 %v325_v2  ;;  %v374_v29 = vld [vmem:[%s7303_s0 + $0x538] sm:$0x1]  ;;  %v371_v58 = vld [vmem:[%s7303_s0 + $0x520] sm:$0x1]  ;;  %v373_v2 = vld [vmem:[%s7303_s0 + $0x530] sm:$0x1] }
 0x347   : > { %2837 = vmatpush1.xpose.msra.mxu0 %v1407_v46  ;;  %2937 = vmatpush1.xpose.msra.mxu1 %v1409_v13  ;;  %v1359_v46 = vld [vmem:[%s4584_s6 + $0x1ec0] sm:$0xff]  ;;  %v1361_v13 = vld [vmem:[%s4584_s6 + $0x1ed0] sm:$0xff] }
 0x348   : > { %2708 = vmatprep.mubr.f32.mxu0 %v348_v42  ;;  %2838 = vmatprep.subr.mxu0 %v1384_v34  ;;  %v1336_v42 = vld [vmem:[%s4584_s6 + $0x1e08] sm:$0xff]  ;;  %v1338_v34 = vld [vmem:[%s4584_s6 + $0x1e18] sm:$0xff] }
 0x349   : > { %2938 = vmatprep.subr.mxu1 %v1386_v57  ;;  %2815 = vmatprep.mubr.f32.mxu1 %v350_v11  ;;  %v1335_v57 = vld [vmem:[%s4584_s6 + $0x1e00] sm:$0xff]  ;;  %v1337_v11 = vld [vmem:[%s4584_s6 + $0x1e10] sm:$0xff] }
 0x34a   : > { %2709 = vmatmul.mubr.f32.gmra.mxu0 %v347_v60  ;;  %2816 = vmatmul.mubr.f32.gmra.mxu1 %v349_v45  ;;  %v1312_v60 = vld [vmem:[%s4584_s6 + $0x1d48] sm:$0xff]  ;;  %v1314_v45 = vld [vmem:[%s4584_s6 + $0x1d58] sm:$0xff] }
 0x34b   : > { %2839 = vmatpush1.xpose.msra.mxu0 %v1383_v4  ;;  %2939 = vmatpush1.xpose.msra.mxu1 %v1385_v19  ;;  %v4242_v4 = vld [vmem:[%s7303_s0 + $0x8] sm:$0xff]  ;;  %v4243_v19 = vld [vmem:[%s7303_s0 + $0x18] sm:$0xff] }
 0x34c   : > { %2714 = vmatprep.mubr.f32.mxu0 %v372_v25  ;;  %2840 = vmatprep.subr.mxu0 %v1360_v18  ;;  %v1311_v25 = vld [vmem:[%s4584_s6 + $0x1d40] sm:$0xff]  ;;  %v1313_v18 = vld [vmem:[%s4584_s6 + $0x1d50] sm:$0xff] }
 0x34d   : > { %2940 = vmatprep.subr.mxu1 %v1362_v28  ;;  %2821 = vmatprep.mubr.f32.mxu1 %v374_v29  ;;  %v1288_v28 = vld [vmem:[%s4584_s6 + $0x1c88] sm:$0xff]  ;;  %v1290_v29 = vld [vmem:[%s4584_s6 + $0x1c98] sm:$0xff] }
 0x34e   : > { %2715 = vmatmul.mubr.f32.gmra.mxu0 %v371_v58  ;;  %2822 = vmatmul.mubr.f32.gmra.mxu1 %v373_v2  ;;  %v1287_v58 = vld [vmem:[%s4584_s6 + $0x1c80] sm:$0xff]  ;;  %v1289_v2 = vld [vmem:[%s4584_s6 + $0x1c90] sm:$0xff] }
 0x34f   : > { %2841 = vmatpush1.xpose.msra.mxu0 %v1359_v46  ;;  %2941 = vmatpush1.xpose.msra.mxu1 %v1361_v13  ;;  %v1264_v46 = vld [vmem:[%s4584_s6 + $0x1bc8] sm:$0xff]  ;;  %v1266_v13 = vld [vmem:[%s4584_s6 + $0x1bd8] sm:$0xff] }
 0x350   : > { %2842 = vmatprep.subr.mxu0 %v1336_v42  ;;  %2942 = vmatprep.subr.mxu1 %v1338_v34  ;;  %v1263_v42 = vld [vmem:[%s4584_s6 + $0x1bc0] sm:$0xff]  ;;  %v1265_v34 = vld [vmem:[%s4584_s6 + $0x1bd0] sm:$0xff] }
 0x351   : > { %2892 = vmatprep.mubr.f32.mxu0 %v4242_v4  ;;  %2992 = vmatprep.mubr.f32.mxu1 %v4243_v19  ;;  %v1216_v4 = vld [vmem:[%s4584_s6 + $0x1a48] sm:$0xff]  ;;  %v1218_v19 = vld [vmem:[%s4584_s6 + $0x1a58] sm:$0xff] }
 0x353   : > { %2843 = vmatpush1.xpose.msra.mxu0 %v1335_v57  ;;  %2943 = vmatpush1.xpose.msra.mxu1 %v1337_v11  ;;  %v1240_v57 = vld [vmem:[%s4584_s6 + $0x1b08] sm:$0xff]  ;;  %v1242_v11 = vld [vmem:[%s4584_s6 + $0x1b18] sm:$0xff] }
 0x354   : > { %2844 = vmatprep.subr.mxu0 %v1312_v60  ;;  %2944 = vmatprep.subr.mxu1 %v1314_v45  ;;  %v1239_v60 = vld [vmem:[%s4584_s6 + $0x1b00] sm:$0xff]  ;;  %v1241_v45 = vld [vmem:[%s4584_s6 + $0x1b10] sm:$0xff] }
 0x357   : > { %2845 = vmatpush1.xpose.msra.mxu0 %v1311_v25  ;;  %2945 = vmatpush1.xpose.msra.mxu1 %v1313_v18  ;;  %v1215_v25 = vld [vmem:[%s4584_s6 + $0x1a40] sm:$0xff]  ;;  %v1217_v18 = vld [vmem:[%s4584_s6 + $0x1a50] sm:$0xff] }
 0x358   : > { %2846 = vmatprep.subr.mxu0 %v1288_v28  ;;  %2946 = vmatprep.subr.mxu1 %v1290_v29  ;;  %v1192_v28 = vld [vmem:[%s4584_s6 + $0x1988] sm:$0xff]  ;;  %v1194_v29 = vld [vmem:[%s4584_s6 + $0x1998] sm:$0xff] }
 0x35b   : > { %2847 = vmatpush1.xpose.msra.mxu0 %v1287_v58  ;;  %2947 = vmatpush1.xpose.msra.mxu1 %v1289_v2  ;;  %v1191_v58 = vld [vmem:[%s4584_s6 + $0x1980] sm:$0xff]  ;;  %v1193_v2 = vld [vmem:[%s4584_s6 + $0x1990] sm:$0xff] }
 0x35c   : > { %2848 = vmatprep.subr.mxu0 %v1264_v46  ;;  %2948 = vmatprep.subr.mxu1 %v1266_v13  ;;  %v1168_v46 = vld [vmem:[%s4584_s6 + $0x18c8] sm:$0xff]  ;;  %v1170_v13 = vld [vmem:[%s4584_s6 + $0x18d8] sm:$0xff] }
 0x35f   : > { %2849 = vmatpush1.xpose.msra.mxu0 %v1263_v42  ;;  %2949 = vmatpush1.xpose.msra.mxu1 %v1265_v34  ;;  %v1167_v42 = vld [vmem:[%s4584_s6 + $0x18c0] sm:$0xff]  ;;  %v1169_v34 = vld [vmem:[%s4584_s6 + $0x18d0] sm:$0xff] }
 0x360   : > { %2850 = vmatprep.subr.mxu0 %v1240_v57  ;;  %2950 = vmatprep.subr.mxu1 %v1242_v11  ;;  %v1144_v57 = vld [vmem:[%s4584_s6 + $0x1808] sm:$0xff]  ;;  %v1146_v11 = vld [vmem:[%s4584_s6 + $0x1818] sm:$0xff] }
 0x363   : > { %2851 = vmatpush1.xpose.msra.mxu0 %v1239_v60  ;;  %2951 = vmatpush1.xpose.msra.mxu1 %v1241_v45  ;;  %v1143_v60 = vld [vmem:[%s4584_s6 + $0x1800] sm:$0xff]  ;;  %v1145_v45 = vld [vmem:[%s4584_s6 + $0x1810] sm:$0xff] }
 0x364   : > { %2852 = vmatprep.subr.mxu0 %v1216_v4  ;;  %2952 = vmatprep.subr.mxu1 %v1218_v19  ;;  %v1508_v4 = vld [vmem:[%s4584_s6 + $0x2368] sm:$0xff]  ;;  %v1510_v19 = vld [vmem:[%s4584_s6 + $0x2378] sm:$0xff] }
 0x367   : > { %2853 = vmatpush1.xpose.msra.mxu0 %v1215_v25  ;;  %2953 = vmatpush1.xpose.msra.mxu1 %v1217_v18  ;;  %v1507_v25 = vld [vmem:[%s4584_s6 + $0x2360] sm:$0xff]  ;;  %v1509_v18 = vld [vmem:[%s4584_s6 + $0x2370] sm:$0xff] }
 0x368   : > { %2854 = vmatprep.subr.mxu0 %v1192_v28  ;;  %2954 = vmatprep.subr.mxu1 %v1194_v29  ;;  %v1484_v28 = vld [vmem:[%s4584_s6 + $0x22a8] sm:$0xff]  ;;  %v1486_v29 = vld [vmem:[%s4584_s6 + $0x22b8] sm:$0xff] }
 0x36b   : > { %2855 = vmatpush1.xpose.msra.mxu0 %v1191_v58  ;;  %2955 = vmatpush1.xpose.msra.mxu1 %v1193_v2  ;;  %v4244_v58 = vld [vmem:[%s7303_s0] sm:$0xff]  ;;  %v4245_v2 = vld [vmem:[%s7303_s0 + $0x10] sm:$0xff] }
 0x36c   : > { %2856 = vmatprep.subr.mxu0 %v1168_v46  ;;  %2956 = vmatprep.subr.mxu1 %v1170_v13  ;;  %v1483_v46 = vld [vmem:[%s4584_s6 + $0x22a0] sm:$0xff]  ;;  %v1485_v13 = vld [vmem:[%s4584_s6 + $0x22b0] sm:$0xff] }
 0x36f   : > { %2857 = vmatpush1.xpose.msra.mxu0 %v1167_v42  ;;  %2957 = vmatpush1.xpose.msra.mxu1 %v1169_v34  ;;  %v1460_v42 = vld [vmem:[%s4584_s6 + $0x21e8] sm:$0xff]  ;;  %v1462_v34 = vld [vmem:[%s4584_s6 + $0x21f8] sm:$0xff] }
 0x370   : > { %2858 = vmatprep.subr.mxu0 %v1144_v57  ;;  %2958 = vmatprep.subr.mxu1 %v1146_v11  ;;  %v4246_v57 = vld [vmem:[%s7303_s0 + $0xc8] sm:$0xff]  ;;  %v4247_v11 = vld [vmem:[%s7303_s0 + $0xd8] sm:$0xff] }
 0x373   : > { %2859 = vmatpush1.xpose.msra.mxu0 %v1143_v60  ;;  %2959 = vmatpush1.xpose.msra.mxu1 %v1145_v45  ;;  %v4248_v60 = vld [vmem:[%s7303_s0 + $0xc0] sm:$0xff]  ;;  %v4249_v45 = vld [vmem:[%s7303_s0 + $0xd0] sm:$0xff] }
 0x374   : > { %3028 = vmatprep.subr.mxu0 %v1508_v4  ;;  %3128 = vmatprep.subr.mxu1 %v1510_v19  ;;  %v1459_v4 = vld [vmem:[%s4584_s6 + $0x21e0] sm:$0xff]  ;;  %v1461_v19 = vld [vmem:[%s4584_s6 + $0x21f0] sm:$0xff] }
 0x376   : > { %2893 = vmatmul.mubr.f32.vlgmr.msra.gmra.mxu0 %v4244_v58  ;;  %2993 = vmatmul.mubr.f32.vlgmr.msra.gmra.mxu1 %v4245_v2  ;;  %v4252_v58 = vld [vmem:[%s7303_s0 + $0x180] sm:$0xff]  ;;  %v4253_v2 = vld [vmem:[%s7303_s0 + $0x190] sm:$0xff] }
 0x377   : > { %3029 = vmatpush1.xpose.msra.mxu0 %v1507_v25  ;;  %3129 = vmatpush1.xpose.msra.mxu1 %v1509_v18  ;;  %v1436_v25 = vld [vmem:[%s4584_s6 + $0x2128] sm:$0xff]  ;;  %v1438_v18 = vld [vmem:[%s4584_s6 + $0x2138] sm:$0xff] }
 0x378   : > { %3030 = vmatprep.subr.mxu0 %v1484_v28  ;;  %3130 = vmatprep.subr.mxu1 %v1486_v29  ;;  %v4250_v28 = vld [vmem:[%s7303_s0 + $0x188] sm:$0xff]  ;;  %v4251_v29 = vld [vmem:[%s7303_s0 + $0x198] sm:$0xff] }
 0x379   : > { %2897 = vmatprep.mubr.f32.mxu0 %v4246_v57  ;;  %2997 = vmatprep.mubr.f32.mxu1 %v4247_v11  ;;  %v4254_v57 = vld [vmem:[%s7303_s0 + $0x248] sm:$0xff]  ;;  %v4255_v11 = vld [vmem:[%s7303_s0 + $0x258] sm:$0xff] }
 0x37a   : > { %2898 = vmatmul.mubr.f32.gmra.mxu0 %v4248_v60  ;;  %2998 = vmatmul.mubr.f32.gmra.mxu1 %v4249_v45  ;;  %v4256_v60 = vld [vmem:[%s7303_s0 + $0x240] sm:$0xff]  ;;  %v4257_v45 = vld [vmem:[%s7303_s0 + $0x250] sm:$0xff] }
 0x37b   : > { %3031 = vmatpush1.xpose.msra.mxu0 %v1483_v46  ;;  %3131 = vmatpush1.xpose.msra.mxu1 %v1485_v13  ;;  %v1435_v46 = vld [vmem:[%s4584_s6 + $0x2120] sm:$0xff]  ;;  %v1437_v13 = vld [vmem:[%s4584_s6 + $0x2130] sm:$0xff] }
 0x37c   : > { %3032 = vmatprep.subr.mxu0 %v1460_v42  ;;  %3132 = vmatprep.subr.mxu1 %v1462_v34  ;;  %v1412_v42 = vld [vmem:[%s4584_s6 + $0x2068] sm:$0xff]  ;;  %v1414_v34 = vld [vmem:[%s4584_s6 + $0x2078] sm:$0xff] }
 0x37d   : > { %2902 = vmatprep.mubr.f32.mxu0 %v4250_v28  ;;  %3002 = vmatprep.mubr.f32.mxu1 %v4251_v29  ;;  %v4258_v28 = vld [vmem:[%s7303_s0 + $0x308] sm:$0xff]  ;;  %v4259_v29 = vld [vmem:[%s7303_s0 + $0x318] sm:$0xff] }
 0x37e   : > { %2903 = vmatmul.mubr.f32.gmra.mxu0 %v4252_v58  ;;  %3003 = vmatmul.mubr.f32.gmra.mxu1 %v4253_v2  ;;  %v4260_v58 = vld [vmem:[%s7303_s0 + $0x300] sm:$0xff]  ;;  %v4261_v2 = vld [vmem:[%s7303_s0 + $0x310] sm:$0xff] }
 0x37f   : > { %3033 = vmatpush1.xpose.msra.mxu0 %v1459_v4  ;;  %3133 = vmatpush1.xpose.msra.mxu1 %v1461_v19  ;;  %v1411_v4 = vld [vmem:[%s4584_s6 + $0x2060] sm:$0xff]  ;;  %v1413_v19 = vld [vmem:[%s4584_s6 + $0x2070] sm:$0xff] }
 0x380   : > { %3034 = vmatprep.subr.mxu0 %v1436_v25  ;;  %3134 = vmatprep.subr.mxu1 %v1438_v18  ;;  %v1388_v25 = vld [vmem:[%s4584_s6 + $0x1fa8] sm:$0xff]  ;;  %v1390_v18 = vld [vmem:[%s4584_s6 + $0x1fb8] sm:$0xff] }
 0x381   : > { %2907 = vmatprep.mubr.f32.mxu0 %v4254_v57  ;;  %3007 = vmatprep.mubr.f32.mxu1 %v4255_v11  ;;  %v1364_v57 = vld [vmem:[%s4584_s6 + $0x1ee8] sm:$0xff]  ;;  %v1366_v11 = vld [vmem:[%s4584_s6 + $0x1ef8] sm:$0xff] }
 0x382   : > { %2908 = vmatmul.mubr.f32.gmra.mxu0 %v4256_v60  ;;  %3008 = vmatmul.mubr.f32.gmra.mxu1 %v4257_v45  ;;  %v4262_v60 = vld [vmem:[%s7303_s0 + $0x3c8] sm:$0xff]  ;;  %v4263_v45 = vld [vmem:[%s7303_s0 + $0x3d8] sm:$0xff] }
 0x383   : > { %3035 = vmatpush1.xpose.msra.mxu0 %v1435_v46  ;;  %3135 = vmatpush1.xpose.msra.mxu1 %v1437_v13  ;;  %v6163_v46 = vpop.f32.mrf.mxu0  ;;  %v6165_v13 = vpop.f32.mrf.mxu1 }
 0x384   : > { %3036 = vmatprep.subr.mxu0 %v1412_v42  ;;  %3136 = vmatprep.subr.mxu1 %v1414_v34  ;;  %7322 = vst [vmem:[#allocation14_spill] sm:$0xff] %v6165_v13  ;;  %v1387_v42 = vld [vmem:[%s4584_s6 + $0x1fa0] sm:$0xff]  ;;  %v1389_v34 = vld [vmem:[%s4584_s6 + $0x1fb0] sm:$0xff] }
 0x385   : > { %2912 = vmatprep.mubr.f32.mxu0 %v4258_v28  ;;  %3012 = vmatprep.mubr.f32.mxu1 %v4259_v29  ;;  %v1363_v28 = vld [vmem:[%s4584_s6 + $0x1ee0] sm:$0xff]  ;;  %v1365_v29 = vld [vmem:[%s4584_s6 + $0x1ef0] sm:$0xff] }
 0x386   : > { %2913 = vmatmul.mubr.f32.gmra.mxu0 %v4260_v58  ;;  %3013 = vmatmul.mubr.f32.gmra.mxu1 %v4261_v2  ;;  %v1340_v58 = vld [vmem:[%s4584_s6 + $0x1e28] sm:$0xff]  ;;  %v1342_v2 = vld [vmem:[%s4584_s6 + $0x1e38] sm:$0xff] }
 0x387   : > { %3037 = vmatpush1.xpose.msra.mxu0 %v1411_v4  ;;  %3137 = vmatpush1.xpose.msra.mxu1 %v1413_v19  ;;  %v6177_v4 = vpop.f32.mrf.mxu0  ;;  %v6179_v19 = vpop.f32.mrf.mxu1 }
 0x388   : > { %3038 = vmatprep.subr.mxu0 %v1388_v25  ;;  %3138 = vmatprep.subr.mxu1 %v1390_v18  ;;  %v4264_v25 = vld [vmem:[%s7303_s0 + $0x3c0] sm:$0xff]  ;;  %v4265_v18 = vld [vmem:[%s7303_s0 + $0x3d0] sm:$0xff] }
 0x389   : > { %2917 = vmatprep.mubr.f32.mxu0 %v4262_v60  ;;  %3017 = vmatprep.mubr.f32.mxu1 %v4263_v45  ;;  %v4266_v60 = vld [vmem:[%s7303_s0 + $0x488] sm:$0x1]  ;;  %v4269_v45 = vld [vmem:[%s7303_s0 + $0x490] sm:$0x1] }
 0x38a   : > { %2918 = vmatmul.mubr.f32.gmra.mxu0 %v4264_v25  ;;  %3018 = vmatmul.mubr.f32.gmra.mxu1 %v4265_v18  ;;  %v1339_v25 = vld [vmem:[%s4584_s6 + $0x1e20] sm:$0xff]  ;;  %v1341_v18 = vld [vmem:[%s4584_s6 + $0x1e30] sm:$0xff] }
 0x38b   : > { %3039 = vmatpush1.xpose.msra.mxu0 %v1387_v42  ;;  %3139 = vmatpush1.xpose.msra.mxu1 %v1389_v34  ;;  %v4267_v42 = vld [vmem:[%s7303_s0 + $0x498] sm:$0x1]  ;;  %v6197_v34 = vpop.f32.mrf.mxu0 }
 0x38c   : > { %3040 = vmatprep.subr.mxu0 %v1364_v57  ;;  %3140 = vmatprep.subr.mxu1 %v1366_v11  ;;  %v6199_v57 = vpop.f32.mrf.mxu1  ;;  %v4268_v11 = vld [vmem:[%s7303_s0 + $0x480] sm:$0x1] }
 0x38d   : > { %2922 = vmatprep.mubr.f32.mxu0 %v4266_v60  ;;  %3022 = vmatprep.mubr.f32.mxu1 %v4267_v42  ;;  %v1316_v60 = vld [vmem:[%s4584_s6 + $0x1d68] sm:$0xff]  ;;  %v1318_v42 = vld [vmem:[%s4584_s6 + $0x1d78] sm:$0xff] }
 0x38e   : > { %2923 = vmatmul.mubr.f32.gmra.mxu0 %v4268_v11  ;;  %3023 = vmatmul.mubr.f32.gmra.mxu1 %v4269_v45  ;;  %v4270_v11 = vld [vmem:[%s7303_s0 + $0x28] sm:$0xff]  ;;  %v1317_v45 = vld [vmem:[%s4584_s6 + $0x1d70] sm:$0xff] }
 0x38f   : > { %3041 = vmatpush1.xpose.msra.mxu0 %v1363_v28  ;;  %3141 = vmatpush1.xpose.msra.mxu1 %v1365_v29  ;;  %v4271_v28 = vld [vmem:[%s7303_s0 + $0x38] sm:$0xff]  ;;  %v6217_v29 = vpop.f32.mrf.mxu0 }
 0x390   : > { %3042 = vmatprep.subr.mxu0 %v1340_v58  ;;  %3142 = vmatprep.subr.mxu1 %v1342_v2  ;;  %v6219_v58 = vpop.f32.mrf.mxu1  ;;  %v1315_v2 = vld [vmem:[%s4584_s6 + $0x1d60] sm:$0xff] }
 0x391   : > { %3092 = vmatprep.mubr.f32.mxu0 %v4270_v11  ;;  %3192 = vmatprep.mubr.f32.mxu1 %v4271_v28  ;;  %v1292_v11 = vld [vmem:[%s4584_s6 + $0x1ca8] sm:$0xff]  ;;  %v6225_v17 = vpop.f32.mrf.mxu0 }
 0x392   : > { %v6227_v28 = vpop.f32.mrf.mxu1 }
 0x393   : > { %3043 = vmatpush1.xpose.msra.mxu0 %v1339_v25  ;;  %3143 = vmatpush1.xpose.msra.mxu1 %v1341_v18  ;;  %7323 = vst [vmem:[#allocation15_spill] sm:$0xff] %v6227_v28  ;;  %v1291_v25 = vld [vmem:[%s4584_s6 + $0x1ca0] sm:$0xff]  ;;  %v1293_v18 = vld [vmem:[%s4584_s6 + $0x1cb0] sm:$0xff]  ;;  %v6233_v32 = vpop.f32.mrf.mxu0  ;;  %v1298_v28 = vld [vmem:[%s4584_s6 + $0x1cd8] sm:$0xff] }
 0x394   : > { %3044 = vmatprep.subr.mxu0 %v1316_v60  ;;  %3144 = vmatprep.subr.mxu1 %v1318_v42  ;;  %v1268_v60 = vld [vmem:[%s4584_s6 + $0x1be8] sm:$0xff]  ;;  %v1270_v42 = vld [vmem:[%s4584_s6 + $0x1bf8] sm:$0xff]  ;;  %v6235_v12 = vpop.f32.mrf.mxu1 }
 0x395   : > { %7324 = vst [vmem:[#allocation16_spill] sm:$0xff] %v6235_v12  ;;  %v6241_v13 = vpop.f32.mrf.mxu0 }
 0x396   : > { %7325 = vst [vmem:[#allocation17_spill] sm:$0xff] %v6241_v13  ;;  %v6243_v44 = vpop.f32.mrf.mxu1  ;;  %v1320_v13 = vld [vmem:[%s4584_s6 + $0x1d88] sm:$0xff] }
 0x397   : > { %3045 = vmatpush1.xpose.msra.mxu0 %v1315_v2  ;;  %3145 = vmatpush1.xpose.msra.mxu1 %v1317_v45  ;;  %v1267_v2 = vld [vmem:[%s4584_s6 + $0x1be0] sm:$0xff]  ;;  %v1269_v45 = vld [vmem:[%s4584_s6 + $0x1bf0] sm:$0xff]  ;;  %7326 = vst [vmem:[#allocation18_spill] sm:$0xff] %v6243_v44  ;;  %v6249_v12 = vpop.f32.mrf.mxu0 }
 0x398   : > { %3046 = vmatprep.subr.mxu0 %v1292_v11  ;;  %3146 = vmatprep.subr.mxu1 %v1294_v43  ;;  %v1244_v11 = vld [vmem:[%s4584_s6 + $0x1b28] sm:$0xff]  ;;  %v1246_v43 = vld [vmem:[%s4584_s6 + $0x1b38] sm:$0xff]  ;;  %7327 = vst [vmem:[#allocation19_spill] sm:$0xff] %v6249_v12  ;;  %v6251_v37 = vpop.f32.mrf.mxu1 }
 0x399   : > { %7328 = vst [vmem:[#allocation20_spill] sm:$0xff] %v6251_v37  ;;  %v6257_v44 = vpop.f32.mrf.mxu0 }
 0x39a   : > { %7329 = vst [vmem:[#allocation21_spill] sm:$0xff] %v6257_v44  ;;  %v6259_v16 = vpop.f32.mrf.mxu1 }
 0x39b   : > { %3047 = vmatpush1.xpose.msra.mxu0 %v1291_v25  ;;  %3147 = vmatpush1.xpose.msra.mxu1 %v1293_v18  ;;  %v1243_v25 = vld [vmem:[%s4584_s6 + $0x1b20] sm:$0xff]  ;;  %v1245_v18 = vld [vmem:[%s4584_s6 + $0x1b30] sm:$0xff]  ;;  %7330 = vst [vmem:[#allocation22_spill] sm:$0xff] %v6259_v16  ;;  %v6265_v37 = vpop.f32.mrf.mxu0 }
 0x39c   : > { %3048 = vmatprep.subr.mxu0 %v1268_v60  ;;  %3148 = vmatprep.subr.mxu1 %v1270_v42  ;;  %v1220_v60 = vld [vmem:[%s4584_s6 + $0x1a68] sm:$0xff]  ;;  %v1222_v42 = vld [vmem:[%s4584_s6 + $0x1a78] sm:$0xff]  ;;  %7331 = vst [vmem:[#allocation23_spill] sm:$0xff] %v6265_v37  ;;  %v6267_v12 = vpop.f32.mrf.mxu1 }
 0x39d   : > { %7332 = vst [vmem:[#allocation24_spill] sm:$0xff] %v6267_v12  ;;  %v6273_v16 = vpop.f32.mrf.mxu0  ;;  %v1512_v12 = vld [vmem:[%s4584_s6 + $0x2388] sm:$0xff] }
 0x39e   : > { %7333 = vst [vmem:[#allocation25_spill] sm:$0xff] %v6273_v16  ;;  %v6275_v44 = vpop.f32.mrf.mxu1  ;;  %v1417_v16 = vld [vmem:[%s4584_s6 + $0x2090] sm:$0xff] }
 0x39f   : > { %3049 = vmatpush1.xpose.msra.mxu0 %v1267_v2  ;;  %3149 = vmatpush1.xpose.msra.mxu1 %v1269_v45  ;;  %v1219_v2 = vld [vmem:[%s4584_s6 + $0x1a60] sm:$0xff]  ;;  %v1221_v45 = vld [vmem:[%s4584_s6 + $0x1a70] sm:$0xff]  ;;  %7334 = vst [vmem:[#allocation26_spill] sm:$0xff] %v6275_v44 }
 0x3a0   : > { %3050 = vmatprep.subr.mxu0 %v1244_v11  ;;  %3150 = vmatprep.subr.mxu1 %v1246_v43  ;;  %v1196_v11 = vld [vmem:[%s4584_s6 + $0x19a8] sm:$0xff]  ;;  %v1198_v43 = vld [vmem:[%s4584_s6 + $0x19b8] sm:$0xff]  ;;  %v6283_v37 = vpop.f32.mrf.mxu1  ;;  %v1511_v44 = vld [vmem:[%s4584_s6 + $0x2380] sm:$0xff] }
 0x3a1   : > { %7336 = vst [vmem:[#allocation28_spill] sm:$0xff] %v6283_v37  ;;  %v1441_v37 = vld [vmem:[%s4584_s6 + $0x2150] sm:$0xff] }
 0x3a3   : > { %3051 = vmatpush1.xpose.msra.mxu0 %v1243_v25  ;;  %3151 = vmatpush1.xpose.msra.mxu1 %v1245_v18  ;;  %v1195_v25 = vld [vmem:[%s4584_s6 + $0x19a0] sm:$0xff]  ;;  %v1197_v18 = vld [vmem:[%s4584_s6 + $0x19b0] sm:$0xff] }
 0x3a4   : > { %3052 = vmatprep.subr.mxu0 %v1220_v60  ;;  %3152 = vmatprep.subr.mxu1 %v1222_v42  ;;  %v1172_v60 = vld [vmem:[%s4584_s6 + $0x18e8] sm:$0xff]  ;;  %v1174_v42 = vld [vmem:[%s4584_s6 + $0x18f8] sm:$0xff] }
 0x3a7   : > { %3053 = vmatpush1.xpose.msra.mxu0 %v1219_v2  ;;  %3153 = vmatpush1.xpose.msra.mxu1 %v1221_v45  ;;  %v1171_v2 = vld [vmem:[%s4584_s6 + $0x18e0] sm:$0xff]  ;;  %v1173_v45 = vld [vmem:[%s4584_s6 + $0x18f0] sm:$0xff] }
 0x3a8   : > { %3054 = vmatprep.subr.mxu0 %v1196_v11  ;;  %3154 = vmatprep.subr.mxu1 %v1198_v43  ;;  %v1148_v11 = vld [vmem:[%s4584_s6 + $0x1828] sm:$0xff]  ;;  %v1150_v43 = vld [vmem:[%s4584_s6 + $0x1838] sm:$0xff] }
 0x3ab   : > { %3055 = vmatpush1.xpose.msra.mxu0 %v1195_v25  ;;  %3155 = vmatpush1.xpose.msra.mxu1 %v1197_v18  ;;  %v1147_v25 = vld [vmem:[%s4584_s6 + $0x1820] sm:$0xff]  ;;  %v1149_v18 = vld [vmem:[%s4584_s6 + $0x1830] sm:$0xff] }
 0x3ac   : > { %3056 = vmatprep.subr.mxu0 %v1172_v60  ;;  %3156 = vmatprep.subr.mxu1 %v1174_v42  ;;  %v1514_v60 = vld [vmem:[%s4584_s6 + $0x2398] sm:$0xff]  ;;  %v6281_v42 = vpop.f32.mrf.mxu0 }
 0x3ad   : > { %7335 = vst [vmem:[#allocation27_spill] sm:$0xff] %v6281_v42  ;;  %v4272_v42 = vld [vmem:[%s7303_s0 + $0x20] sm:$0xff] }
 0x3af   : > { %3057 = vmatpush1.xpose.msra.mxu0 %v1171_v2  ;;  %3157 = vmatpush1.xpose.msra.mxu1 %v1173_v45  ;;  %v1513_v2 = vld [vmem:[%s4584_s6 + $0x2390] sm:$0xff]  ;;  %v1488_v45 = vld [vmem:[%s4584_s6 + $0x22c8] sm:$0xff] }
 0x3b0   : > { %3058 = vmatprep.subr.mxu0 %v1148_v11  ;;  %3158 = vmatprep.subr.mxu1 %v1150_v43  ;;  %v6288_v11 = vpop.f32.mrf.mxu0  ;;  %v6290_v43 = vpop.f32.mrf.mxu1 }
 0x3b1   : > { %7337 = vst [vmem:[#allocation29_spill] sm:$0xff] %v6288_v11  ;;  %7338 = vst [vmem:[#allocation30_spill] sm:$0xff] %v6290_v43  ;;  %v1489_v43 = vld [vmem:[%s4584_s6 + $0x22d0] sm:$0xff] }
 0x3b3   : > { %3059 = vmatpush1.xpose.msra.mxu0 %v1147_v25  ;;  %3159 = vmatpush1.xpose.msra.mxu1 %v1149_v18  ;;  %v1490_v25 = vld [vmem:[%s4584_s6 + $0x22d8] sm:$0xff]  ;;  %v4274_v18 = vld [vmem:[%s7303_s0 + $0xe8] sm:$0xff] }
 0x3b4   : > { %3228 = vmatprep.subr.mxu0 %v1512_v12  ;;  %3328 = vmatprep.subr.mxu1 %v1514_v60  ;;  %v4273_v12 = vld [vmem:[%s7303_s0 + $0x30] sm:$0xff]  ;;  %v1487_v60 = vld [vmem:[%s4584_s6 + $0x22c0] sm:$0xff] }
 0x3b6   : > { %3093 = vmatmul.mubr.f32.vlgmr.msra.gmra.mxu0 %v4272_v42  ;;  %3193 = vmatmul.mubr.f32.vlgmr.msra.gmra.mxu1 %v4273_v12  ;;  %v4275_v42 = vld [vmem:[%s7303_s0 + $0xf8] sm:$0xff]  ;;  %v1464_v12 = vld [vmem:[%s4584_s6 + $0x2208] sm:$0xff] }
 0x3b7   : > { %3229 = vmatpush1.xpose.msra.mxu0 %v1511_v44  ;;  %3329 = vmatpush1.xpose.msra.mxu1 %v1513_v2  ;;  %v6308_v44 = vpop.f32.mrf.mxu0  ;;  %v6310_v2 = vpop.f32.mrf.mxu1 }
 0x3b8   : > { %3097 = vmatprep.mubr.f32.mxu0 %v4274_v18  ;;  %3230 = vmatprep.subr.mxu0 %v1488_v45  ;;  %7339 = vst [vmem:[#allocation31_spill] sm:$0xff] %v6308_v44  ;;  %7340 = vst [vmem:[#allocation32_spill] sm:$0xff] %v6310_v2  ;;  %v4276_v45 = vld [vmem:[%s7303_s0 + $0xe0] sm:$0xff]  ;;  %v1466_v18 = vld [vmem:[%s4584_s6 + $0x2218] sm:$0xff] }
 0x3b9   : > { %3330 = vmatprep.subr.mxu1 %v1490_v25  ;;  %3197 = vmatprep.mubr.f32.mxu1 %v4275_v42  ;;  %v4277_v25 = vld [vmem:[%s7303_s0 + $0xf0] sm:$0xff]  ;;  %v4278_v42 = vld [vmem:[%s7303_s0 + $0x1a8] sm:$0xff]  ;;  %v1463_v2 = vld [vmem:[%s4584_s6 + $0x2200] sm:$0xff] }
 0x3ba   : > { %3098 = vmatmul.mubr.f32.gmra.mxu0 %v4276_v45  ;;  %3198 = vmatmul.mubr.f32.gmra.mxu1 %v4277_v25  ;;  %v1465_v44 = vld [vmem:[%s4584_s6 + $0x2210] sm:$0xff]  ;;  %v4279_v45 = vld [vmem:[%s7303_s0 + $0x1b8] sm:$0xff]  ;;  %v1440_v25 = vld [vmem:[%s4584_s6 + $0x2148] sm:$0xff] }
 0x3bb   : > { %3231 = vmatpush1.xpose.msra.mxu0 %v1487_v60  ;;  %3331 = vmatpush1.xpose.msra.mxu1 %v1489_v43  ;;  %v6328_v60 = vpop.f32.mrf.mxu0  ;;  %v6330_v43 = vpop.f32.mrf.mxu1 }
 0x3bc   : > { %3102 = vmatprep.mubr.f32.mxu0 %v4278_v42  ;;  %3232 = vmatprep.subr.mxu0 %v1464_v12  ;;  %7341 = vst [vmem:[#allocation33_spill] sm:$0xff] %v6328_v60  ;;  %7342 = vst [vmem:[#allocation34_spill] sm:$0xff] %v6330_v43  ;;  %v4280_v42 = vld [vmem:[%s7303_s0 + $0x1a0] sm:$0xff]  ;;  %v4281_v12 = vld [vmem:[%s7303_s0 + $0x1b0] sm:$0xff] }
 0x3bd   : > { %3332 = vmatprep.subr.mxu1 %v1466_v18  ;;  %3202 = vmatprep.mubr.f32.mxu1 %v4279_v45  ;;  %v1442_v18 = vld [vmem:[%s4584_s6 + $0x2158] sm:$0xff]  ;;  %v6339_v45 = vpop.f32.mrf.mxu0  ;;  %v6341_v60 = vpop.f32.mrf.mxu1  ;;  %v4282_v43 = vld [vmem:[%s7303_s0 + $0x268] sm:$0xff] }
 0x3be   : > { %3103 = vmatmul.mubr.f32.gmra.mxu0 %v4280_v42  ;;  %3203 = vmatmul.mubr.f32.gmra.mxu1 %v4281_v12  ;;  %7343 = vst [vmem:[#allocation35_spill] sm:$0xff] %v6341_v60  ;;  %v1439_v42 = vld [vmem:[%s4584_s6 + $0x2140] sm:$0xff]  ;;  %v1393_v60 = vld [vmem:[%s4584_s6 + $0x1fd0] sm:$0xff] }
 0x3bf   : > { %3233 = vmatpush1.xpose.msra.mxu0 %v1463_v2  ;;  %3333 = vmatpush1.xpose.msra.mxu1 %v1465_v44  ;;  %v4283_v2 = vld [vmem:[%s7303_s0 + $0x278] sm:$0xff]  ;;  %v1416_v44 = vld [vmem:[%s4584_s6 + $0x2088] sm:$0xff]  ;;  %v4284_v12 = vld [vmem:[%s7303_s0 + $0x260] sm:$0xff]  ;;  %v6361_v11 = vpop.f32.mrf.mxu1 }
 0x3c0   : > { %3107 = vmatprep.mubr.f32.mxu0 %v4282_v43  ;;  %3234 = vmatprep.subr.mxu0 %v1440_v25  ;;  %v4285_v25 = vld [vmem:[%s7303_s0 + $0x270] sm:$0xff]  ;;  %v1418_v43 = vld [vmem:[%s4584_s6 + $0x2098] sm:$0xff]  ;;  %7345 = vst [vmem:[#allocation37_spill] sm:$0xff] %v6361_v11 }
 0x3c1   : > { %3334 = vmatprep.subr.mxu1 %v1442_v18  ;;  %3207 = vmatprep.mubr.f32.mxu1 %v4283_v2  ;;  %v6359_v18 = vpop.f32.mrf.mxu0  ;;  %v4286_v2 = vld [vmem:[%s7303_s0 + $0x328] sm:$0xff]  ;;  %v6381_v11 = vpop.f32.mrf.mxu1 }
 0x3c2   : > { %3108 = vmatmul.mubr.f32.gmra.mxu0 %v4284_v12  ;;  %3208 = vmatmul.mubr.f32.gmra.mxu1 %v4285_v25  ;;  %7344 = vst [vmem:[#allocation36_spill] sm:$0xff] %v6359_v18  ;;  %v1415_v12 = vld [vmem:[%s4584_s6 + $0x2080] sm:$0xff]  ;;  %7347 = vst [vmem:[#allocation39_spill] sm:$0xff] %v6381_v11 }
 0x3c3   : > { %3235 = vmatpush1.xpose.msra.mxu0 %v1439_v42  ;;  %3335 = vmatpush1.xpose.msra.mxu1 %v1441_v37  ;;  %v4287_v42 = vld [vmem:[%s7303_s0 + $0x338] sm:$0xff]  ;;  %v1392_v37 = vld [vmem:[%s4584_s6 + $0x1fc8] sm:$0xff]  ;;  %v4288_v25 = vld [vmem:[%s7303_s0 + $0x320] sm:$0xff]  ;;  %v6401_v11 = vpop.f32.mrf.mxu1 }
 0x3c4   : > { %3112 = vmatprep.mubr.f32.mxu0 %v4286_v2  ;;  %3236 = vmatprep.subr.mxu0 %v1416_v44  ;;  %v4289_v44 = vld [vmem:[%s7303_s0 + $0x330] sm:$0xff]  ;;  %v6379_v2 = vpop.f32.mrf.mxu0  ;;  %7349 = vst [vmem:[#allocation41_spill] sm:$0xff] %v6401_v11  ;;  %v4296_v11 = vld [vmem:[%s7303_s0 + $0x4a0] sm:$0x1] }
 0x3c5   : > { %3336 = vmatprep.subr.mxu1 %v1418_v43  ;;  %3212 = vmatprep.mubr.f32.mxu1 %v4287_v42  ;;  %v1394_v43 = vld [vmem:[%s4584_s6 + $0x1fd8] sm:$0xff]  ;;  %7346 = vst [vmem:[#allocation38_spill] sm:$0xff] %v6379_v2  ;;  %v4290_v42 = vld [vmem:[%s7303_s0 + $0x3e8] sm:$0xff]  ;;  %v1369_v2 = vld [vmem:[%s4584_s6 + $0x1f10] sm:$0xff] }
 0x3c6   : > { %3113 = vmatmul.mubr.f32.gmra.mxu0 %v4288_v25  ;;  %3213 = vmatmul.mubr.f32.gmra.mxu1 %v4289_v44  ;;  %v1391_v25 = vld [vmem:[%s4584_s6 + $0x1fc0] sm:$0xff] }
 0x3c7   : > { %3237 = vmatpush1.xpose.msra.mxu0 %v1415_v12  ;;  %3337 = vmatpush1.xpose.msra.mxu1 %v1417_v16  ;;  %v4291_v12 = vld [vmem:[%s7303_s0 + $0x3f8] sm:$0xff]  ;;  %v1368_v16 = vld [vmem:[%s4584_s6 + $0x1f08] sm:$0xff]  ;;  %v4292_v44 = vld [vmem:[%s7303_s0 + $0x3e0] sm:$0xff] }
 0x3c8   : > { %3117 = vmatprep.mubr.f32.mxu0 %v4290_v42  ;;  %3238 = vmatprep.subr.mxu0 %v1392_v37  ;;  %v4293_v37 = vld [vmem:[%s7303_s0 + $0x3f0] sm:$0xff]  ;;  %v6399_v42 = vpop.f32.mrf.mxu0  ;;  %v6443_v18 = vld [vmem:[%s5088_s5] sm:$0x7]  ;;  %s4199_s5 = smul.u32 168, %s4580_s27 }
 0x3c9   : > { %3338 = vmatprep.subr.mxu1 %v1394_v43  ;;  %3217 = vmatprep.mubr.f32.mxu1 %v4291_v12  ;;  %v1370_v43 = vld [vmem:[%s4584_s6 + $0x1f18] sm:$0xff]  ;;  %7348 = vst [vmem:[#allocation40_spill] sm:$0xff] %v6399_v42  ;;  %v4294_v12 = vld [vmem:[%s7303_s0 + $0x4a8] sm:$0x1]  ;;  %v1345_v42 = vld [vmem:[%s4584_s6 + $0x1e50] sm:$0xff] }
 0x3ca   : > { %3118 = vmatmul.mubr.f32.gmra.mxu0 %v4292_v44  ;;  %3218 = vmatmul.mubr.f32.gmra.mxu1 %v4293_v37  ;;  %v1367_v44 = vld [vmem:[%s4584_s6 + $0x1f00] sm:$0xff]  ;;  %v1346_v37 = vld [vmem:[%s4584_s6 + $0x1e58] sm:$0xff]  ;;  %7354 = vst [vmem:[#allocation46_spill] sm:$0xff] %v6443_v18  ;;  %s6612_s18 = scalar_lea.vmem [#allocation4], %s4199_s5 }
 0x3cb   : > { %3239 = vmatpush1.xpose.msra.mxu0 %v1391_v25  ;;  %3339 = vmatpush1.xpose.msra.mxu1 %v1393_v60  ;;  %v4295_v25 = vld [vmem:[%s7303_s0 + $0x4b8] sm:$0x1]  ;;  %v1344_v60 = vld [vmem:[%s4584_s6 + $0x1e48] sm:$0xff] }
 0x3cc   : > { %3122 = vmatprep.mubr.f32.mxu0 %v4294_v12  ;;  %3240 = vmatprep.subr.mxu0 %v1368_v16  ;;  %v4297_v16 = vld [vmem:[%s7303_s0 + $0x4b0] sm:$0x1]  ;;  %v6421_v12 = vpop.f32.mrf.mxu1 }
 0x3cd   : > { %3340 = vmatprep.subr.mxu1 %v1370_v43  ;;  %3222 = vmatprep.mubr.f32.mxu1 %v4295_v25  ;;  %v6419_v43 = vpop.f32.mrf.mxu0  ;;  %7351 = vst [vmem:[#allocation43_spill] sm:$0xff] %v6421_v12  ;;  %v1343_v25 = vld [vmem:[%s4584_s6 + $0x1e40] sm:$0xff]  ;;  %v1321_v12 = vld [vmem:[%s4584_s6 + $0x1d90] sm:$0xff] }
 0x3ce   : > { %3123 = vmatmul.mubr.f32.gmra.mxu0 %v4296_v11  ;;  %3223 = vmatmul.mubr.f32.gmra.mxu1 %v4297_v16  ;;  %7350 = vst [vmem:[#allocation42_spill] sm:$0xff] %v6419_v43  ;;  %v1322_v11 = vld [vmem:[%s4584_s6 + $0x1d98] sm:$0xff]  ;;  %v6436_v16 = vpop.f32.mrf.mxu1  ;;  %v1296_v43 = vld [vmem:[%s4584_s6 + $0x1cc8] sm:$0xff] }
 0x3cf   : > { %3241 = vmatpush1.xpose.msra.mxu0 %v1367_v44  ;;  %3341 = vmatpush1.xpose.msra.mxu1 %v1369_v2  ;;  %v4298_v44 = vld [vmem:[%s7303_s0 + $0x48] sm:$0xff]  ;;  %v4299_v2 = vld [vmem:[%s7303_s0 + $0x58] sm:$0xff]  ;;  %7353 = vst [vmem:[#allocation45_spill] sm:$0xff] %v6436_v16 }
 0x3d0   : > { %3242 = vmatprep.subr.mxu0 %v1344_v60  ;;  %3342 = vmatprep.subr.mxu1 %v1346_v37  ;;  %v1535_v60 = vsub.s32 1, %v5079_v53  ;;  %v6434_v37 = vpop.f32.mrf.mxu0  ;;  %v1272_v53 = vld [vmem:[%s4584_s6 + $0x1c08] sm:$0xff]  ;;  %v1274_v16 = vld [vmem:[%s4584_s6 + $0x1c18] sm:$0xff] }
 0x3d1   : > { %3292 = vmatprep.mubr.f32.mxu0 %v4298_v44  ;;  %3392 = vmatprep.mubr.f32.mxu1 %v4299_v2  ;;  %7352 = vst [vmem:[#allocation44_spill] sm:$0xff] %v6434_v37  ;;  %v1319_v44 = vld [vmem:[%s4584_s6 + $0x1d80] sm:$0xff] }
 0x3d2   : > { %v1536_v2 = vrot.slane %v6443_v18, %v1535_v60  ;;  %v1250_v18 = vld [vmem:[%s4584_s6 + $0x1b58] sm:$0xff] }
 0x3d3   : > { %3243 = vmatpush1.xpose.msra.mxu0 %v1343_v25  ;;  %3343 = vmatpush1.xpose.msra.mxu1 %v1345_v42  ;;  %v6446_v42 = vpop.f32.mrf.mxu0  ;;  %v6448_v25 = vpop.f32.mrf.mxu1 }
 0x3d4   : > { %3244 = vmatprep.subr.mxu0 %v1320_v13  ;;  %3344 = vmatprep.subr.mxu1 %v1322_v11  ;;  %7355 = vst [vmem:[#allocation47_spill] sm:$0xff] %v6446_v42  ;;  %7356 = vst [vmem:[#allocation48_spill] sm:$0xff] %v6448_v25  ;;  %v1295_v13 = vld [vmem:[%s4584_s6 + $0x1cc0] sm:$0xff]  ;;  %v1297_v11 = vld [vmem:[%s4584_s6 + $0x1cd0] sm:$0xff]  ;;  %v1613_v37 = vadd.f32 %v5103_v8, %v1536_v2  ;;  %v1619_v25 = vadd.f32 %v5116_v20, %v1536_v2 }
 0x3d5   : > { %v6455_v60 = vpop.f32.mrf.mxu0  ;;  %v1226_v42 = vld [vmem:[%s4584_s6 + $0x1a98] sm:$0xff] }
 0x3d6   : > { %7357 = vst [vmem:[#allocation49_spill] sm:$0xff] %v6455_v60  ;;  %v1720_v8 = vadd.f32 %v5105_v9, %v1613_v37  ;;  %v1224_v60 = vld [vmem:[%s4584_s6 + $0x1a88] sm:$0xff]  ;;  %v1726_v20 = vadd.f32 %v5118_v21, %v1619_v25  ;;  %v1625_v9 = vadd.f32 %v5127_v30, %v1536_v2  ;;  %v1631_v37 = vadd.f32 %v5138_v40, %v1536_v2  ;;  %v1202_v25 = vld [vmem:[%s4584_s6 + $0x19d8] sm:$0xff] }
 0x3d7   : > { %3245 = vmatpush1.xpose.msra.mxu0 %v1319_v44  ;;  %3345 = vmatpush1.xpose.msra.mxu1 %v1321_v12  ;;  %v6457_v12 = vpop.f32.mrf.mxu1  ;;  %v1248_v44 = vld [vmem:[%s4584_s6 + $0x1b48] sm:$0xff]  ;;  %v1643_v21 = vadd.f32 %v5160_v61, %v1536_v2 }
 0x3d8   : > { %3246 = vmatprep.subr.mxu0 %v1296_v43  ;;  %3346 = vmatprep.subr.mxu1 %v1298_v28  ;;  %7358 = vst [vmem:[#allocation50_spill] sm:$0xff] %v6457_v12  ;;  %v1271_v43 = vld [vmem:[%s4584_s6 + $0x1c00] sm:$0xff]  ;;  %v1273_v28 = vld [vmem:[%s4584_s6 + $0x1c10] sm:$0xff]  ;;  %v1827_v12 = vadd.f32 %v5364_v0, %v1720_v8  ;;  %v1200_v40 = vld [vmem:[%s4584_s6 + $0x19c8] sm:$0xff] }
 0x3d9   : > { %v1223_v0 = vld [vmem:[%s4584_s6 + $0x1a80] sm:$0xff]  ;;  %v1225_v8 = vld [vmem:[%s4584_s6 + $0x1a90] sm:$0xff] }
 0x3da   : > { %v1934_v30 = vadd.f32 %v5366_v15, %v1827_v12 }
 0x3db   : > { %3247 = vmatpush1.xpose.msra.mxu0 %v1295_v13  ;;  %3347 = vmatpush1.xpose.msra.mxu1 %v1297_v11  ;;  %v6465_v13 = vpop.f32.mrf.mxu0  ;;  %v6467_v11 = vpop.f32.mrf.mxu1 }
 0x3dc   : > { %3248 = vmatprep.subr.mxu0 %v1272_v53  ;;  %3348 = vmatprep.subr.mxu1 %v1274_v16  ;;  %v1247_v53 = vld [vmem:[%s4584_s6 + $0x1b40] sm:$0xff]  ;;  %v1249_v16 = vld [vmem:[%s4584_s6 + $0x1b50] sm:$0xff] }
 0x3df   : > { %3249 = vmatpush1.xpose.msra.mxu0 %v1271_v43  ;;  %3349 = vmatpush1.xpose.msra.mxu1 %v1273_v28  ;;  %v1833_v43 = vadd.f32 %v5375_v26, %v1726_v20  ;;  %v6479_v28 = vpop.f32.mrf.mxu0  ;;  %v1649_v26 = vadd.f32 %v5355_v1, %v1536_v2  ;;  %v1201_v1 = vld [vmem:[%s4584_s6 + $0x19d0] sm:$0xff] }
 0x3e0   : > { %3250 = vmatprep.subr.mxu0 %v1248_v44  ;;  %3350 = vmatprep.subr.mxu1 %v1250_v18  ;;  %v1637_v18 = vadd.f32 %v5149_v50, %v1536_v2  ;;  %v6481_v44 = vpop.f32.mrf.mxu1  ;;  %v1732_v50 = vadd.f32 %v5129_v31, %v1625_v9  ;;  %v1199_v31 = vld [vmem:[%s4584_s6 + $0x19c0] sm:$0xff]  ;;  %v1176_v2 = vld [vmem:[%s4584_s6 + $0x1908] sm:$0xff] }
 0x3e1   : > { %v1940_v15 = vadd.f32 %v5377_v27, %v1833_v43  ;;  %v6496_v12 = vpop.f32.mrf.mxu0  ;;  %v1756_v20 = vadd.f32 %v5357_v3, %v1649_v26  ;;  %v1177_v43 = vld [vmem:[%s4584_s6 + $0x1910] sm:$0xff] }
 0x3e2   : > { %v1744_v61 = vadd.f32 %v5151_v51, %v1637_v18 }
 0x3e3   : > { %3251 = vmatpush1.xpose.msra.mxu0 %v1247_v53  ;;  %3351 = vmatpush1.xpose.msra.mxu1 %v1249_v16  ;;  %v1738_v53 = vadd.f32 %v5140_v41, %v1631_v37  ;;  %v6498_v16 = vpop.f32.mrf.mxu1  ;;  %v1750_v41 = vadd.f32 %v5162_v62, %v1643_v21  ;;  %v2253_v62 = vadd.f32 %v6177_v4, %v5631_v55 }
 0x3e4   : > { %3252 = vmatprep.subr.mxu0 %v1224_v60  ;;  %3352 = vmatprep.subr.mxu1 %v1226_v42  ;;  %v2041_v42 = vadd.f32 %v5625_v10, %v1934_v30  ;;  %v1839_v60 = vadd.f32 %v5386_v38, %v1732_v50  ;;  %v1178_v10 = vld [vmem:[%s4584_s6 + $0x1918] sm:$0xff]  ;;  %v1851_v27 = vadd.f32 %v5408_v5, %v1744_v61 }
 0x3e5   : > { %v1845_v51 = vadd.f32 %v5397_v52, %v1738_v53  ;;  %v2047_v38 = vadd.f32 %v5636_v33, %v1940_v15  ;;  %v1857_v9 = vadd.f32 %v5419_v22, %v1750_v41  ;;  %v1863_v18 = vadd.f32 %v5616_v49, %v1756_v20  ;;  %v6515_v52 = vpop.f32.mrf.mxu0  ;;  %v6517_v5 = vpop.f32.mrf.mxu1  ;;  %v1175_v33 = vld [vmem:[%s4584_s6 + $0x1900] sm:$0xff]  ;;  %v7362_v15 = vld [vmem:[#allocation38_spill] sm:$0xff]  ;;  %v7366_v20 = vld [vmem:[#allocation35_spill] sm:$0xff] }
 0x3e6   : > { %v2148_v37 = vadd.f32 %v5627_v14, %v2041_v42  ;;  %v1946_v3 = vadd.f32 %v5388_v39, %v1839_v60  ;;  %v1152_v14 = vld [vmem:[%s4584_s6 + $0x1848] sm:$0xff]  ;;  %v2259_v49 = vadd.f32 %v6217_v29, %v5642_v24  ;;  %v2360_v30 = vadd.f32 %v6179_v19, %v2253_v62  ;;  %v7359_v53 = vld [vmem:[#allocation36_spill] sm:$0xff]  ;;  %v7369_v62 = vld [vmem:[#allocation19_spill] sm:$0xff] }
 0x3e7   : > { %3253 = vmatpush1.xpose.msra.mxu0 %v1223_v0  ;;  %3353 = vmatpush1.xpose.msra.mxu1 %v1225_v8  ;;  %v1154_v0 = vld [vmem:[%s4584_s6 + $0x1858] sm:$0xff]  ;;  %v1952_v55 = vadd.f32 %v5399_v54, %v1845_v51  ;;  %v2154_v4 = vadd.f32 %v5638_v35, %v2047_v38  ;;  %v1958_v8 = vadd.f32 %v5410_v6, %v1851_v27  ;;  %v1151_v6 = vld [vmem:[%s4584_s6 + $0x1840] sm:$0xff]  ;;  %v7361_v42 = vld [vmem:[#allocation17_spill] sm:$0xff] }
 0x3e8   : > { %3254 = vmatprep.subr.mxu0 %v1200_v40  ;;  %3354 = vmatprep.subr.mxu1 %v1202_v25  ;;  %v2255_v22 = vadd.f32 %v6197_v34, %v2148_v37  ;;  %v2053_v39 = vadd.f32 %v5647_v47, %v1946_v3  ;;  %v1964_v21 = vadd.f32 %v5421_v23, %v1857_v9  ;;  %v6535_v47 = vpop.f32.mrf.mxu0  ;;  %v6537_v40 = vpop.f32.mrf.mxu1  ;;  %v1153_v23 = vld [vmem:[%s4584_s6 + $0x1850] sm:$0xff]  ;;  %v1516_v25 = vld [vmem:[%s4584_s6 + $0x23a8] sm:$0xff]  ;;  %v7368_v37 = vld [vmem:[#allocation8_spill] sm:$0xff] }
 0x3e9   : > { %v1970_v54 = vadd.f32 %v5618_v56, %v1863_v18  ;;  %v2059_v35 = vadd.f32 %v5658_v7, %v1952_v55  ;;  %v2261_v34 = vadd.f32 %v6225_v17, %v2154_v4  ;;  %v2065_v24 = vadd.f32 %v5669_v36, %v1958_v8  ;;  %v1518_v7 = vld [vmem:[%s4584_s6 + $0x23b8] sm:$0xff]  ;;  %v1492_v27 = vld [vmem:[%s4584_s6 + $0x22e8] sm:$0xff]  ;;  %v7367_v38 = vld [vmem:[#allocation14_spill] sm:$0xff] }
 0x3ea   : > { %v2071_v19 = vadd.f32 %v5680_v63, %v1964_v21  ;;  %v2362_v29 = vadd.f32 %v6199_v57, %v2255_v22  ;;  %v2467_v56 = vadd.f32 %v6339_v45, %v2360_v30  ;;  %v2160_v17 = vadd.f32 %v5649_v48, %v2053_v39  ;;  %v7360_v57 = vld [vmem:[#allocation15_spill] sm:$0xff]  ;;  %v6556_v48 = vpop.f32.mrf.mxu0  ;;  %v7370_v18 = vld [vmem:[#allocation40_spill] sm:$0xff]  ;;  %v7373_v30 = vld [vmem:[#allocation18_spill] sm:$0xff] }
 0x3eb   : > { %3255 = vmatpush1.xpose.msra.mxu0 %v1199_v31  ;;  %3355 = vmatpush1.xpose.msra.mxu1 %v1201_v1  ;;  %v2077_v50 = vadd.f32 %v6163_v46, %v1970_v54  ;;  %v2366_v26 = vadd.f32 %v6219_v58, %v2259_v49  ;;  %v2265_v36 = vadd.f32 %v6233_v32, %v5653_v59  ;;  %v6558_v31 = vpop.f32.mrf.mxu1  ;;  %v1515_v46 = vld [vmem:[%s4584_s6 + $0x23a0] sm:$0xff]  ;;  %v1517_v59 = vld [vmem:[%s4584_s6 + $0x23b0] sm:$0xff]  ;;  %v7363_v32 = vld [vmem:[#allocation7_spill] sm:$0xff] }
 0x3ec   : > { %3256 = vmatprep.subr.mxu0 %v1176_v2  ;;  %3356 = vmatprep.subr.mxu1 %v1178_v10  ;;  %v2469_v63 = vadd.f32 %v7359_v53, %v2362_v29  ;;  %v2368_v45 = vadd.f32 %v7360_v57, %v2261_v34  ;;  %v2267_v61 = vadd.f32 %v7361_v42, %v2160_v17  ;;  %v7364_v1 = vld [vmem:[#allocation9_spill] sm:$0xff]  ;;  %v7365_v2 = vld [vmem:[#allocation11_spill] sm:$0xff]  ;;  %v4301_v22 = vld [vmem:[%s7303_s0 + $0x40] sm:$0xff] }
 0x3ed   : > { %v2473_v60 = vadd.f32 %v7362_v15, %v2366_v26  ;;  %v2166_v58 = vadd.f32 %v7363_v32, %v2059_v35  ;;  %v2172_v41 = vadd.f32 %v7364_v1, %v2065_v24  ;;  %v6566_v10 = vadd.f32 %v7365_v2, %v2071_v19  ;;  %v1494_v55 = vld [vmem:[%s4584_s6 + $0x22f8] sm:$0xff]  ;;  %v7371_v4 = vld [vmem:[#allocation16_spill] sm:$0xff]  ;;  %v7372_v49 = vld [vmem:[#allocation37_spill] sm:$0xff] }
 0x3ee   : > { %v2574_v51 = vadd.f32 %v7366_v20, %v2467_v56  ;;  %v6571_v9 = vadd.f32 %v7367_v38, %v2077_v50  ;;  %v2271_v3 = vadd.f32 %v7369_v62, %v7368_v37  ;;  %v2372_v39 = vadd.f32 %v7371_v4, %v2265_v36  ;;  %v7374_v35 = vld [vmem:[#allocation21_spill] sm:$0xff]  ;;  %v1491_v56 = vld [vmem:[%s4584_s6 + $0x22e0] sm:$0xff]  ;;  %v4304_v36 = vld [vmem:[%s7303_s0 + $0x118] sm:$0xff] }
 0x3ef   : > { %3257 = vmatpush1.xpose.msra.mxu0 %v1175_v33  ;;  %3357 = vmatpush1.xpose.msra.mxu1 %v1177_v43  ;;  %v2475_v33 = vadd.f32 %v7370_v18, %v2368_v45  ;;  %v2576_v8 = vadd.f32 %v7372_v49, %v2469_v63  ;;  %v2374_v54 = vadd.f32 %v7373_v30, %v2267_v61  ;;  %v4303_v29 = vld [vmem:[%s7303_s0 + $0x108] sm:$0xff]  ;;  %v7377_v63 = vld [vmem:[#allocation20_spill] sm:$0xff]  ;;  %v7378_v45 = vld [vmem:[#allocation10_spill] sm:$0xff] }
 0x3f0   : > { %3258 = vmatprep.subr.mxu0 %v1152_v14  ;;  %3358 = vmatprep.subr.mxu1 %v1154_v0  ;;  %v4302_v0 = vld [vmem:[%s7303_s0 + $0x50] sm:$0xff]  ;;  %v2273_v34 = vadd.f32 %v7374_v35, %v2166_v58  ;;  %v1468_v53 = vld [vmem:[%s4584_s6 + $0x2228] sm:$0xff]  ;;  %v2378_v57 = vadd.f32 %v7377_v63, %v2271_v3  ;;  %v7379_v42 = vld [vmem:[#allocation23_spill] sm:$0xff] }
 0x3f1   : > { %v2277_v61 = vadd.f32 %v7379_v42, %v7378_v45  ;;  %v7380_v15 = vld [vmem:[#allocation41_spill] sm:$0xff]  ;;  %v4306_v58 = vld [vmem:[%s7303_s0 + $0x110] sm:$0xff]  ;;  %v1470_v1 = vld [vmem:[%s4584_s6 + $0x2238] sm:$0xff] }
 0x3f2   : > { %v7381_v2 = vld [vmem:[#allocation44_spill] sm:$0xff]  ;;  %v7382_v38 = vld [vmem:[#allocation22_spill] sm:$0xff]  ;;  %v7383_v62 = vld [vmem:[#allocation25_spill] sm:$0xff] }
 0x3f3   : > { %3259 = vmatpush1.xpose.msra.mxu0 %v1151_v6  ;;  %3359 = vmatpush1.xpose.msra.mxu1 %v1153_v23  ;;  %v7375_v6 = vld [vmem:[#allocation39_spill] sm:$0xff]  ;;  %v2481_v20 = vadd.f32 %v7381_v2, %v2374_v54  ;;  %v2380_v37 = vadd.f32 %v7382_v38, %v2273_v34  ;;  %v2279_v3 = vadd.f32 %v7383_v62, %v2172_v41  ;;  %v7386_v30 = vld [vmem:[#allocation24_spill] sm:$0xff]  ;;  %v7395_v38 = vld [vmem:[#allocation13_spill] sm:$0xff] }
 0x3f4   : > { %3428 = vmatprep.subr.mxu0 %v1516_v25  ;;  %3528 = vmatprep.subr.mxu1 %v1518_v7  ;;  %v2580_v23 = vadd.f32 %v7375_v6, %v2473_v60  ;;  %v1493_v25 = vld [vmem:[%s4584_s6 + $0x22f0] sm:$0xff]  ;;  %v2582_v60 = vadd.f32 %v7380_v15, %v2475_v33  ;;  %v7384_v18 = vld [vmem:[#allocation47_spill] sm:$0xff]  ;;  %v2384_v54 = vadd.f32 %v7386_v30, %v2277_v61  ;;  %v7387_v35 = vld [vmem:[#allocation12_spill] sm:$0xff] }
 0x3f5   : > { %v7376_v7 = vld [vmem:[#allocation42_spill] sm:$0xff]  ;;  %v2485_v33 = vadd.f32 %v7384_v18, %v2378_v57  ;;  %v7385_v4 = vld [vmem:[#allocation43_spill] sm:$0xff]  ;;  %v7392_v57 = vld [vmem:[#allocation29_spill] sm:$0xff] }
 0x3f6   : > { %v2680_v43 = vpop.f32.mrf.mxu0  ;;  %3293 = vmatmul.mubr.f32.vlgmr.msra.gmra.mxu0 %v4301_v22  ;;  %v2787_v14 = vpop.f32.mrf.mxu1  ;;  %3393 = vmatmul.mubr.f32.vlgmr.msra.gmra.mxu1 %v4302_v0  ;;  %v2479_v17 = vadd.f32 %v7376_v7, %v2372_v39  ;;  %v4307_v22 = vld [vmem:[%s7303_s0 + $0x1c8] sm:$0xff]  ;;  %v1467_v0 = vld [vmem:[%s4584_s6 + $0x2220] sm:$0xff]  ;;  %v4308_v41 = vld [vmem:[%s7303_s0 + $0x1d8] sm:$0xff]  ;;  %v2285_v45 = vadd.f32 %v7392_v57, %v6566_v10 }
 0x3f7   : > { %v2681_v21 = vadd.f32 %v2680_v43, %v2574_v51  ;;  %3429 = vmatpush1.xpose.msra.mxu0 %v1515_v46  ;;  %3529 = vmatpush1.xpose.msra.mxu1 %v1517_v59  ;;  %v4305_v59 = vld [vmem:[%s7303_s0 + $0x100] sm:$0xff]  ;;  %v7388_v34 = vld [vmem:[#allocation27_spill] sm:$0xff] }
 0x3f8   : > { %v2682_v24 = vpop.f32.mrf.mxu0  ;;  %v2789_v19 = vpop.f32.mrf.mxu1  ;;  %3297 = vmatprep.mubr.f32.mxu0 %v4303_v29  ;;  %3430 = vmatprep.subr.mxu0 %v1492_v27  ;;  %v2586_v39 = vadd.f32 %v7385_v4, %v2479_v17  ;;  %v2283_v6 = vadd.f32 %v7388_v34, %v7387_v35  ;;  %v4309_v29 = vld [vmem:[%s7303_s0 + $0x1c0] sm:$0xff]  ;;  %v1446_v7 = vld [vmem:[%s4584_s6 + $0x2178] sm:$0xff]  ;;  %v7390_v17 = vld [vmem:[#allocation45_spill] sm:$0xff] }
 0x3f9   : > { %v2788_v50 = vadd.f32 %v2787_v14, %v2681_v21  ;;  %v2683_v26 = vadd.f32 %v2682_v24, %v2576_v8  ;;  %3530 = vmatprep.subr.mxu1 %v1494_v55  ;;  %3397 = vmatprep.mubr.f32.mxu1 %v4304_v36  ;;  %v1469_v55 = vld [vmem:[%s4584_s6 + $0x2230] sm:$0xff]  ;;  %v1444_v21 = vld [vmem:[%s4584_s6 + $0x2168] sm:$0xff]  ;;  %v7393_v42 = vld [vmem:[#allocation48_spill] sm:$0xff] }
 0x3fa   : > { %v2686_v46 = vpop.f32.mrf.mxu0  ;;  %3298 = vmatmul.mubr.f32.gmra.mxu0 %v4305_v59  ;;  %v2793_v32 = vpop.f32.mrf.mxu1  ;;  %3398 = vmatmul.mubr.f32.gmra.mxu1 %v4306_v58  ;;  %v2592_v61 = vadd.f32 %v7393_v42, %v2485_v33  ;;  %v1443_v59 = vld [vmem:[%s4584_s6 + $0x2160] sm:$0xff]  ;;  %v2491_v58 = vadd.f32 %v6465_v13, %v2384_v54  ;;  %v4312_v10 = vld [vmem:[%s7303_s0 + $0x298] sm:$0xff]  ;;  %v4315_v54 = vld [vmem:[%s7303_s0 + $0x348] sm:$0xff] }
 0x3fb   : > { %4028 = vst [vmem:[%s6612_s18] sm:$0xff] %v2788_v50  ;;  %v2790_v51 = vadd.f32 %v2789_v19, %v2683_v26  ;;  %v2687_v27 = vadd.f32 %v2686_v46, %v2580_v23  ;;  %3431 = vmatpush1.xpose.msra.mxu0 %v1491_v56  ;;  %3531 = vmatpush1.xpose.msra.mxu1 %v1493_v25  ;;  %v7389_v23 = vld [vmem:[#allocation49_spill] sm:$0xff]  ;;  %v4310_v25 = vld [vmem:[%s7303_s0 + $0x1d0] sm:$0xff]  ;;  %v4313_v33 = vld [vmem:[%s7303_s0 + $0x280] sm:$0xff] }
 0x3fc   : > { %v2688_v43 = vpop.f32.mrf.mxu0  ;;  %3302 = vmatprep.mubr.f32.mxu0 %v4307_v22  ;;  %v2795_v14 = vpop.f32.mrf.mxu1  ;;  %3432 = vmatprep.subr.mxu0 %v1468_v53  ;;  %v2487_v24 = vadd.f32 %v7389_v23, %v2380_v37  ;;  %v2588_v50 = vadd.f32 %v7390_v17, %v2481_v20  ;;  %v7391_v53 = vld [vmem:[#allocation26_spill] sm:$0xff]  ;;  %v1420_v20 = vld [vmem:[%s4584_s6 + $0x20a8] sm:$0xff]  ;;  %v7396_v37 = vld [vmem:[#allocation31_spill] sm:$0xff] }
 0x3fd   : > { %4029 = vst [vmem:[%s6612_s18 + $0x8] sm:$0xff] %v2790_v51  ;;  %v2689_v49 = vadd.f32 %v2688_v43, %v2582_v60  ;;  %v2794_v8 = vadd.f32 %v2793_v32, %v2687_v27  ;;  %3532 = vmatprep.subr.mxu1 %v1470_v1  ;;  %3402 = vmatprep.mubr.f32.mxu1 %v4308_v41  ;;  %v4311_v60 = vld [vmem:[%s7303_s0 + $0x288] sm:$0xff]  ;;  %v1445_v32 = vld [vmem:[%s4584_s6 + $0x2170] sm:$0xff]  ;;  %v7394_v51 = vld [vmem:[#allocation28_spill] sm:$0xff] }
 0x3fe   : > { %v2692_v19 = vpop.f32.mrf.mxu0  ;;  %3303 = vmatmul.mubr.f32.gmra.mxu0 %v4309_v29  ;;  %v2799_v56 = vpop.f32.mrf.mxu1  ;;  %3403 = vmatmul.mubr.f32.gmra.mxu1 %v4310_v25  ;;  %v2386_v63 = vadd.f32 %v7391_v53, %v2279_v3  ;;  %v2390_v27 = vadd.f32 %v7394_v51, %v2283_v6  ;;  %v2289_v62 = vadd.f32 %v7396_v37, %v7395_v38  ;;  %v7397_v3 = vld [vmem:[#allocation50_spill] sm:$0xff]  ;;  %v1419_v35 = vld [vmem:[%s4584_s6 + $0x20a0] sm:$0xff]  ;;  %v4319_v42 = vld [vmem:[%s7303_s0 + $0x408] sm:$0xff] }
 0x3ff   : > { %4031 = vst [vmem:[%s6612_s18 + $0x18] sm:$0xff] %v2794_v8  ;;  %v2693_v26 = vadd.f32 %v2692_v19, %v2586_v39  ;;  %v2796_v36 = vadd.f32 %v2795_v14, %v2689_v49  ;;  %3433 = vmatpush1.xpose.msra.mxu0 %v1467_v0  ;;  %3533 = vmatpush1.xpose.msra.mxu1 %v1469_v55  ;;  %v4314_v22 = vld [vmem:[%s7303_s0 + $0x290] sm:$0xff]  ;;  %v1422_v14 = vld [vmem:[%s4584_s6 + $0x20b8] sm:$0xff]  ;;  %v7399_v8 = vld [vmem:[#allocation33_spill] sm:$0xff] }
 0x400   : > { %v2694_v15 = vpop.f32.mrf.mxu0  ;;  %3307 = vmatprep.mubr.f32.mxu0 %v4311_v60  ;;  %v2801_v46 = vpop.f32.mrf.mxu1  ;;  %3434 = vmatprep.subr.mxu0 %v1444_v21  ;;  %v2594_v18 = vadd.f32 %v7397_v3, %v2487_v24  ;;  %v2493_v0 = vadd.f32 %v6479_v28, %v2386_v63  ;;  %v7398_v39 = vld [vmem:[#allocation30_spill] sm:$0xff]  ;;  %v2291_v41 = vadd.f32 %v7399_v8, %v6571_v9  ;;  %v1396_v24 = vld [vmem:[%s4584_s6 + $0x1fe8] sm:$0xff]  ;;  %v7400_v19 = vld [vmem:[#allocation32_spill] sm:$0xff] }
 0x401   : > { %4032 = vst [vmem:[%s6612_s18 + $0x20] sm:$0xff] %v2796_v36  ;;  %v2695_v1 = vadd.f32 %v2694_v15, %v2588_v50  ;;  %v2800_v2 = vadd.f32 %v2799_v56, %v2693_v26  ;;  %3534 = vmatprep.subr.mxu1 %v1446_v7  ;;  %3407 = vmatprep.mubr.f32.mxu1 %v4312_v10  ;;  %v1421_v34 = vld [vmem:[%s4584_s6 + $0x20b0] sm:$0xff]  ;;  %v1398_v50 = vld [vmem:[%s4584_s6 + $0x1ff8] sm:$0xff]  ;;  %v4323_v37 = vld [vmem:[%s7303_s0 + $0x4c8] sm:$0x1] }
 0x402   : > { %v2698_v13 = vpop.f32.mrf.mxu0  ;;  %3308 = vmatmul.mubr.f32.gmra.mxu0 %v4313_v33  ;;  %v2805_v43 = vpop.f32.mrf.mxu1  ;;  %3408 = vmatmul.mubr.f32.gmra.mxu1 %v4314_v22  ;;  %v2392_v49 = vadd.f32 %v7398_v39, %v2285_v45  ;;  %v2497_v21 = vadd.f32 %v6496_v12, %v2390_v27  ;;  %v2598_v6 = vadd.f32 %v6467_v11, %v2491_v58  ;;  %v4316_v12 = vld [vmem:[%s7303_s0 + $0x358] sm:$0xff]  ;;  %v4317_v11 = vld [vmem:[%s7303_s0 + $0x340] sm:$0xff]  ;;  %v4318_v17 = vld [vmem:[%s7303_s0 + $0x350] sm:$0xff] }
 0x403   : > { %4034 = vst [vmem:[%s6612_s18 + $0x30] sm:$0xff] %v2800_v2  ;;  %v2699_v55 = vadd.f32 %v2698_v13, %v2592_v61  ;;  %v2802_v4 = vadd.f32 %v2801_v46, %v2695_v1  ;;  %3435 = vmatpush1.xpose.msra.mxu0 %v1443_v59  ;;  %3535 = vmatpush1.xpose.msra.mxu1 %v1445_v32  ;;  %v7401_v53 = vld [vmem:[#allocation34_spill] sm:$0xff]  ;;  %v1372_v32 = vld [vmem:[%s4584_s6 + $0x1f28] sm:$0xff]  ;;  %v4321_v2 = vld [vmem:[%s7303_s0 + $0x400] sm:$0xff] }
 0x404   : > { %v2700_v30 = vpop.f32.mrf.mxu0  ;;  %3312 = vmatprep.mubr.f32.mxu0 %v4315_v54  ;;  %v2807_v28 = vpop.f32.mrf.mxu1  ;;  %3436 = vmatprep.subr.mxu0 %v1420_v20  ;;  %v2396_v29 = vadd.f32 %v7400_v19, %v2289_v62  ;;  %v2499_v56 = vadd.f32 %v6515_v52, %v2392_v49  ;;  %v2600_v26 = vadd.f32 %v6481_v44, %v2493_v0  ;;  %v1395_v44 = vld [vmem:[%s4584_s6 + $0x1fe0] sm:$0xff]  ;;  %v1397_v15 = vld [vmem:[%s4584_s6 + $0x1ff0] sm:$0xff]  ;;  %v1374_v20 = vld [vmem:[%s4584_s6 + $0x1f38] sm:$0xff] }
 0x405   : > { %4035 = vst [vmem:[%s6612_s18 + $0x38] sm:$0xff] %v2802_v4  ;;  %v2701_v23 = vadd.f32 %v2700_v30, %v2594_v18  ;;  %v2806_v9 = vadd.f32 %v2805_v43, %v2699_v55  ;;  %3536 = vmatprep.subr.mxu1 %v1422_v14  ;;  %3412 = vmatprep.mubr.f32.mxu1 %v4316_v12  ;;  %v4322_v10 = vld [vmem:[%s7303_s0 + $0x410] sm:$0xff]  ;;  %v1371_v3 = vld [vmem:[%s4584_s6 + $0x1f20] sm:$0xff]  ;;  %v4324_v43 = vld [vmem:[%s7303_s0 + $0x4d8] sm:$0x1] }
 0x406   : > { %v2704_v25 = vpop.f32.mrf.mxu0  ;;  %3313 = vmatmul.mubr.f32.gmra.mxu0 %v4317_v11  ;;  %v2811_v7 = vpop.f32.mrf.mxu1  ;;  %3413 = vmatmul.mubr.f32.gmra.mxu1 %v4318_v17  ;;  %v2398_v63 = vadd.f32 %v7401_v53, %v2291_v41  ;;  %v2604_v57 = vadd.f32 %v6498_v16, %v2497_v21  ;;  %v2503_v60 = vadd.f32 %v6535_v47, %v2396_v29  ;;  %v4320_v16 = vld [vmem:[%s7303_s0 + $0x418] sm:$0xff]  ;;  %v1373_v18 = vld [vmem:[%s4584_s6 + $0x1f30] sm:$0xff]  ;;  %v1348_v22 = vld [vmem:[%s4584_s6 + $0x1e68] sm:$0xff] }
 0x407   : > { %4037 = vst [vmem:[%s6612_s18 + $0x48] sm:$0xff] %v2806_v9  ;;  %v2705_v52 = vadd.f32 %v2704_v25, %v2598_v6  ;;  %v2808_v36 = vadd.f32 %v2807_v28, %v2701_v23  ;;  %3437 = vmatpush1.xpose.msra.mxu0 %v1419_v35  ;;  %3537 = vmatpush1.xpose.msra.mxu1 %v1421_v34  ;;  %v1350_v14 = vld [vmem:[%s4584_s6 + $0x1e78] sm:$0xff]  ;;  %v4325_v55 = vld [vmem:[%s7303_s0 + $0x4c0] sm:$0x1]  ;;  %v4326_v4 = vld [vmem:[%s7303_s0 + $0x4d0] sm:$0x1] }
 0x408   : > { %v2706_v45 = vpop.f32.mrf.mxu0  ;;  %3317 = vmatprep.mubr.f32.mxu0 %v4319_v42  ;;  %v2813_v61 = vpop.f32.mrf.mxu1  ;;  %3438 = vmatprep.subr.mxu0 %v1396_v24  ;;  %v2606_v58 = vadd.f32 %v6517_v5, %v2499_v56  ;;  %v2505_v51 = vadd.f32 %v6556_v48, %v2398_v63  ;;  %v2610_v13 = vadd.f32 %v6537_v40, %v2503_v60  ;;  %v1347_v30 = vld [vmem:[%s4584_s6 + $0x1e60] sm:$0xff]  ;;  %v1349_v54 = vld [vmem:[%s4584_s6 + $0x1e70] sm:$0xff]  ;;  %v1326_v34 = vld [vmem:[%s4584_s6 + $0x1db8] sm:$0xff] }
 0x409   : > { %4038 = vst [vmem:[%s6612_s18 + $0x50] sm:$0xff] %v2808_v36  ;;  %v2707_v46 = vadd.f32 %v2706_v45, %v2600_v26  ;;  %v2812_v59 = vadd.f32 %v2811_v7, %v2705_v52  ;;  %3538 = vmatprep.subr.mxu1 %v1398_v50  ;;  %3417 = vmatprep.mubr.f32.mxu1 %v4320_v16  ;;  %v4327_v6 = vld [vmem:[%s7303_s0 + $0x68] sm:$0xff]  ;;  %v4328_v23 = vld [vmem:[%s7303_s0 + $0x78] sm:$0xff]  ;;  %v1323_v12 = vld [vmem:[%s4584_s6 + $0x1da0] sm:$0xff] }
 0x40a   : > { %v2710_v1 = vpop.f32.mrf.mxu0  ;;  %3318 = vmatmul.mubr.f32.gmra.mxu0 %v4321_v2  ;;  %v2817_v47 = vpop.f32.mrf.mxu1  ;;  %3418 = vmatmul.mubr.f32.gmra.mxu1 %v4322_v10  ;;  %v2612_v39 = vadd.f32 %v6558_v31, %v2505_v51  ;;  %v1324_v31 = vld [vmem:[%s4584_s6 + $0x1da8] sm:$0xff]  ;;  %v1325_v24 = vld [vmem:[%s4584_s6 + $0x1db0] sm:$0xff]  ;;  %v1302_v29 = vld [vmem:[%s4584_s6 + $0x1cf8] sm:$0xff] }
 0x40b   : > { %4040 = vst [vmem:[%s6612_s18 + $0x60] sm:$0xff] %v2812_v59  ;;  %v2711_v5 = vadd.f32 %v2710_v1, %v2604_v57  ;;  %v2814_v27 = vadd.f32 %v2813_v61, %v2707_v46  ;;  %3439 = vmatpush1.xpose.msra.mxu0 %v1395_v44  ;;  %3539 = vmatpush1.xpose.msra.mxu1 %v1397_v15  ;;  %v1300_v19 = vld [vmem:[%s4584_s6 + $0x1ce8] sm:$0xff]  ;;  %v1299_v56 = vld [vmem:[%s4584_s6 + $0x1ce0] sm:$0xff]  ;;  %v1301_v25 = vld [vmem:[%s4584_s6 + $0x1cf0] sm:$0xff] }
 0x40c   : > { %v2712_v38 = vpop.f32.mrf.mxu0  ;;  %3322 = vmatprep.mubr.f32.mxu0 %v4323_v37  ;;  %v2819_v62 = vpop.f32.mrf.mxu1  ;;  %3440 = vmatprep.subr.mxu0 %v1372_v32  ;;  %v1276_v11 = vld [vmem:[%s4584_s6 + $0x1c28] sm:$0xff]  ;;  %v1278_v7 = vld [vmem:[%s4584_s6 + $0x1c38] sm:$0xff]  ;;  %v1275_v17 = vld [vmem:[%s4584_s6 + $0x1c20] sm:$0xff] }
 0x40d   : > { %4041 = vst [vmem:[%s6612_s18 + $0x68] sm:$0xff] %v2814_v27  ;;  %v2713_v48 = vadd.f32 %v2712_v38, %v2606_v58  ;;  %v2818_v33 = vadd.f32 %v2817_v47, %v2711_v5  ;;  %3540 = vmatprep.subr.mxu1 %v1374_v20  ;;  %3422 = vmatprep.mubr.f32.mxu1 %v4324_v43  ;;  %v1277_v50 = vld [vmem:[%s4584_s6 + $0x1c30] sm:$0xff]  ;;  %v1252_v26 = vld [vmem:[%s4584_s6 + $0x1b68] sm:$0xff]  ;;  %v1254_v52 = vld [vmem:[%s4584_s6 + $0x1b78] sm:$0xff] }
 0x40e   : > { %v2716_v0 = vpop.f32.mrf.mxu0  ;;  %3323 = vmatmul.mubr.f32.gmra.mxu0 %v4325_v55  ;;  %v2823_v40 = vpop.f32.mrf.mxu1  ;;  %3423 = vmatmul.mubr.f32.gmra.mxu1 %v4326_v4  ;;  %v1251_v36 = vld [vmem:[%s4584_s6 + $0x1b60] sm:$0xff]  ;;  %v1253_v53 = vld [vmem:[%s4584_s6 + $0x1b70] sm:$0xff]  ;;  %v1228_v63 = vld [vmem:[%s4584_s6 + $0x1aa8] sm:$0xff] }
 0x40f   : > { %4043 = vst [vmem:[%s6612_s18 + $0x78] sm:$0xff] %v2818_v33  ;;  %v2717_v49 = vadd.f32 %v2716_v0, %v2610_v13  ;;  %v2820_v8 = vadd.f32 %v2819_v62, %v2713_v48  ;;  %3441 = vmatpush1.xpose.msra.mxu0 %v1371_v3  ;;  %3541 = vmatpush1.xpose.msra.mxu1 %v1373_v18  ;;  %v1230_v57 = vld [vmem:[%s4584_s6 + $0x1ab8] sm:$0xff]  ;;  %v1227_v45 = vld [vmem:[%s4584_s6 + $0x1aa0] sm:$0xff]  ;;  %v1229_v42 = vld [vmem:[%s4584_s6 + $0x1ab0] sm:$0xff] }
 0x410   : > { %v2718_v41 = vpop.f32.mrf.mxu0  ;;  %v2825_v21 = vpop.f32.mrf.mxu1  ;;  %3442 = vmatprep.subr.mxu0 %v1348_v22  ;;  %3542 = vmatprep.subr.mxu1 %v1350_v14  ;;  %v1204_v61 = vld [vmem:[%s4584_s6 + $0x19e8] sm:$0xff]  ;;  %v1206_v44 = vld [vmem:[%s4584_s6 + $0x19f8] sm:$0xff]  ;;  %v1203_v15 = vld [vmem:[%s4584_s6 + $0x19e0] sm:$0xff] }
 0x411   : > { %4044 = vst [vmem:[%s6612_s18 + $0x80] sm:$0xff] %v2820_v8  ;;  %v2719_v28 = vadd.f32 %v2718_v41, %v2612_v39  ;;  %v2824_v35 = vadd.f32 %v2823_v40, %v2717_v49  ;;  %3492 = vmatprep.mubr.f32.mxu0 %v4327_v6  ;;  %3592 = vmatprep.mubr.f32.mxu1 %v4328_v23  ;;  %v1205_v60 = vld [vmem:[%s4584_s6 + $0x19f0] sm:$0xff]  ;;  %v1180_v46 = vld [vmem:[%s4584_s6 + $0x1928] sm:$0xff]  ;;  %v1182_v59 = vld [vmem:[%s4584_s6 + $0x1938] sm:$0xff] }
 0x412   : > { %v1179_v16 = vld [vmem:[%s4584_s6 + $0x1920] sm:$0xff]  ;;  %v1181_v32 = vld [vmem:[%s4584_s6 + $0x1930] sm:$0xff]  ;;  %v1156_v58 = vld [vmem:[%s4584_s6 + $0x1868] sm:$0xff] }
 0x413   : > { %4046 = vst [vmem:[%s6612_s18 + $0x90] sm:$0x1] %v2824_v35  ;;  %v2826_v9 = vadd.f32 %v2825_v21, %v2719_v28  ;;  %3443 = vmatpush1.xpose.msra.mxu0 %v1347_v30  ;;  %3543 = vmatpush1.xpose.msra.mxu1 %v1349_v54  ;;  %v1158_v1 = vld [vmem:[%s4584_s6 + $0x1878] sm:$0xff]  ;;  %v7402_v2 = vld [vmem:[#allocation6_spill] sm:$0xff]  ;;  %v1155_v10 = vld [vmem:[%s4584_s6 + $0x1860] sm:$0xff] }
 0x414   : > { %3444 = vmatprep.subr.mxu0 %v1324_v31  ;;  %3544 = vmatprep.subr.mxu1 %v1326_v34  ;;  %v1539_v47 = vsub.s32 2, %v7402_v2  ;;  %v1157_v20 = vld [vmem:[%s4584_s6 + $0x1870] sm:$0xff]  ;;  %v1520_v51 = vld [vmem:[%s4584_s6 + $0x23c8] sm:$0xff]  ;;  %v1522_v5 = vld [vmem:[%s4584_s6 + $0x23d8] sm:$0xff] }
 0x415   : > { %4047 = vst [vmem:[%s6612_s18 + $0x98] sm:$0x1] %v2826_v9  ;;  %v7403_v27 = vld [vmem:[#allocation46_spill] sm:$0xff]  ;;  %v1519_v37 = vld [vmem:[%s4584_s6 + $0x23c0] sm:$0xff]  ;;  %v1496_v3 = vld [vmem:[%s4584_s6 + $0x2308] sm:$0xff] }
 0x416   : > { %v6786_v38 = vrot.slane %v7403_v27, %v1539_v47  ;;  %v1521_v62 = vld [vmem:[%s4584_s6 + $0x23d0] sm:$0xff]  ;;  %v4329_v13 = vld [vmem:[%s7303_s0 + $0x60] sm:$0xff]  ;;  %v1498_v43 = vld [vmem:[%s4584_s6 + $0x2318] sm:$0xff] }
 0x417   : > { %3445 = vmatpush1.xpose.msra.mxu0 %v1323_v12  ;;  %3545 = vmatpush1.xpose.msra.mxu1 %v1325_v24  ;;  %v4330_v33 = vld [vmem:[%s7303_s0 + $0x70] sm:$0xff]  ;;  %v4331_v55 = vld [vmem:[%s7303_s0 + $0x128] sm:$0xff]  ;;  %v1495_v40 = vld [vmem:[%s4584_s6 + $0x2300] sm:$0xff] }
 0x418   : > { %3446 = vmatprep.subr.mxu0 %v1300_v19  ;;  %3546 = vmatprep.subr.mxu1 %v1302_v29  ;;  %v1497_v4 = vld [vmem:[%s4584_s6 + $0x2310] sm:$0xff]  ;;  %v4332_v49 = vld [vmem:[%s7303_s0 + $0x138] sm:$0xff]  ;;  %v1472_v8 = vld [vmem:[%s4584_s6 + $0x2248] sm:$0xff] }
 0x419   : > { %v4333_v41 = vld [vmem:[%s7303_s0 + $0x120] sm:$0xff]  ;;  %v4334_v21 = vld [vmem:[%s7303_s0 + $0x130] sm:$0xff]  ;;  %v1474_v30 = vld [vmem:[%s4584_s6 + $0x2258] sm:$0xff] }
 0x41a   : > { %v4335_v31 = vld [vmem:[%s7303_s0 + $0x1e8] sm:$0xff]  ;;  %v1471_v34 = vld [vmem:[%s4584_s6 + $0x2240] sm:$0xff]  ;;  %v1473_v6 = vld [vmem:[%s4584_s6 + $0x2250] sm:$0xff] }
 0x41b   : > { %3447 = vmatpush1.xpose.msra.mxu0 %v1299_v56  ;;  %3547 = vmatpush1.xpose.msra.mxu1 %v1301_v25  ;;  %v4336_v12 = vld [vmem:[%s7303_s0 + $0x1f8] sm:$0xff]  ;;  %v1448_v24 = vld [vmem:[%s4584_s6 + $0x2188] sm:$0xff]  ;;  %v4337_v29 = vld [vmem:[%s7303_s0 + $0x1e0] sm:$0xff] }
 0x41c   : > { %3448 = vmatprep.subr.mxu0 %v1276_v11  ;;  %3548 = vmatprep.subr.mxu1 %v1278_v7  ;;  %v4338_v56 = vld [vmem:[%s7303_s0 + $0x1f0] sm:$0xff]  ;;  %v1450_v25 = vld [vmem:[%s4584_s6 + $0x2198] sm:$0xff]  ;;  %v1400_v47 = vld [vmem:[%s4584_s6 + $0x2008] sm:$0xff] }
 0x41d   : > { %v4344_v2 = vld [vmem:[%s7303_s0 + $0x378] sm:$0xff] }
 0x41f   : > { %3449 = vmatpush1.xpose.msra.mxu0 %v1275_v17  ;;  %3549 = vmatpush1.xpose.msra.mxu1 %v1277_v50  ;;  %v4339_v50 = vld [vmem:[%s7303_s0 + $0x2a8] sm:$0xff] }
 0x420   : > { %3450 = vmatprep.subr.mxu0 %v1252_v26  ;;  %3550 = vmatprep.subr.mxu1 %v1254_v52  ;;  %v1447_v26 = vld [vmem:[%s4584_s6 + $0x2180] sm:$0xff]  ;;  %v1449_v52 = vld [vmem:[%s4584_s6 + $0x2190] sm:$0xff] }
 0x423   : > { %3451 = vmatpush1.xpose.msra.mxu0 %v1251_v36  ;;  %3551 = vmatpush1.xpose.msra.mxu1 %v1253_v53 }
 0x424   : > { %3452 = vmatprep.subr.mxu0 %v1228_v63  ;;  %3552 = vmatprep.subr.mxu1 %v1230_v57  ;;  %v4340_v63 = vld [vmem:[%s7303_s0 + $0x2b8] sm:$0xff]  ;;  %v1424_v57 = vld [vmem:[%s4584_s6 + $0x20c8] sm:$0xff] }
 0x427   : > { %3453 = vmatpush1.xpose.msra.mxu0 %v1227_v45  ;;  %3553 = vmatpush1.xpose.msra.mxu1 %v1229_v42  ;;  %v4341_v42 = vld [vmem:[%s7303_s0 + $0x2a0] sm:$0xff] }
 0x428   : > { %3454 = vmatprep.subr.mxu0 %v1204_v61  ;;  %3554 = vmatprep.subr.mxu1 %v1206_v44  ;;  %v4342_v61 = vld [vmem:[%s7303_s0 + $0x2b0] sm:$0xff]  ;;  %v1426_v44 = vld [vmem:[%s4584_s6 + $0x20d8] sm:$0xff] }
 0x42b   : > { %3455 = vmatpush1.xpose.msra.mxu0 %v1203_v15  ;;  %3555 = vmatpush1.xpose.msra.mxu1 %v1205_v60 }
 0x42c   : > { %3456 = vmatprep.subr.mxu0 %v1180_v46  ;;  %3556 = vmatprep.subr.mxu1 %v1182_v59  ;;  %v4343_v59 = vld [vmem:[%s7303_s0 + $0x368] sm:$0xff] }
 0x42f   : > { %3457 = vmatpush1.xpose.msra.mxu0 %v1179_v16  ;;  %3557 = vmatpush1.xpose.msra.mxu1 %v1181_v32  ;;  %v1423_v16 = vld [vmem:[%s4584_s6 + $0x20c0] sm:$0xff]  ;;  %v1425_v32 = vld [vmem:[%s4584_s6 + $0x20d0] sm:$0xff] }
 0x430   : > { %3458 = vmatprep.subr.mxu0 %v1156_v58  ;;  %3558 = vmatprep.subr.mxu1 %v1158_v1 }
 0x433   : > { %3459 = vmatpush1.xpose.msra.mxu0 %v1155_v10  ;;  %3559 = vmatpush1.xpose.msra.mxu1 %v1157_v20  ;;  %v4345_v20 = vld [vmem:[%s7303_s0 + $0x360] sm:$0xff] }
 0x434   : > { %3628 = vmatprep.subr.mxu0 %v1520_v51  ;;  %3728 = vmatprep.subr.mxu1 %v1522_v5  ;;  %v4346_v51 = vld [vmem:[%s7303_s0 + $0x370] sm:$0xff]  ;;  %v1402_v5 = vld [vmem:[%s4584_s6 + $0x2018] sm:$0xff] }
 0x436   : > { %v2894_v18 = vpop.f32.mrf.mxu0  ;;  %3493 = vmatmul.mubr.f32.vlgmr.msra.gmra.mxu0 %v4329_v13  ;;  %v2994_v48 = vpop.f32.mrf.mxu1  ;;  %3593 = vmatmul.mubr.f32.vlgmr.msra.gmra.mxu1 %v4330_v33  ;;  %v1401_v13 = vld [vmem:[%s4584_s6 + $0x2010] sm:$0xff] }
 0x437   : > { %v2895_v22 = vadd.f32 %v2894_v18, %v6786_v38  ;;  %3629 = vmatpush1.xpose.msra.mxu0 %v1519_v37  ;;  %3729 = vmatpush1.xpose.msra.mxu1 %v1521_v62  ;;  %v1399_v18 = vld [vmem:[%s4584_s6 + $0x2000] sm:$0xff] }
 0x438   : > { %v2896_v14 = vpop.f32.mrf.mxu0  ;;  %v2996_v0 = vpop.f32.mrf.mxu1  ;;  %3497 = vmatprep.mubr.f32.mxu0 %v4331_v55  ;;  %3630 = vmatprep.subr.mxu0 %v1496_v3  ;;  %v4347_v3 = vld [vmem:[%s7303_s0 + $0x428] sm:$0xff]  ;;  %v4350_v55 = vld [vmem:[%s7303_s0 + $0x430] sm:$0xff] }
 0x439   : > { %v6804_v39 = vadd.f32 %v2994_v48, %v2895_v22  ;;  %3730 = vmatprep.subr.mxu1 %v1498_v43  ;;  %3597 = vmatprep.mubr.f32.mxu1 %v4332_v49  ;;  %v4348_v43 = vld [vmem:[%s7303_s0 + $0x438] sm:$0xff]  ;;  %v1376_v22 = vld [vmem:[%s4584_s6 + $0x1f48] sm:$0xff]  ;;  %v4349_v0 = vld [vmem:[%s7303_s0 + $0x420] sm:$0xff] }
 0x43a   : > { %3498 = vmatmul.mubr.f32.gmra.mxu0 %v4333_v41  ;;  %3598 = vmatmul.mubr.f32.gmra.mxu1 %v4334_v21  ;;  %v2899_v54 = vpop.f32.mrf.mxu0  ;;  %v2999_v28 = vpop.f32.mrf.mxu1  ;;  %v4351_v41 = vld [vmem:[%s7303_s0 + $0x4e8] sm:$0x1]  ;;  %v1375_v21 = vld [vmem:[%s4584_s6 + $0x1f40] sm:$0xff] }
 0x43b   : > { %3631 = vmatpush1.xpose.msra.mxu0 %v1495_v40  ;;  %3731 = vmatpush1.xpose.msra.mxu1 %v1497_v4  ;;  %v2900_v35 = vadd.f32 %v2899_v54, %v6786_v38  ;;  %v1378_v40 = vld [vmem:[%s4584_s6 + $0x1f58] sm:$0xff] }
 0x43c   : > { %3502 = vmatprep.mubr.f32.mxu0 %v4335_v31  ;;  %3632 = vmatprep.subr.mxu0 %v1472_v8  ;;  %v2901_v23 = vpop.f32.mrf.mxu0  ;;  %v3001_v9 = vpop.f32.mrf.mxu1  ;;  %v1352_v31 = vld [vmem:[%s4584_s6 + $0x1e88] sm:$0xff] }
 0x43d   : > { %3732 = vmatprep.subr.mxu1 %v1474_v30  ;;  %3602 = vmatprep.mubr.f32.mxu1 %v4336_v12  ;;  %v6827_v19 = vadd.f32 %v2999_v28, %v2900_v35  ;;  %v1377_v30 = vld [vmem:[%s4584_s6 + $0x1f50] sm:$0xff]  ;;  %v4352_v35 = vld [vmem:[%s7303_s0 + $0x4f8] sm:$0x1]  ;;  %v4353_v23 = vld [vmem:[%s7303_s0 + $0x4e0] sm:$0x1] }
 0x43e   : > { %3503 = vmatmul.mubr.f32.gmra.mxu0 %v4337_v29  ;;  %3603 = vmatmul.mubr.f32.gmra.mxu1 %v4338_v56  ;;  %v2904_v11 = vpop.f32.mrf.mxu0  ;;  %v3004_v7 = vpop.f32.mrf.mxu1  ;;  %v4354_v9 = vld [vmem:[%s7303_s0 + $0x4f0] sm:$0x1]  ;;  %v1351_v56 = vld [vmem:[%s4584_s6 + $0x1e80] sm:$0xff] }
 0x43f   : > { %3633 = vmatpush1.xpose.msra.mxu0 %v1471_v34  ;;  %3733 = vmatpush1.xpose.msra.mxu1 %v1473_v6  ;;  %v2905_v17 = vadd.f32 %v2904_v11, %v6786_v38  ;;  %v1354_v34 = vld [vmem:[%s4584_s6 + $0x1e98] sm:$0xff] }
 0x440   : > { %3507 = vmatprep.mubr.f32.mxu0 %v4339_v50  ;;  %3634 = vmatprep.subr.mxu0 %v1448_v24  ;;  %v2906_v36 = vpop.f32.mrf.mxu0  ;;  %v3006_v53 = vpop.f32.mrf.mxu1  ;;  %v1330_v50 = vld [vmem:[%s4584_s6 + $0x1dd8] sm:$0xff] }
 0x441   : > { %3734 = vmatprep.subr.mxu1 %v1450_v25  ;;  %3607 = vmatprep.mubr.f32.mxu1 %v4340_v63  ;;  %v6846_v45 = vadd.f32 %v3004_v7, %v2905_v17  ;;  %v1353_v25 = vld [vmem:[%s4584_s6 + $0x1e90] sm:$0xff]  ;;  %v1328_v17 = vld [vmem:[%s4584_s6 + $0x1dc8] sm:$0xff]  ;;  %v1327_v36 = vld [vmem:[%s4584_s6 + $0x1dc0] sm:$0xff] }
 0x442   : > { %3508 = vmatmul.mubr.f32.gmra.mxu0 %v4341_v42  ;;  %3608 = vmatmul.mubr.f32.gmra.mxu1 %v4342_v61  ;;  %v2909_v15 = vpop.f32.mrf.mxu0  ;;  %v3009_v60 = vpop.f32.mrf.mxu1  ;;  %v1329_v53 = vld [vmem:[%s4584_s6 + $0x1dd0] sm:$0xff]  ;;  %v1304_v63 = vld [vmem:[%s4584_s6 + $0x1d08] sm:$0xff]  ;;  %v1303_v42 = vld [vmem:[%s4584_s6 + $0x1d00] sm:$0xff] }
 0x443   : > { %3635 = vmatpush1.xpose.msra.mxu0 %v1447_v26  ;;  %3735 = vmatpush1.xpose.msra.mxu1 %v1449_v52  ;;  %v2910_v46 = vadd.f32 %v2909_v15, %v6786_v38  ;;  %v4355_v52 = vld [vmem:[%s7303_s0 + $0x88] sm:$0xff]  ;;  %v1305_v61 = vld [vmem:[%s4584_s6 + $0x1d10] sm:$0xff]  ;;  %v1282_v15 = vld [vmem:[%s4584_s6 + $0x1c58] sm:$0xff] }
 0x444   : > { %3512 = vmatprep.mubr.f32.mxu0 %v4343_v59  ;;  %3636 = vmatprep.subr.mxu0 %v1424_v57  ;;  %v2911_v58 = vpop.f32.mrf.mxu0  ;;  %v3011_v1 = vpop.f32.mrf.mxu1  ;;  %v1306_v57 = vld [vmem:[%s4584_s6 + $0x1d18] sm:$0xff]  ;;  %v1256_v59 = vld [vmem:[%s4584_s6 + $0x1b88] sm:$0xff] }
 0x445   : > { %3736 = vmatprep.subr.mxu1 %v1426_v44  ;;  %3612 = vmatprep.mubr.f32.mxu1 %v4344_v2  ;;  %v6865_v10 = vadd.f32 %v3009_v60, %v2910_v46  ;;  %v1280_v44 = vld [vmem:[%s4584_s6 + $0x1c48] sm:$0xff]  ;;  %v1279_v60 = vld [vmem:[%s4584_s6 + $0x1c40] sm:$0xff]  ;;  %v1281_v46 = vld [vmem:[%s4584_s6 + $0x1c50] sm:$0xff] }
 0x446   : > { %3513 = vmatmul.mubr.f32.gmra.mxu0 %v4345_v20  ;;  %3613 = vmatmul.mubr.f32.gmra.mxu1 %v4346_v51  ;;  %v2914_v27 = vpop.f32.mrf.mxu0  ;;  %v3014_v37 = vpop.f32.mrf.mxu1  ;;  %v1257_v58 = vld [vmem:[%s4584_s6 + $0x1b90] sm:$0xff]  ;;  %v1232_v1 = vld [vmem:[%s4584_s6 + $0x1ac8] sm:$0xff]  ;;  %v1234_v2 = vld [vmem:[%s4584_s6 + $0x1ad8] sm:$0xff] }
 0x447   : > { %3637 = vmatpush1.xpose.msra.mxu0 %v1423_v16  ;;  %3737 = vmatpush1.xpose.msra.mxu1 %v1425_v32  ;;  %v2915_v62 = vadd.f32 %v2914_v27, %v6786_v38  ;;  %v1258_v16 = vld [vmem:[%s4584_s6 + $0x1b98] sm:$0xff]  ;;  %v1255_v32 = vld [vmem:[%s4584_s6 + $0x1b80] sm:$0xff]  ;;  %v1233_v20 = vld [vmem:[%s4584_s6 + $0x1ad0] sm:$0xff] }
 0x448   : > { %3517 = vmatprep.mubr.f32.mxu0 %v4347_v3  ;;  %3638 = vmatprep.subr.mxu0 %v1400_v47  ;;  %v2916_v48 = vpop.f32.mrf.mxu0  ;;  %v3016_v33 = vpop.f32.mrf.mxu1  ;;  %v1231_v47 = vld [vmem:[%s4584_s6 + $0x1ac0] sm:$0xff]  ;;  %v1208_v51 = vld [vmem:[%s4584_s6 + $0x1a08] sm:$0xff]  ;;  %v1186_v3 = vld [vmem:[%s4584_s6 + $0x1958] sm:$0xff] }
 0x449   : > { %3738 = vmatprep.subr.mxu1 %v1402_v5  ;;  %3617 = vmatprep.mubr.f32.mxu1 %v4348_v43  ;;  %v6884_v14 = vadd.f32 %v3014_v37, %v2915_v62  ;;  %v1210_v5 = vld [vmem:[%s4584_s6 + $0x1a18] sm:$0xff]  ;;  %v1207_v27 = vld [vmem:[%s4584_s6 + $0x1a00] sm:$0xff]  ;;  %v1209_v37 = vld [vmem:[%s4584_s6 + $0x1a10] sm:$0xff] }
 0x44a   : > { %3518 = vmatmul.mubr.f32.gmra.mxu0 %v4349_v0  ;;  %3618 = vmatmul.mubr.f32.gmra.mxu1 %v4350_v55  ;;  %v2919_v4 = vpop.f32.mrf.mxu0  ;;  %v3019_v49 = vpop.f32.mrf.mxu1  ;;  %v1184_v62 = vld [vmem:[%s4584_s6 + $0x1948] sm:$0xff]  ;;  %v1162_v33 = vld [vmem:[%s4584_s6 + $0x1898] sm:$0xff]  ;;  %v1159_v43 = vld [vmem:[%s4584_s6 + $0x1880] sm:$0xff] }
 0x44b   : > { %3639 = vmatpush1.xpose.msra.mxu0 %v1399_v18  ;;  %3739 = vmatpush1.xpose.msra.mxu1 %v1401_v13  ;;  %v2920_v8 = vadd.f32 %v2919_v4, %v6786_v38  ;;  %v1183_v18 = vld [vmem:[%s4584_s6 + $0x1940] sm:$0xff]  ;;  %v1185_v13 = vld [vmem:[%s4584_s6 + $0x1950] sm:$0xff]  ;;  %v1160_v48 = vld [vmem:[%s4584_s6 + $0x1888] sm:$0xff] }
 0x44c   : > { %3522 = vmatprep.mubr.f32.mxu0 %v4351_v41  ;;  %3640 = vmatprep.subr.mxu0 %v1376_v22  ;;  %v2921_v54 = vpop.f32.mrf.mxu0  ;;  %v3021_v28 = vpop.f32.mrf.mxu1  ;;  %v1161_v22 = vld [vmem:[%s4584_s6 + $0x1890] sm:$0xff]  ;;  %v1524_v0 = vld [vmem:[%s4584_s6 + $0x23e8] sm:$0xff]  ;;  %v1526_v55 = vld [vmem:[%s4584_s6 + $0x23f8] sm:$0xff] }
 0x44d   : > { %3740 = vmatprep.subr.mxu1 %v1378_v40  ;;  %3622 = vmatprep.mubr.f32.mxu1 %v4352_v35  ;;  %v6904_v6 = vadd.f32 %v3019_v49, %v2920_v8  ;;  %v1523_v40 = vld [vmem:[%s4584_s6 + $0x23e0] sm:$0xff]  ;;  %v1525_v4 = vld [vmem:[%s4584_s6 + $0x23f0] sm:$0xff]  ;;  %v1500_v49 = vld [vmem:[%s4584_s6 + $0x2328] sm:$0xff] }
 0x44e   : > { %3523 = vmatmul.mubr.f32.gmra.mxu0 %v4353_v23  ;;  %3623 = vmatmul.mubr.f32.gmra.mxu1 %v4354_v9  ;;  %v2924_v12 = vpop.f32.mrf.mxu0  ;;  %v3024_v24 = vpop.f32.mrf.mxu1  ;;  %v4357_v41 = vld [vmem:[%s7303_s0 + $0x80] sm:$0xff]  ;;  %v1502_v54 = vld [vmem:[%s4584_s6 + $0x2338] sm:$0xff]  ;;  %v1501_v9 = vld [vmem:[%s4584_s6 + $0x2330] sm:$0xff] }
 0x44f   : > { %3641 = vmatpush1.xpose.msra.mxu0 %v1375_v21  ;;  %3741 = vmatpush1.xpose.msra.mxu1 %v1377_v30  ;;  %v2925_v29 = vadd.f32 %v2924_v12, %v6786_v38  ;;  %v4356_v38 = vld [vmem:[%s7303_s0 + $0x98] sm:$0xff]  ;;  %v4358_v30 = vld [vmem:[%s7303_s0 + $0x90] sm:$0xff]  ;;  %v1499_v23 = vld [vmem:[%s4584_s6 + $0x2320] sm:$0xff] }
 0x450   : > { %3642 = vmatprep.subr.mxu0 %v1352_v31  ;;  %3742 = vmatprep.subr.mxu1 %v1354_v34  ;;  %v2926_v11 = vpop.f32.mrf.mxu0  ;;  %v3026_v7 = vpop.f32.mrf.mxu1  ;;  %v4359_v34 = vld [vmem:[%s7303_s0 + $0x148] sm:$0xff] }
 0x451   : > { %v6917_v26 = vadd.f32 %v3024_v24, %v2925_v29  ;;  %3692 = vmatprep.mubr.f32.mxu0 %v4355_v52  ;;  %3792 = vmatprep.mubr.f32.mxu1 %v4356_v38  ;;  %v1476_v24 = vld [vmem:[%s4584_s6 + $0x2268] sm:$0xff]  ;;  %v4362_v11 = vld [vmem:[%s7303_s0 + $0x150] sm:$0xff]  ;;  %v1478_v7 = vld [vmem:[%s4584_s6 + $0x2278] sm:$0xff] }
 0x452   : > { %v4363_v52 = vld [vmem:[%s7303_s0 + $0x208] sm:$0xff] }
 0x453   : > { %3643 = vmatpush1.xpose.msra.mxu0 %v1351_v56  ;;  %3743 = vmatpush1.xpose.msra.mxu1 %v1353_v25  ;;  %v4361_v56 = vld [vmem:[%s7303_s0 + $0x140] sm:$0xff] }
 0x454   : > { %3644 = vmatprep.subr.mxu0 %v1328_v17  ;;  %3744 = vmatprep.subr.mxu1 %v1330_v50 }
 0x457   : > { %3645 = vmatpush1.xpose.msra.mxu0 %v1327_v36  ;;  %3745 = vmatpush1.xpose.msra.mxu1 %v1329_v53  ;;  %v1475_v36 = vld [vmem:[%s4584_s6 + $0x2260] sm:$0xff]  ;;  %v1477_v53 = vld [vmem:[%s4584_s6 + $0x2270] sm:$0xff] }
 0x458   : > { %3646 = vmatprep.subr.mxu0 %v1304_v63  ;;  %3746 = vmatprep.subr.mxu1 %v1306_v57  ;;  %v1452_v57 = vld [vmem:[%s4584_s6 + $0x21a8] sm:$0xff] }
 0x45b   : > { %3647 = vmatpush1.xpose.msra.mxu0 %v1303_v42  ;;  %3747 = vmatpush1.xpose.msra.mxu1 %v1305_v61  ;;  %v4365_v61 = vld [vmem:[%s7303_s0 + $0x200] sm:$0xff] }
 0x45c   : > { %3648 = vmatprep.subr.mxu0 %v1280_v44  ;;  %3748 = vmatprep.subr.mxu1 %v1282_v15  ;;  %v4366_v15 = vld [vmem:[%s7303_s0 + $0x210] sm:$0xff] }
 0x45f   : > { %3649 = vmatpush1.xpose.msra.mxu0 %v1279_v60  ;;  %3749 = vmatpush1.xpose.msra.mxu1 %v1281_v46  ;;  %v1454_v60 = vld [vmem:[%s4584_s6 + $0x21b8] sm:$0xff] }
 0x460   : > { %3650 = vmatprep.subr.mxu0 %v1256_v59  ;;  %3750 = vmatprep.subr.mxu1 %v1258_v16  ;;  %v4367_v16 = vld [vmem:[%s7303_s0 + $0x2c8] sm:$0xff] }
 0x463   : > { %3651 = vmatpush1.xpose.msra.mxu0 %v1255_v32  ;;  %3751 = vmatpush1.xpose.msra.mxu1 %v1257_v58  ;;  %v1451_v58 = vld [vmem:[%s4584_s6 + $0x21a0] sm:$0xff] }
 0x464   : > { %3652 = vmatprep.subr.mxu0 %v1232_v1  ;;  %3752 = vmatprep.subr.mxu1 %v1234_v2  ;;  %v1453_v1 = vld [vmem:[%s4584_s6 + $0x21b0] sm:$0xff] }
 0x467   : > { %3653 = vmatpush1.xpose.msra.mxu0 %v1231_v47  ;;  %3753 = vmatpush1.xpose.msra.mxu1 %v1233_v20  ;;  %v1428_v47 = vld [vmem:[%s4584_s6 + $0x20e8] sm:$0xff] }
 0x468   : > { %3654 = vmatprep.subr.mxu0 %v1208_v51  ;;  %3754 = vmatprep.subr.mxu1 %v1210_v5  ;;  %v4369_v51 = vld [vmem:[%s7303_s0 + $0x2c0] sm:$0xff] }
 0x46b   : > { %3655 = vmatpush1.xpose.msra.mxu0 %v1207_v27  ;;  %3755 = vmatpush1.xpose.msra.mxu1 %v1209_v37  ;;  %v4370_v27 = vld [vmem:[%s7303_s0 + $0x2d0] sm:$0xff]  ;;  %v1430_v37 = vld [vmem:[%s4584_s6 + $0x20f8] sm:$0xff] }
 0x46c   : > { %3656 = vmatprep.subr.mxu0 %v1184_v62  ;;  %3756 = vmatprep.subr.mxu1 %v1186_v3 }
 0x46f   : > { %3657 = vmatpush1.xpose.msra.mxu0 %v1183_v18  ;;  %3757 = vmatpush1.xpose.msra.mxu1 %v1185_v13  ;;  %v4371_v18 = vld [vmem:[%s7303_s0 + $0x388] sm:$0xff] }
 0x470   : > { %3658 = vmatprep.subr.mxu0 %v1160_v48  ;;  %3758 = vmatprep.subr.mxu1 %v1162_v33  ;;  %v1427_v48 = vld [vmem:[%s4584_s6 + $0x20e0] sm:$0xff]  ;;  %v1429_v33 = vld [vmem:[%s4584_s6 + $0x20f0] sm:$0xff] }
 0x473   : > { %3659 = vmatpush1.xpose.msra.mxu0 %v1159_v43  ;;  %3759 = vmatpush1.xpose.msra.mxu1 %v1161_v22  ;;  %v1404_v22 = vld [vmem:[%s4584_s6 + $0x2028] sm:$0xff] }
 0x474   : > { %3828 = vmatprep.subr.mxu0 %v1524_v0  ;;  %3928 = vmatprep.subr.mxu1 %v1526_v55  ;;  %v4373_v55 = vld [vmem:[%s7303_s0 + $0x380] sm:$0xff] }
 0x476   : > { %v3094_v8 = vpop.f32.mrf.mxu0  ;;  %3693 = vmatmul.mubr.f32.vlgmr.msra.gmra.mxu0 %v4357_v41  ;;  %v3194_v21 = vpop.f32.mrf.mxu1  ;;  %3793 = vmatmul.mubr.f32.vlgmr.msra.gmra.mxu1 %v4358_v30 }
 0x477   : > { %v3095_v28 = vadd.f32 %v3094_v8, %v6804_v39  ;;  %3829 = vmatpush1.xpose.msra.mxu0 %v1523_v40  ;;  %3929 = vmatpush1.xpose.msra.mxu1 %v1525_v4  ;;  %v4360_v39 = vld [vmem:[%s7303_s0 + $0x158] sm:$0xff]  ;;  %v4374_v4 = vld [vmem:[%s7303_s0 + $0x390] sm:$0xff] }
 0x478   : > { %v3096_v35 = vpop.f32.mrf.mxu0  ;;  %v3196_v31 = vpop.f32.mrf.mxu1  ;;  %3697 = vmatprep.mubr.f32.mxu0 %v4359_v34  ;;  %3830 = vmatprep.subr.mxu0 %v1500_v49  ;;  %v1406_v49 = vld [vmem:[%s4584_s6 + $0x2038] sm:$0xff] }
 0x479   : > { %v6973_v12 = vadd.f32 %v3194_v21, %v3095_v28  ;;  %3930 = vmatprep.subr.mxu1 %v1502_v54  ;;  %3797 = vmatprep.mubr.f32.mxu1 %v4360_v39  ;;  %v4375_v21 = vld [vmem:[%s7303_s0 + $0x448] sm:$0xff]  ;;  %v1403_v54 = vld [vmem:[%s4584_s6 + $0x2020] sm:$0xff]  ;;  %v1405_v28 = vld [vmem:[%s4584_s6 + $0x2030] sm:$0xff] }
 0x47a   : > { %v3099_v29 = vpop.f32.mrf.mxu0  ;;  %3698 = vmatmul.mubr.f32.gmra.mxu0 %v4361_v56  ;;  %v3199_v25 = vpop.f32.mrf.mxu1  ;;  %3798 = vmatmul.mubr.f32.gmra.mxu1 %v4362_v11  ;;  %v1380_v31 = vld [vmem:[%s4584_s6 + $0x1f68] sm:$0xff]  ;;  %v4378_v39 = vld [vmem:[%s7303_s0 + $0x450] sm:$0xff] }
 0x47b   : > { %v3100_v17 = vadd.f32 %v3099_v29, %v6827_v19  ;;  %3831 = vmatpush1.xpose.msra.mxu0 %v1499_v23  ;;  %3931 = vmatpush1.xpose.msra.mxu1 %v1501_v9  ;;  %v4364_v19 = vld [vmem:[%s7303_s0 + $0x218] sm:$0xff]  ;;  %v4377_v23 = vld [vmem:[%s7303_s0 + $0x440] sm:$0xff] }
 0x47c   : > { %v3101_v50 = vpop.f32.mrf.mxu0  ;;  %3702 = vmatprep.mubr.f32.mxu0 %v4363_v52  ;;  %v3201_v38 = vpop.f32.mrf.mxu1  ;;  %3832 = vmatprep.subr.mxu0 %v1476_v24  ;;  %v1382_v24 = vld [vmem:[%s4584_s6 + $0x1f78] sm:$0xff]  ;;  %v1356_v52 = vld [vmem:[%s4584_s6 + $0x1ea8] sm:$0xff] }
 0x47d   : > { %v6992_v63 = vadd.f32 %v3199_v25, %v3100_v17  ;;  %3932 = vmatprep.subr.mxu1 %v1478_v7  ;;  %3802 = vmatprep.mubr.f32.mxu1 %v4364_v19  ;;  %v4379_v25 = vld [vmem:[%s7303_s0 + $0x508] sm:$0x1]  ;;  %v1379_v7 = vld [vmem:[%s4584_s6 + $0x1f60] sm:$0xff]  ;;  %v1381_v17 = vld [vmem:[%s4584_s6 + $0x1f70] sm:$0xff] }
 0x47e   : > { %v3104_v42 = vpop.f32.mrf.mxu0  ;;  %3703 = vmatmul.mubr.f32.gmra.mxu0 %v4365_v61  ;;  %v3204_v44 = vpop.f32.mrf.mxu1  ;;  %3803 = vmatmul.mubr.f32.gmra.mxu1 %v4366_v15  ;;  %v1358_v38 = vld [vmem:[%s4584_s6 + $0x1eb8] sm:$0xff]  ;;  %v1355_v61 = vld [vmem:[%s4584_s6 + $0x1ea0] sm:$0xff] }
 0x47f   : > { %v3105_v46 = vadd.f32 %v3104_v42, %v6846_v45  ;;  %3833 = vmatpush1.xpose.msra.mxu0 %v1475_v36  ;;  %3933 = vmatpush1.xpose.msra.mxu1 %v1477_v53  ;;  %v4368_v45 = vld [vmem:[%s7303_s0 + $0x2d8] sm:$0xff]  ;;  %v4381_v53 = vld [vmem:[%s7303_s0 + $0x500] sm:$0x1] }
 0x480   : > { %v3106_v59 = vpop.f32.mrf.mxu0  ;;  %3707 = vmatprep.mubr.f32.mxu0 %v4367_v16  ;;  %v3206_v32 = vpop.f32.mrf.mxu1  ;;  %3834 = vmatprep.subr.mxu0 %v1452_v57  ;;  %v4382_v57 = vld [vmem:[%s7303_s0 + $0x510] sm:$0x1]  ;;  %v1334_v16 = vld [vmem:[%s4584_s6 + $0x1df8] sm:$0xff] }
 0x481   : > { %v7011_v2 = vadd.f32 %v3204_v44, %v3105_v46  ;;  %3934 = vmatprep.subr.mxu1 %v1454_v60  ;;  %3807 = vmatprep.mubr.f32.mxu1 %v4368_v45  ;;  %v1357_v44 = vld [vmem:[%s4584_s6 + $0x1eb0] sm:$0xff]  ;;  %v1332_v59 = vld [vmem:[%s4584_s6 + $0x1de8] sm:$0xff]  ;;  %v4384_v32 = vld [vmem:[%s7303_s0 + $0xb8] sm:$0xff] }
 0x482   : > { %v3109_v20 = vpop.f32.mrf.mxu0  ;;  %3708 = vmatmul.mubr.f32.gmra.mxu0 %v4369_v51  ;;  %v3209_v5 = vpop.f32.mrf.mxu1  ;;  %3808 = vmatmul.mubr.f32.gmra.mxu1 %v4370_v27  ;;  %v1308_v45 = vld [vmem:[%s4584_s6 + $0x1d28] sm:$0xff]  ;;  %v1309_v51 = vld [vmem:[%s4584_s6 + $0x1d30] sm:$0xff]  ;;  %v1286_v27 = vld [vmem:[%s4584_s6 + $0x1c78] sm:$0xff] }
 0x483   : > { %v3110_v62 = vadd.f32 %v3109_v20, %v6865_v10  ;;  %3835 = vmatpush1.xpose.msra.mxu0 %v1451_v58  ;;  %3935 = vmatpush1.xpose.msra.mxu1 %v1453_v1  ;;  %v4372_v10 = vld [vmem:[%s7303_s0 + $0x398] sm:$0xff]  ;;  %v1331_v58 = vld [vmem:[%s4584_s6 + $0x1de0] sm:$0xff]  ;;  %v1333_v1 = vld [vmem:[%s4584_s6 + $0x1df0] sm:$0xff] }
 0x484   : > { %v3111_v3 = vpop.f32.mrf.mxu0  ;;  %3712 = vmatprep.mubr.f32.mxu0 %v4371_v18  ;;  %v3211_v13 = vpop.f32.mrf.mxu1  ;;  %3836 = vmatprep.subr.mxu0 %v1428_v47  ;;  %v1310_v47 = vld [vmem:[%s4584_s6 + $0x1d38] sm:$0xff]  ;;  %v1307_v20 = vld [vmem:[%s4584_s6 + $0x1d20] sm:$0xff] }
 0x485   : > { %v7030_v43 = vadd.f32 %v3209_v5, %v3110_v62  ;;  %3936 = vmatprep.subr.mxu1 %v1430_v37  ;;  %3812 = vmatprep.mubr.f32.mxu1 %v4372_v10  ;;  %v1284_v5 = vld [vmem:[%s4584_s6 + $0x1c68] sm:$0xff]  ;;  %v1283_v37 = vld [vmem:[%s4584_s6 + $0x1c60] sm:$0xff]  ;;  %v1285_v62 = vld [vmem:[%s4584_s6 + $0x1c70] sm:$0xff] }
 0x486   : > { %v3114_v0 = vpop.f32.mrf.mxu0  ;;  %3713 = vmatmul.mubr.f32.gmra.mxu0 %v4373_v55  ;;  %v3214_v40 = vpop.f32.mrf.mxu1  ;;  %3813 = vmatmul.mubr.f32.gmra.mxu1 %v4374_v4  ;;  %v1260_v3 = vld [vmem:[%s4584_s6 + $0x1ba8] sm:$0xff]  ;;  %v1262_v18 = vld [vmem:[%s4584_s6 + $0x1bb8] sm:$0xff]  ;;  %v1259_v13 = vld [vmem:[%s4584_s6 + $0x1ba0] sm:$0xff] }
 0x487   : > { %v3115_v8 = vadd.f32 %v3114_v0, %v6884_v14  ;;  %3837 = vmatpush1.xpose.msra.mxu0 %v1427_v48  ;;  %3937 = vmatpush1.xpose.msra.mxu1 %v1429_v33  ;;  %v4376_v14 = vld [vmem:[%s7303_s0 + $0x458] sm:$0xff]  ;;  %v1261_v48 = vld [vmem:[%s4584_s6 + $0x1bb0] sm:$0xff]  ;;  %v1236_v33 = vld [vmem:[%s4584_s6 + $0x1ae8] sm:$0xff] }
 0x488   : > { %v3116_v41 = vpop.f32.mrf.mxu0  ;;  %3717 = vmatprep.mubr.f32.mxu0 %v4375_v21  ;;  %v3216_v30 = vpop.f32.mrf.mxu1  ;;  %3838 = vmatprep.subr.mxu0 %v1404_v22  ;;  %v1238_v10 = vld [vmem:[%s4584_s6 + $0x1af8] sm:$0xff]  ;;  %v1235_v22 = vld [vmem:[%s4584_s6 + $0x1ae0] sm:$0xff]  ;;  %v1237_v0 = vld [vmem:[%s4584_s6 + $0x1af0] sm:$0xff] }
 0x489   : > { %v7049_v35 = vadd.f32 %v3214_v40, %v3115_v8  ;;  %3938 = vmatprep.subr.mxu1 %v1406_v49  ;;  %3817 = vmatprep.mubr.f32.mxu1 %v4376_v14  ;;  %v1212_v55 = vld [vmem:[%s4584_s6 + $0x1a28] sm:$0xff]  ;;  %v1214_v40 = vld [vmem:[%s4584_s6 + $0x1a38] sm:$0xff]  ;;  %v1211_v4 = vld [vmem:[%s4584_s6 + $0x1a20] sm:$0xff] }
 0x48a   : > { %v3119_v34 = vpop.f32.mrf.mxu0  ;;  %3718 = vmatmul.mubr.f32.gmra.mxu0 %v4377_v23  ;;  %v3219_v9 = vpop.f32.mrf.mxu1  ;;  %3818 = vmatmul.mubr.f32.gmra.mxu1 %v4378_v39  ;;  %v1213_v49 = vld [vmem:[%s4584_s6 + $0x1a30] sm:$0xff]  ;;  %v1188_v8 = vld [vmem:[%s4584_s6 + $0x1968] sm:$0xff]  ;;  %v1190_v41 = vld [vmem:[%s4584_s6 + $0x1978] sm:$0xff] }
 0x48b   : > { %v3120_v29 = vadd.f32 %v3119_v34, %v6904_v6  ;;  %3839 = vmatpush1.xpose.msra.mxu0 %v1403_v54  ;;  %3939 = vmatpush1.xpose.msra.mxu1 %v1405_v28  ;;  %v4380_v6 = vld [vmem:[%s7303_s0 + $0x518] sm:$0x1]  ;;  %v1187_v21 = vld [vmem:[%s4584_s6 + $0x1960] sm:$0xff]  ;;  %v1189_v30 = vld [vmem:[%s4584_s6 + $0x1970] sm:$0xff] }
 0x48c   : > { %v3121_v56 = vpop.f32.mrf.mxu0  ;;  %3722 = vmatprep.mubr.f32.mxu0 %v4379_v25  ;;  %v3221_v11 = vpop.f32.mrf.mxu1  ;;  %3840 = vmatprep.subr.mxu0 %v1380_v31  ;;  %v1164_v54 = vld [vmem:[%s4584_s6 + $0x18a8] sm:$0xff]  ;;  %v1166_v28 = vld [vmem:[%s4584_s6 + $0x18b8] sm:$0xff]  ;;  %v1163_v14 = vld [vmem:[%s4584_s6 + $0x18a0] sm:$0xff] }
 0x48d   : > { %v7068_v50 = vadd.f32 %v3219_v9, %v3120_v29  ;;  %3940 = vmatprep.subr.mxu1 %v1382_v24  ;;  %3822 = vmatprep.mubr.f32.mxu1 %v4380_v6  ;;  %v1165_v31 = vld [vmem:[%s4584_s6 + $0x18b0] sm:$0xff]  ;;  %v4385_v23 = vld [vmem:[%s7303_s0 + $0xa0] sm:$0xff]  ;;  %v4387_v29 = vld [vmem:[%s7303_s0 + $0x168] sm:$0xff] }
 0x48e   : > { %v3124_v36 = vpop.f32.mrf.mxu0  ;;  %3723 = vmatmul.mubr.f32.gmra.mxu0 %v4381_v53  ;;  %v3224_v19 = vpop.f32.mrf.mxu1  ;;  %3823 = vmatmul.mubr.f32.gmra.mxu1 %v4382_v57  ;;  %v4386_v9 = vld [vmem:[%s7303_s0 + $0xb0] sm:$0xff]  ;;  %v4388_v56 = vld [vmem:[%s7303_s0 + $0x178] sm:$0xff]  ;;  %v4389_v6 = vld [vmem:[%s7303_s0 + $0x160] sm:$0xff] }
 0x48f   : > { %v3125_v42 = vadd.f32 %v3124_v36, %v6917_v26  ;;  %3841 = vmatpush1.xpose.msra.mxu0 %v1379_v7  ;;  %3941 = vmatpush1.xpose.msra.mxu1 %v1381_v17  ;;  %v4383_v26 = vld [vmem:[%s7303_s0 + $0xa8] sm:$0xff]  ;;  %v4392_v53 = vld [vmem:[%s7303_s0 + $0x238] sm:$0xff] }
 0x490   : > { %3842 = vmatprep.subr.mxu0 %v1356_v52  ;;  %3942 = vmatprep.subr.mxu1 %v1358_v38  ;;  %v3126_v15 = vpop.f32.mrf.mxu0  ;;  %v3226_v60 = vpop.f32.mrf.mxu1  ;;  %v4391_v36 = vld [vmem:[%s7303_s0 + $0x228] sm:$0xff] }
 0x491   : > { %v7084_v46 = vadd.f32 %v3224_v19, %v3125_v42  ;;  %3892 = vmatprep.mubr.f32.mxu0 %v4383_v26  ;;  %3992 = vmatprep.mubr.f32.mxu1 %v4384_v32 }
 0x493   : > { %3843 = vmatpush1.xpose.msra.mxu0 %v1355_v61  ;;  %3943 = vmatpush1.xpose.msra.mxu1 %v1357_v44  ;;  %v4393_v44 = vld [vmem:[%s7303_s0 + $0x220] sm:$0xff] }
 0x494   : > { %3844 = vmatprep.subr.mxu0 %v1332_v59  ;;  %3944 = vmatprep.subr.mxu1 %v1334_v16  ;;  %v4395_v59 = vld [vmem:[%s7303_s0 + $0x2e8] sm:$0xff]  ;;  %v4396_v16 = vld [vmem:[%s7303_s0 + $0x2f8] sm:$0xff] }
 0x497   : > { %3845 = vmatpush1.xpose.msra.mxu0 %v1331_v58  ;;  %3945 = vmatpush1.xpose.msra.mxu1 %v1333_v1 }
 0x498   : > { %3846 = vmatprep.subr.mxu0 %v1308_v45  ;;  %3946 = vmatprep.subr.mxu1 %v1310_v47  ;;  %v4397_v45 = vld [vmem:[%s7303_s0 + $0x2e0] sm:$0xff] }
 0x49b   : > { %3847 = vmatpush1.xpose.msra.mxu0 %v1307_v20  ;;  %3947 = vmatpush1.xpose.msra.mxu1 %v1309_v51  ;;  %v4399_v51 = vld [vmem:[%s7303_s0 + $0x3a8] sm:$0xff] }
 0x49c   : > { %3848 = vmatprep.subr.mxu0 %v1284_v5  ;;  %3948 = vmatprep.subr.mxu1 %v1286_v27  ;;  %v4400_v5 = vld [vmem:[%s7303_s0 + $0x3b8] sm:$0xff] }
 0x49f   : > { %3849 = vmatpush1.xpose.msra.mxu0 %v1283_v37  ;;  %3949 = vmatpush1.xpose.msra.mxu1 %v1285_v62 }
 0x4a0   : > { %3850 = vmatprep.subr.mxu0 %v1260_v3  ;;  %3950 = vmatprep.subr.mxu1 %v1262_v18  ;;  %v4401_v18 = vld [vmem:[%s7303_s0 + $0x3a0] sm:$0xff] }
 0x4a3   : > { %3851 = vmatpush1.xpose.msra.mxu0 %v1259_v13  ;;  %3951 = vmatpush1.xpose.msra.mxu1 %v1261_v48 }
 0x4a4   : > { %3852 = vmatprep.subr.mxu0 %v1236_v33  ;;  %3952 = vmatprep.subr.mxu1 %v1238_v10  ;;  %v4403_v33 = vld [vmem:[%s7303_s0 + $0x468] sm:$0xff]  ;;  %v4404_v10 = vld [vmem:[%s7303_s0 + $0x478] sm:$0xff] }
 0x4a7   : > { %3853 = vmatpush1.xpose.msra.mxu0 %v1235_v22  ;;  %3953 = vmatpush1.xpose.msra.mxu1 %v1237_v0 }
 0x4a8   : > { %3854 = vmatprep.subr.mxu0 %v1212_v55  ;;  %3954 = vmatprep.subr.mxu1 %v1214_v40 }
 0x4ab   : > { %3855 = vmatpush1.xpose.msra.mxu0 %v1211_v4  ;;  %3955 = vmatpush1.xpose.msra.mxu1 %v1213_v49  ;;  %v4405_v4 = vld [vmem:[%s7303_s0 + $0x460] sm:$0xff] }
 0x4ac   : > { %3856 = vmatprep.subr.mxu0 %v1188_v8  ;;  %3956 = vmatprep.subr.mxu1 %v1190_v41  ;;  %v4407_v41 = vld [vmem:[%s7303_s0 + $0x528] sm:$0x1] }
 0x4af   : > { %3857 = vmatpush1.xpose.msra.mxu0 %v1187_v21  ;;  %3957 = vmatpush1.xpose.msra.mxu1 %v1189_v30  ;;  %v4408_v21 = vld [vmem:[%s7303_s0 + $0x538] sm:$0x1] }
 0x4b0   : > { %3858 = vmatprep.subr.mxu0 %v1164_v54  ;;  %3958 = vmatprep.subr.mxu1 %v1166_v28 }
 0x4b3   : > { %3859 = vmatpush1.xpose.msra.mxu0 %v1163_v14  ;;  %3959 = vmatpush1.xpose.msra.mxu1 %v1165_v31  ;;  %v4409_v31 = vld [vmem:[%s7303_s0 + $0x520] sm:$0x1] }
 0x4b6   : > { %v3294_v34 = vpop.f32.mrf.mxu0  ;;  %3893 = vmatmul.mubr.f32.vlgmr.msra.gmra.mxu0 %v4385_v23  ;;  %3993 = vmatmul.mubr.f32.vlgmr.msra.gmra.mxu1 %v4386_v9  ;;  %v3394_v39 = vpop.f32.mrf.mxu1 }
 0x4b7   : > { %v3295_v24 = vadd.f32 %v3294_v34, %v6973_v12  ;;  %3897 = vmatprep.mubr.f32.mxu0 %v4387_v29  ;;  %3997 = vmatprep.mubr.f32.mxu1 %v4388_v56  ;;  %v4390_v12 = vld [vmem:[%s7303_s0 + $0x170] sm:$0xff] }
 0x4b8   : > { %v3296_v25 = vpop.f32.mrf.mxu0  ;;  %v3396_v11 = vpop.f32.mrf.mxu1 }
 0x4b9   : > { %v7137_v7 = vadd.f32 %v3394_v39, %v3295_v24 }
 0x4ba   : > { %v3299_v17 = vpop.f32.mrf.mxu0  ;;  %3898 = vmatmul.mubr.f32.gmra.mxu0 %v4389_v6  ;;  %3998 = vmatmul.mubr.f32.gmra.mxu1 %v4390_v12  ;;  %v3399_v52 = vpop.f32.mrf.mxu1 }
 0x4bb   : > { %v3300_v38 = vadd.f32 %v3299_v17, %v6992_v63  ;;  %3902 = vmatprep.mubr.f32.mxu0 %v4391_v36  ;;  %4002 = vmatprep.mubr.f32.mxu1 %v4392_v53  ;;  %v4394_v63 = vld [vmem:[%s7303_s0 + $0x230] sm:$0xff] }
 0x4bc   : > { %v3301_v19 = vpop.f32.mrf.mxu0  ;;  %v3401_v57 = vpop.f32.mrf.mxu1 }
 0x4bd   : > { %v7152_v42 = vadd.f32 %v3399_v52, %v3300_v38 }
 0x4be   : > { %v3304_v61 = vpop.f32.mrf.mxu0  ;;  %3903 = vmatmul.mubr.f32.gmra.mxu0 %v4393_v44  ;;  %4003 = vmatmul.mubr.f32.gmra.mxu1 %v4394_v63  ;;  %v3404_v15 = vpop.f32.mrf.mxu1 }
 0x4bf   : > { %v3305_v60 = vadd.f32 %v3304_v61, %v7011_v2  ;;  %3907 = vmatprep.mubr.f32.mxu0 %v4395_v59  ;;  %4007 = vmatprep.mubr.f32.mxu1 %v4396_v16  ;;  %v4398_v2 = vld [vmem:[%s7303_s0 + $0x2f0] sm:$0xff] }
 0x4c0   : > { %v3306_v26 = vpop.f32.mrf.mxu0  ;;  %v3406_v32 = vpop.f32.mrf.mxu1 }
 0x4c1   : > { %v7167_v58 = vadd.f32 %v3404_v15, %v3305_v60 }
 0x4c2   : > { %v3309_v1 = vpop.f32.mrf.mxu0  ;;  %3908 = vmatmul.mubr.f32.gmra.mxu0 %v4397_v45  ;;  %4008 = vmatmul.mubr.f32.gmra.mxu1 %v4398_v2  ;;  %v3409_v47 = vpop.f32.mrf.mxu1 }
 0x4c3   : > { %v3310_v20 = vadd.f32 %v3309_v1, %v7030_v43  ;;  %3912 = vmatprep.mubr.f32.mxu0 %v4399_v51  ;;  %4012 = vmatprep.mubr.f32.mxu1 %v4400_v5  ;;  %v4402_v43 = vld [vmem:[%s7303_s0 + $0x3b0] sm:$0xff] }
 0x4c4   : > { %v3311_v27 = vpop.f32.mrf.mxu0  ;;  %v3411_v37 = vpop.f32.mrf.mxu1 }
 0x4c5   : > { %v3410_v62 = vadd.f32 %v3409_v47, %v3310_v20 }
 0x4c6   : > { %v3314_v3 = vpop.f32.mrf.mxu0  ;;  %3913 = vmatmul.mubr.f32.gmra.mxu0 %v4401_v18  ;;  %4013 = vmatmul.mubr.f32.gmra.mxu1 %v4402_v43  ;;  %v3414_v13 = vpop.f32.mrf.mxu1 }
 0x4c7   : > { %v3315_v48 = vadd.f32 %v3314_v3, %v7049_v35  ;;  %3917 = vmatprep.mubr.f32.mxu0 %v4403_v33  ;;  %4017 = vmatprep.mubr.f32.mxu1 %v4404_v10  ;;  %v4406_v35 = vld [vmem:[%s7303_s0 + $0x470] sm:$0xff] }
 0x4c8   : > { %v3316_v22 = vpop.f32.mrf.mxu0  ;;  %v3416_v0 = vpop.f32.mrf.mxu1 }
 0x4c9   : > { %v3415_v55 = vadd.f32 %v3414_v13, %v3315_v48 }
 0x4ca   : > { %v3319_v40 = vpop.f32.mrf.mxu0  ;;  %3918 = vmatmul.mubr.f32.gmra.mxu0 %v4405_v4  ;;  %4018 = vmatmul.mubr.f32.gmra.mxu1 %v4406_v35  ;;  %v3419_v49 = vpop.f32.mrf.mxu1 }
 0x4cb   : > { %v3320_v8 = vadd.f32 %v3319_v40, %v7068_v50  ;;  %3922 = vmatprep.mubr.f32.mxu0 %v4407_v41  ;;  %4022 = vmatprep.mubr.f32.mxu1 %v4408_v21  ;;  %v4410_v50 = vld [vmem:[%s7303_s0 + $0x530] sm:$0x1] }
 0x4cc   : > { %v3321_v30 = vpop.f32.mrf.mxu0  ;;  %v3421_v54 = vpop.f32.mrf.mxu1 }
 0x4cd   : > { %v3420_v28 = vadd.f32 %v3419_v49, %v3320_v8 }
 0x4ce   : > { %v3324_v14 = vpop.f32.mrf.mxu0  ;;  %3923 = vmatmul.mubr.f32.gmra.mxu0 %v4409_v31  ;;  %4023 = vmatmul.mubr.f32.gmra.mxu1 %v4410_v50  ;;  %v3424_v34 = vpop.f32.mrf.mxu1 }
 0x4cf   : > { %v3325_v23 = vadd.f32 %v3324_v14, %v7084_v46 }
 0x4d0   : > { %v3326_v9 = vpop.f32.mrf.mxu0  ;;  %v3426_v39 = vpop.f32.mrf.mxu1 }
 0x4d1   : > { %v3425_v24 = vadd.f32 %v3424_v34, %v3325_v23 }
 0x4f6   : > { %v3494_v29 = vpop.f32.mrf.mxu0  ;;  %v3594_v56 = vpop.f32.mrf.mxu1 }
 0x4f7   : > { %v3495_v25 = vadd.f32 %v3494_v29, %v7137_v7 }
 0x4f8   : > { %v3496_v11 = vpop.f32.mrf.mxu0  ;;  %v3596_v17 = vpop.f32.mrf.mxu1 }
 0x4f9   : > { %v7216_v6 = vadd.f32 %v3594_v56, %v3495_v25 }
 0x4fa   : > { %v3499_v12 = vpop.f32.mrf.mxu0  ;;  %v3599_v52 = vpop.f32.mrf.mxu1 }
 0x4fb   : > { %v3500_v38 = vadd.f32 %v3499_v12, %v7152_v42 }
 0x4fc   : > { %v3501_v36 = vpop.f32.mrf.mxu0  ;;  %v3601_v53 = vpop.f32.mrf.mxu1 }
 0x4fd   : > { %v3600_v19 = vadd.f32 %v3599_v52, %v3500_v38 }
 0x4fe   : > { %v3504_v57 = vpop.f32.mrf.mxu0  ;;  %v3604_v46 = vpop.f32.mrf.mxu1 }
 0x4ff   : > { %v3505_v61 = vadd.f32 %v3504_v57, %v7167_v58 }
 0x500   : > { %v3506_v44 = vpop.f32.mrf.mxu0  ;;  %v3606_v63 = vpop.f32.mrf.mxu1 }
 0x501   : > { %v3605_v15 = vadd.f32 %v3604_v46, %v3505_v61 }
 0x502   : > { %v3509_v60 = vpop.f32.mrf.mxu0  ;;  %v3609_v7 = vpop.f32.mrf.mxu1 }
 0x503   : > { %v3510_v59 = vadd.f32 %v3509_v60, %v3410_v62 }
 0x504   : > { %v3511_v16 = vpop.f32.mrf.mxu0  ;;  %v3611_v26 = vpop.f32.mrf.mxu1 }
 0x505   : > { %v7220_v32 = vadd.f32 %v3609_v7, %v3510_v59 }
 0x506   : > { %v3514_v1 = vpop.f32.mrf.mxu0  ;;  %v3614_v45 = vpop.f32.mrf.mxu1 }
 0x507   : > { %v3515_v42 = vadd.f32 %v3514_v1, %v3415_v55 }
 0x508   : > { %v3516_v2 = vpop.f32.mrf.mxu0  ;;  %v3616_v47 = vpop.f32.mrf.mxu1 }
 0x509   : > { %v7222_v20 = vadd.f32 %v3614_v45, %v3515_v42 }
 0x50a   : > { %v3519_v51 = vpop.f32.mrf.mxu0  ;;  %v3619_v5 = vpop.f32.mrf.mxu1 }
 0x50b   : > { %v3520_v58 = vadd.f32 %v3519_v51, %v3420_v28 }
 0x50c   : > { %v3521_v27 = vpop.f32.mrf.mxu0  ;;  %v3621_v37 = vpop.f32.mrf.mxu1 }
 0x50d   : > { %v7224_v3 = vadd.f32 %v3619_v5, %v3520_v58 }
 0x50e   : > { %v3524_v18 = vpop.f32.mrf.mxu0  ;;  %v3624_v62 = vpop.f32.mrf.mxu1 }
 0x50f   : > { %v3525_v43 = vadd.f32 %v3524_v18, %v3425_v24 }
 0x510   : > { %v3526_v13 = vpop.f32.mrf.mxu0  ;;  %v3626_v48 = vpop.f32.mrf.mxu1 }
 0x511   : > { %v7226_v33 = vadd.f32 %v3624_v62, %v3525_v43 }
 0x536   : > { %v3694_v10 = vpop.f32.mrf.mxu0  ;;  %v3794_v22 = vpop.f32.mrf.mxu1 }
 0x537   : > { %v3695_v52 = vadd.f32 %v3694_v10, %v7216_v6 }
 0x538   : > { %v3696_v0 = vpop.f32.mrf.mxu0  ;;  %v3796_v55 = vpop.f32.mrf.mxu1 }
 0x539   : > { %v3795_v38 = vadd.f32 %v3794_v22, %v3695_v52 }
 0x53a   : > { %v3699_v40 = vpop.f32.mrf.mxu0  ;;  %v3799_v4 = vpop.f32.mrf.mxu1 }
 0x53b   : > { %v3700_v36 = vadd.f32 %v3699_v40, %v3600_v19 }
 0x53c   : > { %v3701_v35 = vpop.f32.mrf.mxu0  ;;  %v3801_v49 = vpop.f32.mrf.mxu1 }
 0x53d   : > { %v3800_v63 = vadd.f32 %v3799_v4, %v3700_v36  ;;  %v4091_v36 = vld [vmem:[%s6612_s18 + $0x50] sm:$0xff] (%p7404_p10) }
 0x53e   : > { %v3704_v8 = vpop.f32.mrf.mxu0  ;;  %v3804_v41 = vpop.f32.mrf.mxu1  ;;  %4092 = vst [vmem:[%s7252_s11 + $0x98] sm:$0xff] (%p7404_p10), %v4091_v36 }
 0x53f   : > { %v3705_v60 = vadd.f32 %v3704_v8, %v3605_v15 }
 0x540   : > { %v3706_v21 = vpop.f32.mrf.mxu0  ;;  %v3806_v30 = vpop.f32.mrf.mxu1 }
 0x541   : > { %v3805_v42 = vadd.f32 %v3804_v41, %v3705_v60 }
 0x542   : > { %v3709_v54 = vpop.f32.mrf.mxu0  ;;  %v3809_v28 = vpop.f32.mrf.mxu1 }
 0x543   : > { %v3710_v6 = vadd.f32 %v3709_v54, %v7220_v32 }
 0x544   : > { %v3711_v14 = vpop.f32.mrf.mxu0  ;;  %v3811_v31 = vpop.f32.mrf.mxu1 }
 0x545   : > { %v3810_v15 = vadd.f32 %v3809_v28, %v3710_v6 }
 0x546   : > { %v3714_v50 = vpop.f32.mrf.mxu0  ;;  %v3814_v34 = vpop.f32.mrf.mxu1 }
 0x547   : > { %v3715_v27 = vadd.f32 %v3714_v50, %v7222_v20 }
 0x548   : > { %v3716_v23 = vpop.f32.mrf.mxu0  ;;  %v3816_v9 = vpop.f32.mrf.mxu1 }
 0x549   : > { %v3815_v32 = vadd.f32 %v3814_v34, %v3715_v27 }
 0x54a   : > { %v3719_v39 = vpop.f32.mrf.mxu0  ;;  %v3819_v24 = vpop.f32.mrf.mxu1 }
 0x54b   : > { %v3720_v10 = vadd.f32 %v3719_v39, %v7224_v3 }
 0x54c   : > { %v3721_v29 = vpop.f32.mrf.mxu0  ;;  %v3821_v56 = vpop.f32.mrf.mxu1 }
 0x54d   : > { %v3820_v20 = vadd.f32 %v3819_v24, %v3720_v10  ;;  %v4073_v24 = vld [vmem:[%s6612_s18 + $0x8] sm:$0xff] (%p7404_p10)  ;;  %v4077_v56 = vld [vmem:[%s6612_s18 + $0x18] sm:$0xff] (%p7404_p10) }
 0x54e   : > { %v3724_v25 = vpop.f32.mrf.mxu0  ;;  %v3824_v11 = vpop.f32.mrf.mxu1  ;;  %4074 = vst [vmem:[%s7252_s11 + $0x8] sm:$0xff] (%p7404_p10), %v4073_v24  ;;  %4078 = vst [vmem:[%s7252_s11 + $0x30] sm:$0xff] (%p7404_p10), %v4077_v56 }
 0x54f   : > { %v3725_v49 = vadd.f32 %v3724_v25, %v7226_v33  ;;  %v4071_v33 = vld [vmem:[%s6612_s18] sm:$0xff] (%p7404_p10) }
 0x550   : > { %v3726_v17 = vpop.f32.mrf.mxu0  ;;  %v3826_v12 = vpop.f32.mrf.mxu1  ;;  %v4079_v25 = vld [vmem:[%s6612_s18 + $0x20] sm:$0xff] (%p7404_p10)  ;;  %4072 = vst [vmem:[%s7252_s11] sm:$0xff] (%p7404_p10), %v4071_v33 }
 0x551   : > { %v3825_v3 = vadd.f32 %v3824_v11, %v3725_v49  ;;  %v4083_v17 = vld [vmem:[%s6612_s18 + $0x30] sm:$0xff] (%p7404_p10)  ;;  %v4085_v12 = vld [vmem:[%s6612_s18 + $0x38] sm:$0xff] (%p7404_p10)  ;;  %4080 = vst [vmem:[%s7252_s11 + $0x38] sm:$0xff] (%p7404_p10), %v4079_v25 }
 0x552   : > { %4084 = vst [vmem:[%s7252_s11 + $0x60] sm:$0xff] (%p7404_p10), %v4083_v17  ;;  %4086 = vst [vmem:[%s7252_s11 + $0x68] sm:$0xff] (%p7404_p10), %v4085_v12 }
 0x576   : > { %v3894_v53 = vpop.f32.mrf.mxu0  ;;  %v3994_v57 = vpop.f32.mrf.mxu1 }
 0x577   : > { %v3895_v46 = vadd.f32 %v3894_v53, %v3795_v38  ;;  %v4089_v38 = vld [vmem:[%s6612_s18 + $0x48] sm:$0xff] (%p7404_p10) }
 0x578   : > { %v3896_v61 = vpop.f32.mrf.mxu0  ;;  %v3996_v44 = vpop.f32.mrf.mxu1  ;;  %4090 = vst [vmem:[%s7252_s11 + $0x90] sm:$0xff] (%p7404_p10), %v4089_v38 }
 0x579   : > { %v3995_v7 = vadd.f32 %v3994_v57, %v3895_v46  ;;  %v4095_v57 = vld [vmem:[%s6612_s18 + $0x60] sm:$0xff] (%p7404_p10)  ;;  %v4097_v46 = vld [vmem:[%s6612_s18 + $0x68] sm:$0xff] (%p7404_p10)  ;;  %v4101_v44 = vld [vmem:[%s6612_s18 + $0x78] sm:$0xff] (%p7404_p10) }
 0x57a   : > { %v3899_v59 = vpop.f32.mrf.mxu0  ;;  %v3999_v16 = vpop.f32.mrf.mxu1  ;;  %4096 = vst [vmem:[%s7252_s11 + $0xc0] sm:$0xff] (%p7404_p10), %v4095_v57  ;;  %4098 = vst [vmem:[%s7252_s11 + $0xc8] sm:$0xff] (%p7404_p10), %v4097_v46 }
 0x57b   : > { %4030 = vst [vmem:[%s6612_s18 + $0x10] sm:$0xff] %v3995_v7  ;;  %v3900_v26 = vadd.f32 %v3899_v59, %v3800_v63  ;;  %v4103_v63 = vld [vmem:[%s6612_s18 + $0x80] sm:$0xff] (%p7404_p10)  ;;  %4102 = vst [vmem:[%s7252_s11 + $0xf0] sm:$0xff] (%p7404_p10), %v4101_v44  ;;  %v4107_v7 = vld [vmem:[%s6612_s18 + $0x90] sm:$0xff] (%p7404_p10) }
 0x57c   : > { %v3901_v1 = vpop.f32.mrf.mxu0  ;;  %v4001_v45 = vpop.f32.mrf.mxu1  ;;  %4104 = vst [vmem:[%s7252_s11 + $0xf8] sm:$0xff] (%p7404_p10), %v4103_v63  ;;  %v4109_v59 = vld [vmem:[%s6612_s18 + $0x98] sm:$0xff] (%p7404_p10)  ;;  %4108 = vst [vmem:[%s7252_s11 + $0x120] sm:$0xff] (%p7404_p10), %v4107_v7 }
 0x57d   : > { %v4000_v19 = vadd.f32 %v3999_v16, %v3900_v26  ;;  %4110 = vst [vmem:[%s7252_s11 + $0x128] sm:$0xff] (%p7404_p10), %v4109_v59 }
 0x57e   : > { %v3904_v2 = vpop.f32.mrf.mxu0  ;;  %v4004_v47 = vpop.f32.mrf.mxu1 }
 0x57f   : > { %4033 = vst [vmem:[%s6612_s18 + $0x28] sm:$0xff] %v4000_v19  ;;  %v3905_v51 = vadd.f32 %v3904_v2, %v3805_v42 }
 0x580   : > { %v3906_v5 = vpop.f32.mrf.mxu0  ;;  %v4006_v58 = vpop.f32.mrf.mxu1 }
 0x581   : > { %v4005_v37 = vadd.f32 %v4004_v47, %v3905_v51 }
 0x582   : > { %v3909_v18 = vpop.f32.mrf.mxu0  ;;  %v4009_v62 = vpop.f32.mrf.mxu1  ;;  %v4075_v29 = vld [vmem:[%s6612_s18 + $0x10] sm:$0xff] (%p7404_p10) }
 0x583   : > { %4036 = vst [vmem:[%s6612_s18 + $0x40] sm:$0xff] %v4005_v37  ;;  %v3910_v43 = vadd.f32 %v3909_v18, %v3810_v15  ;;  %4076 = vst [vmem:[%s7252_s11 + $0x10] sm:$0xff] (%p7404_p10), %v4075_v29 }
 0x584   : > { %v3911_v13 = vpop.f32.mrf.mxu0  ;;  %v4011_v48 = vpop.f32.mrf.mxu1 }
 0x585   : > { %v4010_v22 = vadd.f32 %v4009_v62, %v3910_v43 }
 0x586   : > { %v3914_v0 = vpop.f32.mrf.mxu0  ;;  %v4014_v55 = vpop.f32.mrf.mxu1  ;;  %v4081_v11 = vld [vmem:[%s6612_s18 + $0x28] sm:$0xff] (%p7404_p10) }
 0x587   : > { %4039 = vst [vmem:[%s6612_s18 + $0x58] sm:$0xff] %v4010_v22  ;;  %v3915_v40 = vadd.f32 %v3914_v0, %v3815_v32  ;;  %4082 = vst [vmem:[%s7252_s11 + $0x40] sm:$0xff] (%p7404_p10), %v4081_v11 }
 0x588   : > { %v3916_v4 = vpop.f32.mrf.mxu0  ;;  %v4016_v35 = vpop.f32.mrf.mxu1 }
 0x589   : > { %v4015_v8 = vadd.f32 %v4014_v55, %v3915_v40 }
 0x58a   : > { %v3919_v41 = vpop.f32.mrf.mxu0  ;;  %v4019_v21 = vpop.f32.mrf.mxu1  ;;  %v4087_v52 = vld [vmem:[%s6612_s18 + $0x40] sm:$0xff] (%p7404_p10) }
 0x58b   : > { %4042 = vst [vmem:[%s6612_s18 + $0x70] sm:$0xff] %v4015_v8  ;;  %v3920_v30 = vadd.f32 %v3919_v41, %v3820_v20  ;;  %4088 = vst [vmem:[%s7252_s11 + $0x70] sm:$0xff] (%p7404_p10), %v4087_v52 }
 0x58c   : > { %v3921_v54 = vpop.f32.mrf.mxu0  ;;  %v4021_v28 = vpop.f32.mrf.mxu1 }
 0x58d   : > { %v4020_v14 = vadd.f32 %v4019_v21, %v3920_v30 }
 0x58e   : > { %v3924_v31 = vpop.f32.mrf.mxu0  ;;  %v4024_v50 = vpop.f32.mrf.mxu1  ;;  %v4093_v53 = vld [vmem:[%s6612_s18 + $0x58] sm:$0xff] (%p7404_p10) }
 0x58f   : > { %4045 = vst [vmem:[%s6612_s18 + $0x88] sm:$0xff] %v4020_v14  ;;  %v3925_v34 = vadd.f32 %v3924_v31, %v3825_v3  ;;  %4055 = sbr.rel (!%p7404_p10) target bundleno = 1436 (0x59c), region = 40  ;;  %4094 = vst [vmem:[%s7252_s11 + $0xa0] sm:$0xff] (%p7404_p10), %v4093_v53 }
 0x590   : > { %v3926_v23 = vpop.f32.mrf.mxu0  ;;  %v4026_v9 = vpop.f32.mrf.mxu1 }
 0x591   : > { %v4025_v39 = vadd.f32 %v4024_v50, %v3925_v34 }
 0x592   : > { %v4099_v61 = vld [vmem:[%s6612_s18 + $0x70] sm:$0xff] (%p7404_p10) }
 0x593   : > { %4048 = vst [vmem:[%s6612_s18 + $0xa0] sm:$0x1] %v4025_v39  ;;  %4100 = vst [vmem:[%s7252_s11 + $0xd0] sm:$0xff] (%p7404_p10), %v4099_v61 }
 0x596   : > { %v4105_v60 = vld [vmem:[%s6612_s18 + $0x88] sm:$0xff] }
 0x597   : > { %4106 = vst [vmem:[%s7252_s11 + $0x100] sm:$0xff] %v4105_v60 }
 0x59a   : > { %v4111_v16 = vld [vmem:[%s6612_s18 + $0xa0] sm:$0xff] }
 0x59b   : > { %4112 = vst [vmem:[%s7252_s11 + $0x130] sm:$0xff] %v4111_v16 }
 0x59c PF: > { %p13_p2 = scmp.ge.s32.totalorder %s4520_s17, 4   ;;  %s7405_s12 = smov %s4465_s13 }
 0x59d   : > { %s7406_s13 = smov %s4469_s14  ;;  %s7407_s14 = smov %s4530_s20 }
 0x59e   : > { %s7408_s15 = smov %s4520_s17  ;;  %15 = sbr.rel (!%p13_p2) target bundleno = 3 (0x3), region = 98 }
 0x5a3   :  { %4128 = vsyncpa [#allocation3], 1 }
 0x5a4   :  { %4130 = vsyncpa [#allocation3 + $0x1], 1 }

</bundles_post_ra>
